<compile_context>
chip_gen: v6e
topology: v6e:2x2x1
jax: 0.10.0
libtpu: 0.0.40
codegen_flags: <defaults>
</compile_context>

<pallas_src>
import functools
import math

import jax
import jax.numpy as jnp
from jax.experimental import pallas as pl
from jax.experimental.pallas import tpu as pltpu

LN_EPS = 1e-5
MASK_BIAS = -1e10


def _encoder_layer_kernel(xq_ref, xkv_ref, bias_ref,
                          wq_ref, bq_ref, wkv_ref, bkv_ref,
                          wo_ref, bo_ref, w1_ref, b1_ref, w2_ref, b2_ref,
                          g_ref, beta_ref,
                          out_ref,
                          q_scr, m_scr, l_scr, acc_scr,
                          *, n_heads, compute_dtype):
    ki = pl.program_id(2)
    nk = pl.num_programs(2)

    TQ, H = xq_ref.shape[1], xq_ref.shape[2]
    TK = xkv_ref.shape[1]
    hd = H // n_heads
    inv_scale = 1.0 / math.sqrt(hd)

    # ---- once per (batch, q-tile): q projection + online-softmax init ----
    @pl.when(ki == 0)
    def _init():
        x_q = xq_ref[0].astype(compute_dtype)                        # (TQ, H)
        qall = jnp.dot(x_q, wq_ref[...],
                       preferred_element_type=jnp.float32) + bq_ref[...]
        qall = qall * inv_scale                    # pre-scale q (not the scores)
        qh = jnp.swapaxes(qall.reshape(TQ, n_heads, hd), 0, 1)       # (nh,TQ,hd)
        q_scr[...] = qh.astype(compute_dtype)
        m_scr[...] = jnp.full(m_scr.shape, -jnp.inf, dtype=m_scr.dtype)
        l_scr[...] = jnp.zeros(l_scr.shape, dtype=l_scr.dtype)
        acc_scr[...] = jnp.zeros(acc_scr.shape, dtype=acc_scr.dtype)

    # ---- per key block: K/V projected straight into (nh, hd, TK) layout ----
    x_k = xkv_ref[0].astype(compute_dtype)                           # (TK, H)
    kv = jax.lax.dot_general(                                        # (2H, TK)
        wkv_ref[...], x_k,
        dimension_numbers=(((1,), (1,)), ((), ())),
        preferred_element_type=jnp.float32) + bkv_ref[...]
    kT = kv[:H].reshape(n_heads, hd, TK).astype(compute_dtype)       # (nh,hd,TK)
    vT = kv[H:].reshape(n_heads, hd, TK).astype(compute_dtype)       # (nh,hd,TK)

    # ---- flash-style online softmax over key blocks ----
    s = jax.lax.dot_general(                                         # (nh,TQ,TK)
        q_scr[...], kT,
        dimension_numbers=(((2,), (1,)), ((0,), (0,))),
        preferred_element_type=jnp.float32)
    s = s + bias_ref[0, 0]                     # additive mask bias (0 / -1e10)

    m_prev = m_scr[...]
    m_new = jnp.maximum(m_prev, jnp.max(s, axis=-1, keepdims=True))
    alpha = jnp.exp(m_prev - m_new)
    p = jnp.exp(s - m_new)                                           # f32
    l_scr[...] = alpha * l_scr[...] + jnp.sum(p, axis=-1, keepdims=True)
    pv = jax.lax.dot_general(                                        # (nh,TQ,hd)
        p.astype(compute_dtype), vT,
        dimension_numbers=(((2,), (2,)), ((0,), (0,))),
        preferred_element_type=jnp.float32)
    acc_scr[...] = alpha * acc_scr[...] + pv
    m_scr[...] = m_new

    # ---- last key block: out-proj, residual+LN, FFN, residual+LN ----
    @pl.when(ki == nk - 1)
    def _finalize():
        gamma = g_ref[...]
        beta = beta_ref[...]

        def layer_norm(v):                       # v: (TQ, H) f32
            mu = jnp.mean(v, axis=-1, keepdims=True)
            var = jnp.mean((v - mu) ** 2, axis=-1, keepdims=True)
            return (v - mu) * jax.lax.rsqrt(var + LN_EPS) * gamma + beta

        ctx = acc_scr[...] * pl.reciprocal(l_scr[...], approx=True)  # (nh,TQ,hd)
        # output projection: per-head batched matmul + sum over heads
        # (no (nh,TQ,hd) -> (TQ,H) activation relayout).
        sa_h = jax.lax.dot_general(                                  # (nh,TQ,H)
            ctx.astype(compute_dtype), wo_ref[...],
            dimension_numbers=(((2,), (1,)), ((0,), (0,))),
            preferred_element_type=jnp.float32)
        sa = jnp.sum(sa_h, axis=0) + bo_ref[...]                     # (TQ, H)

        # TODO(synk): dropout is identity (eval mode); no RNG-based dropout.
        x1 = layer_norm(xq_ref[0] + sa)

        h1 = jnp.dot(x1.astype(compute_dtype), w1_ref[...],
                     preferred_element_type=jnp.float32) + b1_ref[...]
        h1 = jnp.maximum(h1, 0.0)
        ff = jnp.dot(h1.astype(compute_dtype), w2_ref[...],
                     preferred_element_type=jnp.float32) + b2_ref[...]

        out_ref[0] = layer_norm(x1 + ff).astype(out_ref.dtype)


def encoder_layer(src, src_mask, params, *, n_heads,
                  compute_dtype=jnp.bfloat16, out_dtype=None,
                  q_block=256, kv_block=256):
    B, S, H = src.shape
    assert H % n_heads == 0
    hd = H // n_heads
    pf_dim = params["w1"].shape[1]
    if out_dtype is None:
        out_dtype = src.dtype

    TQ = min(q_block, S)
    TK = min(kv_block, S)
    # TODO(synk): pad ragged S (and H/head_dim to 128) instead of asserting.
    assert S % TQ == 0 and S % TK == 0, "S must be a multiple of the tile sizes"
    nq, nk = S // TQ, S // TK

    f32 = jnp.float32
    # One-time head-major weight packing in the wrapper.
    wq = params["wq"].astype(compute_dtype)                          # (H, H)
    bq = params["bq"].reshape(1, H).astype(f32)
    wkv = jnp.concatenate([params["wk"].T, params["wv"].T],
                          axis=0).astype(compute_dtype)              # (2H, H)
    bkv = jnp.concatenate([params["bk"], params["bv"]]
                          ).reshape(2 * H, 1).astype(f32)
    wo_h = params["wo"].reshape(n_heads, hd, H).astype(compute_dtype)
    bo = params["bo"].reshape(1, H).astype(f32)
    w1 = params["w1"].astype(compute_dtype)
    b1 = params["b1"].reshape(1, pf_dim).astype(f32)
    w2 = params["w2"].astype(compute_dtype)
    b2 = params["b2"].reshape(1, H).astype(f32)
    g = params["ln_g"].reshape(1, H).astype(f32)
    beta = params["ln_b"].reshape(1, H).astype(f32)

    # Pre-baked additive mask bias; each key block is a full static lane slab.
    bias = jnp.where(src_mask.reshape(B, S) > 0.0, 0.0, MASK_BIAS)
    bias = bias.reshape(B, nk, 1, TK).astype(f32)

    flops = B * (4 * S * H * H                  # q + output projections
                 + nq * 4 * S * H * H           # k/v projections (per q tile)
                 + 4 * S * S * H                # qk^T + pv
                 + 4 * S * H * pf_dim)          # feed-forward
    weight_bytes = sum(int(a.size) * a.dtype.itemsize
                       for a in (wq, bq, wkv, bkv, wo_h, bo, w1, b1, w2, b2, g, beta))
    bytes_accessed = int((1 + nq) * src.size * src.dtype.itemsize
                         + B * S * H * jnp.dtype(out_dtype).itemsize
                         + bias.size * 4 + weight_bytes)
    cost = pl.CostEstimate(flops=int(flops),
                           transcendentals=int(B * n_heads * S * S),
                           bytes_accessed=bytes_accessed)

    kernel = functools.partial(_encoder_layer_kernel,
                               n_heads=n_heads, compute_dtype=compute_dtype)

    def build(weight_mode):
        def wspec(shape):
            nd = len(shape)
            idx = lambda b, qi, ki, _nd=nd: (0,) * _nd
            if weight_mode is None:
                return pl.BlockSpec(shape, idx)
            return pl.BlockSpec(shape, idx, pipeline_mode=weight_mode)

        in_specs = [
            pl.BlockSpec((1, TQ, H), lambda b, qi, ki: (b, qi, 0)),      # q rows
            pl.BlockSpec((1, TK, H), lambda b, qi, ki: (b, ki, 0)),      # k/v rows
            pl.BlockSpec((1, 1, 1, TK), lambda b, qi, ki: (b, ki, 0, 0)),  # mask bias
            wspec((H, H)), wspec((1, H)),                 # wq, bq
            wspec((2 * H, H)), wspec((2 * H, 1)),         # wkv (head-major), bkv
            wspec((n_heads, hd, H)), wspec((1, H)),       # wo (head-major), bo
            wspec((H, pf_dim)), wspec((1, pf_dim)),       # w1, b1
            wspec((pf_dim, H)), wspec((1, H)),            # w2, b2
            wspec((1, H)), wspec((1, H)),                 # ln gamma, beta
        ]

        return pl.pallas_call(
            kernel,
            out_shape=jax.ShapeDtypeStruct((B, S, H), out_dtype),
            grid=(B, nq, nk),
            in_specs=in_specs,
            out_specs=pl.BlockSpec((1, TQ, H), lambda b, qi, ki: (b, qi, 0)),
            scratch_shapes=[
                pltpu.VMEM((n_heads, TQ, hd), compute_dtype),   # scaled q
                pltpu.VMEM((n_heads, TQ, 1), jnp.float32),      # running max
                pltpu.VMEM((n_heads, TQ, 1), jnp.float32),      # running denom
                pltpu.VMEM((n_heads, TQ, hd), jnp.float32),     # running numerator
            ],
            compiler_params=pltpu.CompilerParams(
                dimension_semantics=("parallel", "parallel", "arbitrary"),
                vmem_limit_bytes=40 * 1024 * 1024),
            cost_estimate=cost,
        )(src, src, bias,
          wq, bq, wkv, bkv, wo_h, bo, w1, b1, w2, b2, g, beta)

    try:
        # Grid-invariant weights: single-buffer to halve their VMEM residency.
        return build(pl.Buffered(1))
    except Exception:
        # Fallback for jax versions without BlockSpec.pipeline_mode support.
        return build(None)


# --------------------------- pure-JAX reference ---------------------------
def encoder_layer_ref(src, src_mask, params, *, n_heads):
    B, S, H = src.shape
    hd = H // n_heads
    scale = jnp.sqrt(jnp.float32(hd))

    def ln(v):
        mu = jnp.mean(v, axis=-1, keepdims=True)
        var = jnp.mean((v - mu) ** 2, axis=-1, keepdims=True)
        return (v - mu) / jnp.sqrt(var + LN_EPS) * params["ln_g"] + params["ln_b"]

    q = src @ params["wq"] + params["bq"]
    k = src @ params["wk"] + params["bk"]
    v = src @ params["wv"] + params["bv"]
    q = q.reshape(B, S, n_heads, hd).transpose(0, 2, 1, 3)
    k = k.reshape(B, S, n_heads, hd).transpose(0, 2, 1, 3)
    v = v.reshape(B, S, n_heads, hd).transpose(0, 2, 1, 3)
    energy = jnp.einsum("bhqd,bhkd->bhqk", q, k) / scale
    energy = jnp.where(src_mask > 0.0, energy, -1e10)
    attn = jax.nn.softmax(energy, axis=-1)
    ctx = jnp.einsum("bhqk,bhkd->bhqd", attn, v)
    ctx = ctx.transpose(0, 2, 1, 3).reshape(B, S, H)
    sa = ctx @ params["wo"] + params["bo"]
    x1 = ln(src + sa)
    ff = jnp.maximum(x1 @ params["w1"] + params["b1"], 0.0) @ params["w2"] + params["b2"]
    return ln(x1 + ff)


if __name__ == "__main__":
    B, S, H = 2, 16, 32
    n_heads = 4
    pf_dim = 64

    key = jax.random.PRNGKey(0)
    keys = jax.random.split(key, 12)

    def init(k, shape, scale=0.1):
        return jax.random.normal(k, shape, dtype=jnp.float32) * scale

    params = {
        "wq": init(keys[0], (H, H)), "bq": jnp.zeros((H,), jnp.float32),
        "wk": init(keys[1], (H, H)), "bk": jnp.zeros((H,), jnp.float32),
        "wv": init(keys[2], (H, H)), "bv": jnp.zeros((H,), jnp.float32),
        "wo": init(keys[3], (H, H)), "bo": jnp.zeros((H,), jnp.float32),
        "w1": init(keys[4], (H, pf_dim)), "b1": init(keys[5], (pf_dim,), 0.01),
        "w2": init(keys[6], (pf_dim, H)), "b2": init(keys[7], (H,), 0.01),
        "ln_g": jnp.ones((H,), jnp.float32),
        "ln_b": jnp.zeros((H,), jnp.float32),
    }

    src = jax.random.normal(keys[8], (B, S, H), dtype=jnp.float32)
    # mask out the last 3 tokens of batch element 1
    valid = jnp.array([[1.0] * S, [1.0] * (S - 3) + [0.0] * 3], dtype=jnp.float32)
    src_mask = valid[:, None, None, :]   # (B, 1, 1, S)

    ref = encoder_layer_ref(src, src_mask, params, n_heads=n_heads)

    # f32 path with small tiles -> exercises the multi-tile flash softmax.
    out = encoder_layer(src, src_mask, params, n_heads=n_heads,
                        compute_dtype=jnp.float32, q_block=8, kv_block=8)
    out = jax.block_until_ready(out)
    assert out.shape == (B, S, H)
    assert jnp.allclose(out, ref, atol=1e-2, rtol=1e-2), "f32 kernel does not match reference"

    # default bf16 MXU path (f32 accumulation / statistics) — looser tolerance.
    out_bf16 = encoder_layer(src, src_mask, params, n_heads=n_heads,
                             q_block=8, kv_block=8)
    out_bf16 = jax.block_until_ready(out_bf16)
    assert jnp.allclose(out_bf16, ref, atol=1e-1, rtol=1e-1), "bf16 kernel diverges from reference"

    print("KERNEL_OK")
</pallas_src>

<mosaic_0001>
module attributes {stable_mosaic.version = 11 : i64} {
  func.func @_encoder_layer_kernel(%arg0: i32, %arg1: i32, %arg2: i32, %arg3: memref<1x8x32xf32, #tpu.memory_space<vmem>>, %arg4: memref<1x8x32xf32, #tpu.memory_space<vmem>>, %arg5: memref<1x1x1x8xf32, #tpu.memory_space<vmem>>, %arg6: memref<32x32xf32, #tpu.memory_space<vmem>>, %arg7: memref<1x32xf32, #tpu.memory_space<vmem>>, %arg8: memref<64x32xf32, #tpu.memory_space<vmem>>, %arg9: memref<64x1xf32, #tpu.memory_space<vmem>>, %arg10: memref<4x8x32xf32, #tpu.memory_space<vmem>>, %arg11: memref<1x32xf32, #tpu.memory_space<vmem>>, %arg12: memref<32x64xf32, #tpu.memory_space<vmem>>, %arg13: memref<1x64xf32, #tpu.memory_space<vmem>>, %arg14: memref<64x32xf32, #tpu.memory_space<vmem>>, %arg15: memref<1x32xf32, #tpu.memory_space<vmem>>, %arg16: memref<1x32xf32, #tpu.memory_space<vmem>>, %arg17: memref<1x32xf32, #tpu.memory_space<vmem>>, %arg18: memref<1x8x32xf32, #tpu.memory_space<vmem>>, %arg19: memref<4x8x8xf32, #tpu.memory_space<vmem>>, %arg20: memref<4x8x1xf32, #tpu.memory_space<vmem>>, %arg21: memref<4x8x1xf32, #tpu.memory_space<vmem>>, %arg22: memref<4x8x8xf32, #tpu.memory_space<vmem>>) attributes {dimension_semantics = [#tpu.dimension_semantics<parallel>, #tpu.dimension_semantics<parallel>, #tpu.dimension_semantics<arbitrary>], iteration_bounds = array<i64: 2, 2, 2>, scalar_prefetch = 0 : i64, scratch_operands = 4 : i64, tpu.core_type = #tpu.core_type<tc>, window_params = [{transform_indices = @transform_0, window_bounds = array<i64: 1, 8, 32>}, {transform_indices = @transform_1, window_bounds = array<i64: 1, 8, 32>}, {transform_indices = @transform_2, window_bounds = array<i64: 1, 1, 1, 8>}, {pipeline_mode = #tpu.pipeline_mode<synchronous>, transform_indices = @transform_3, window_bounds = array<i64: 32, 32>}, {pipeline_mode = #tpu.pipeline_mode<synchronous>, transform_indices = @transform_4, window_bounds = array<i64: 1, 32>}, {pipeline_mode = #tpu.pipeline_mode<synchronous>, transform_indices = @transform_5, window_bounds = array<i64: 64, 32>}, {pipeline_mode = #tpu.pipeline_mode<synchronous>, transform_indices = @transform_6, window_bounds = array<i64: 64, 1>}, {pipeline_mode = #tpu.pipeline_mode<synchronous>, transform_indices = @transform_7, window_bounds = array<i64: 4, 8, 32>}, {pipeline_mode = #tpu.pipeline_mode<synchronous>, transform_indices = @transform_8, window_bounds = array<i64: 1, 32>}, {pipeline_mode = #tpu.pipeline_mode<synchronous>, transform_indices = @transform_9, window_bounds = array<i64: 32, 64>}, {pipeline_mode = #tpu.pipeline_mode<synchronous>, transform_indices = @transform_10, window_bounds = array<i64: 1, 64>}, {pipeline_mode = #tpu.pipeline_mode<synchronous>, transform_indices = @transform_11, window_bounds = array<i64: 64, 32>}, {pipeline_mode = #tpu.pipeline_mode<synchronous>, transform_indices = @transform_12, window_bounds = array<i64: 1, 32>}, {pipeline_mode = #tpu.pipeline_mode<synchronous>, transform_indices = @transform_13, window_bounds = array<i64: 1, 32>}, {pipeline_mode = #tpu.pipeline_mode<synchronous>, transform_indices = @transform_14, window_bounds = array<i64: 1, 32>}, {transform_indices = @transform_15, window_bounds = array<i64: 1, 8, 32>}]} {
    %c0_i32 = arith.constant 0 : i32
    %0 = arith.cmpi eq, %arg2, %c0_i32 : i32
    %1 = arith.extui %0 : i1 to i32
    %c0_i32_0 = arith.constant 0 : i32
    %2 = arith.cmpi ne, %1, %c0_i32_0 : i32
    scf.if %2 {
      %c0_37 = arith.constant 0 : index
      %c0_38 = arith.constant 0 : index
      %c0_39 = arith.constant 0 : index
      %46 = vector.load %arg3[%c0_37, %c0_38, %c0_39] : memref<1x8x32xf32, #tpu.memory_space<vmem>>, vector<1x8x32xf32>
      %47 = vector.shape_cast %46 : vector<1x8x32xf32> to vector<8x32xf32>
      %c0_40 = arith.constant 0 : index
      %c0_41 = arith.constant 0 : index
      %48 = vector.load %arg6[%c0_40, %c0_41] : memref<32x32xf32, #tpu.memory_space<vmem>>, vector<32x32xf32>
      %cst_42 = arith.constant dense<0.000000e+00> : vector<8x32xf32>
      %49 = tpu.matmul %47, %48, %cst_42 {dimension_numbers = #tpu.dot_dimension_numbers<[1], [0], [0], [1], [0, 0, 1, 1], [], []>} : vector<8x32xf32>, vector<32x32xf32>, vector<8x32xf32> -> vector<8x32xf32>
      %c0_43 = arith.constant 0 : index
      %c0_44 = arith.constant 0 : index
      %50 = vector.load %arg7[%c0_43, %c0_44] : memref<1x32xf32, #tpu.memory_space<vmem>>, vector<1x32xf32>
      %51 = vector.broadcast %50 : vector<1x32xf32> to vector<8x32xf32>
      %52 = arith.addf %49, %51 : vector<8x32xf32>
      %cst_45 = arith.constant 0.353553385 : f32
      %53 = vector.broadcast %cst_45 : f32 to vector<8x32xf32>
      %54 = arith.mulf %52, %53 : vector<8x32xf32>
      %55 = vector.shape_cast %54 : vector<8x32xf32> to vector<8x4x8xf32>
      %56 = tpu.transpose %55, [1, 0, 2] : vector<8x4x8xf32> -> vector<4x8x8xf32>
      %c0_46 = arith.constant 0 : index
      %c0_47 = arith.constant 0 : index
      %c0_48 = arith.constant 0 : index
      %57 = vector.load %arg19[%c0_46, %c0_47, %c0_48] : memref<4x8x8xf32, #tpu.memory_space<vmem>>, vector<4x8x8xf32>
      tpu.vector_store %arg19[%c0_46, %c0_47, %c0_48], %56 {strides = array<i32>} : memref<4x8x8xf32, #tpu.memory_space<vmem>>, vector<4x8x8xf32>,
      %cst_49 = arith.constant 0xFF800000 : f32
      %58 = vector.broadcast %cst_49 : f32 to vector<4x8x1xf32>
      %c0_50 = arith.constant 0 : index
      %c0_51 = arith.constant 0 : index
      %c0_52 = arith.constant 0 : index
      %59 = vector.load %arg20[%c0_50, %c0_51, %c0_52] : memref<4x8x1xf32, #tpu.memory_space<vmem>>, vector<4x8x1xf32>
      tpu.vector_store %arg20[%c0_50, %c0_51, %c0_52], %58 {strides = array<i32>} : memref<4x8x1xf32, #tpu.memory_space<vmem>>, vector<4x8x1xf32>,
      %cst_53 = arith.constant 0.000000e+00 : f32
      %60 = vector.broadcast %cst_53 : f32 to vector<4x8x1xf32>
      %c0_54 = arith.constant 0 : index
      %c0_55 = arith.constant 0 : index
      %c0_56 = arith.constant 0 : index
      %61 = vector.load %arg21[%c0_54, %c0_55, %c0_56] : memref<4x8x1xf32, #tpu.memory_space<vmem>>, vector<4x8x1xf32>
      tpu.vector_store %arg21[%c0_54, %c0_55, %c0_56], %60 {strides = array<i32>} : memref<4x8x1xf32, #tpu.memory_space<vmem>>, vector<4x8x1xf32>,
      %cst_57 = arith.constant 0.000000e+00 : f32
      %62 = vector.broadcast %cst_57 : f32 to vector<4x8x8xf32>
      %c0_58 = arith.constant 0 : index
      %c0_59 = arith.constant 0 : index
      %c0_60 = arith.constant 0 : index
      %63 = vector.load %arg22[%c0_58, %c0_59, %c0_60] : memref<4x8x8xf32, #tpu.memory_space<vmem>>, vector<4x8x8xf32>
      tpu.vector_store %arg22[%c0_58, %c0_59, %c0_60], %62 {strides = array<i32>} : memref<4x8x8xf32, #tpu.memory_space<vmem>>, vector<4x8x8xf32>,
    } else {
    }
    %c0 = arith.constant 0 : index
    %c0_1 = arith.constant 0 : index
    %c0_2 = arith.constant 0 : index
    %3 = vector.load %arg4[%c0, %c0_1, %c0_2] : memref<1x8x32xf32, #tpu.memory_space<vmem>>, vector<1x8x32xf32>
    %4 = vector.shape_cast %3 : vector<1x8x32xf32> to vector<8x32xf32>
    %c0_3 = arith.constant 0 : index
    %c0_4 = arith.constant 0 : index
    %5 = vector.load %arg8[%c0_3, %c0_4] : memref<64x32xf32, #tpu.memory_space<vmem>>, vector<64x32xf32>
    %cst = arith.constant dense<0.000000e+00> : vector<64x8xf32>
    %6 = tpu.matmul %5, %4, %cst {dimension_numbers = #tpu.dot_dimension_numbers<[1], [1], [0], [0], [0, 0, 1, 0], [], []>} : vector<64x32xf32>, vector<8x32xf32>, vector<64x8xf32> -> vector<64x8xf32>
    %c0_5 = arith.constant 0 : index
    %c0_6 = arith.constant 0 : index
    %7 = vector.load %arg9[%c0_5, %c0_6] : memref<64x1xf32, #tpu.memory_space<vmem>>, vector<64x1xf32>
    %8 = vector.broadcast %7 : vector<64x1xf32> to vector<64x8xf32>
    %9 = arith.addf %6, %8 : vector<64x8xf32>
    %10 = vector.extract_strided_slice %9 {offsets = [0, 0], sizes = [32, 8], strides = [1, 1]} : vector<64x8xf32> to vector<32x8xf32>
    %11 = vector.shape_cast %10 : vector<32x8xf32> to vector<4x8x8xf32>
    %12 = vector.extract_strided_slice %9 {offsets = [32, 0], sizes = [32, 8], strides = [1, 1]} : vector<64x8xf32> to vector<32x8xf32>
    %13 = vector.shape_cast %12 : vector<32x8xf32> to vector<4x8x8xf32>
    %c0_7 = arith.constant 0 : index
    %c0_8 = arith.constant 0 : index
    %c0_9 = arith.constant 0 : index
    %14 = vector.load %arg19[%c0_7, %c0_8, %c0_9] : memref<4x8x8xf32, #tpu.memory_space<vmem>>, vector<4x8x8xf32>
    %cst_10 = arith.constant dense<0.000000e+00> : vector<4x8x8xf32>
    %15 = tpu.matmul %14, %11, %cst_10 {dimension_numbers = #tpu.dot_dimension_numbers<[2], [1], [1], [2], [0, 0, 0, 1, 1, 2], [0], [0]>} : vector<4x8x8xf32>, vector<4x8x8xf32>, vector<4x8x8xf32> -> vector<4x8x8xf32>
    %c0_11 = arith.constant 0 : index
    %c0_12 = arith.constant 0 : index
    %c0_13 = arith.constant 0 : index
    %c0_14 = arith.constant 0 : index
    %16 = vector.load %arg5[%c0_11, %c0_12, %c0_13, %c0_14] : memref<1x1x1x8xf32, #tpu.memory_space<vmem>>, vector<1x1x1x8xf32>
    %17 = vector.shape_cast %16 : vector<1x1x1x8xf32> to vector<1x8xf32>
    %18 = vector.shape_cast %17 : vector<1x8xf32> to vector<1x1x8xf32>
    %19 = vector.broadcast %18 : vector<1x1x8xf32> to vector<4x8x8xf32>
    %20 = arith.addf %15, %19 : vector<4x8x8xf32>
    %c0_15 = arith.constant 0 : index
    %c0_16 = arith.constant 0 : index
    %c0_17 = arith.constant 0 : index
    %21 = vector.load %arg20[%c0_15, %c0_16, %c0_17] : memref<4x8x1xf32, #tpu.memory_space<vmem>>, vector<4x8x1xf32>
    %cst_18 = arith.constant dense<0xFF800000> : vector<4x8xf32>
    %22 = vector.multi_reduction <maximumf>, %20, %cst_18 [2] : vector<4x8x8xf32> to vector<4x8xf32>
    %23 = vector.shape_cast %22 : vector<4x8xf32> to vector<4x8x1xf32>
    %24 = arith.maximumf %21, %23 : vector<4x8x1xf32>
    %25 = arith.subf %21, %24 : vector<4x8x1xf32>
    %26 = math.exp %25 : vector<4x8x1xf32>
    %27 = vector.broadcast %24 : vector<4x8x1xf32> to vector<4x8x8xf32>
    %28 = arith.subf %20, %27 : vector<4x8x8xf32>
    %29 = math.exp %28 : vector<4x8x8xf32>
    %c0_19 = arith.constant 0 : index
    %c0_20 = arith.constant 0 : index
    %c0_21 = arith.constant 0 : index
    %30 = vector.load %arg21[%c0_19, %c0_20, %c0_21] : memref<4x8x1xf32, #tpu.memory_space<vmem>>, vector<4x8x1xf32>
    %31 = arith.mulf %26, %30 : vector<4x8x1xf32>
    %cst_22 = arith.constant dense<0.000000e+00> : vector<4x8xf32>
    %32 = vector.multi_reduction <add>, %29, %cst_22 [2] : vector<4x8x8xf32> to vector<4x8xf32>
    %33 = vector.shape_cast %32 : vector<4x8xf32> to vector<4x8x1xf32>
    %34 = arith.addf %31, %33 : vector<4x8x1xf32>
    %c0_23 = arith.constant 0 : index
    %c0_24 = arith.constant 0 : index
    %c0_25 = arith.constant 0 : index
    %35 = vector.load %arg21[%c0_23, %c0_24, %c0_25] : memref<4x8x1xf32, #tpu.memory_space<vmem>>, vector<4x8x1xf32>
    tpu.vector_store %arg21[%c0_23, %c0_24, %c0_25], %34 {strides = array<i32>} : memref<4x8x1xf32, #tpu.memory_space<vmem>>, vector<4x8x1xf32>,
    %cst_26 = arith.constant dense<0.000000e+00> : vector<4x8x8xf32>
    %36 = tpu.matmul %29, %13, %cst_26 {dimension_numbers = #tpu.dot_dimension_numbers<[2], [2], [1], [1], [0, 0, 0, 1, 1, 1], [0], [0]>} : vector<4x8x8xf32>, vector<4x8x8xf32>, vector<4x8x8xf32> -> vector<4x8x8xf32>
    %c0_27 = arith.constant 0 : index
    %c0_28 = arith.constant 0 : index
    %c0_29 = arith.constant 0 : index
    %37 = vector.load %arg22[%c0_27, %c0_28, %c0_29] : memref<4x8x8xf32, #tpu.memory_space<vmem>>, vector<4x8x8xf32>
    %38 = vector.broadcast %26 : vector<4x8x1xf32> to vector<4x8x8xf32>
    %39 = arith.mulf %38, %37 : vector<4x8x8xf32>
    %40 = arith.addf %39, %36 : vector<4x8x8xf32>
    %c0_30 = arith.constant 0 : index
    %c0_31 = arith.constant 0 : index
    %c0_32 = arith.constant 0 : index
    %41 = vector.load %arg22[%c0_30, %c0_31, %c0_32] : memref<4x8x8xf32, #tpu.memory_space<vmem>>, vector<4x8x8xf32>
    tpu.vector_store %arg22[%c0_30, %c0_31, %c0_32], %40 {strides = array<i32>} : memref<4x8x8xf32, #tpu.memory_space<vmem>>, vector<4x8x8xf32>,
    %c0_33 = arith.constant 0 : index
    %c0_34 = arith.constant 0 : index
    %c0_35 = arith.constant 0 : index
    %42 = vector.load %arg20[%c0_33, %c0_34, %c0_35] : memref<4x8x1xf32, #tpu.memory_space<vmem>>, vector<4x8x1xf32>
    tpu.vector_store %arg20[%c0_33, %c0_34, %c0_35], %24 {strides = array<i32>} : memref<4x8x1xf32, #tpu.memory_space<vmem>>, vector<4x8x1xf32>,
    %c1_i32 = arith.constant 1 : i32
    %43 = arith.cmpi eq, %arg2, %c1_i32 : i32
    %44 = arith.extui %43 : i1 to i32
    %c0_i32_36 = arith.constant 0 : i32
    %45 = arith.cmpi ne, %44, %c0_i32_36 : i32
    scf.if %45 {
      %c0_37 = arith.constant 0 : index
      %c0_38 = arith.constant 0 : index
      %46 = vector.load %arg16[%c0_37, %c0_38] : memref<1x32xf32, #tpu.memory_space<vmem>>, vector<1x32xf32>
      %c0_39 = arith.constant 0 : index
      %c0_40 = arith.constant 0 : index
      %47 = vector.load %arg17[%c0_39, %c0_40] : memref<1x32xf32, #tpu.memory_space<vmem>>, vector<1x32xf32>
      %c0_41 = arith.constant 0 : index
      %c0_42 = arith.constant 0 : index
      %c0_43 = arith.constant 0 : index
      %48 = vector.load %arg22[%c0_41, %c0_42, %c0_43] : memref<4x8x8xf32, #tpu.memory_space<vmem>>, vector<4x8x8xf32>
      %c0_44 = arith.constant 0 : index
      %c0_45 = arith.constant 0 : index
      %c0_46 = arith.constant 0 : index
      %49 = vector.load %arg21[%c0_44, %c0_45, %c0_46] : memref<4x8x1xf32, #tpu.memory_space<vmem>>, vector<4x8x1xf32>
      %50 = tpu.reciprocal %49 {approx = true} : vector<4x8x1xf32> -> vector<4x8x1xf32>
      %51 = vector.broadcast %50 : vector<4x8x1xf32> to vector<4x8x8xf32>
      %52 = arith.mulf %48, %51 : vector<4x8x8xf32>
      %c0_47 = arith.constant 0 : index
      %c0_48 = arith.constant 0 : index
      %c0_49 = arith.constant 0 : index
      %53 = vector.load %arg10[%c0_47, %c0_48, %c0_49] : memref<4x8x32xf32, #tpu.memory_space<vmem>>, vector<4x8x32xf32>
      %cst_50 = arith.constant dense<0.000000e+00> : vector<4x8x32xf32>
      %54 = tpu.matmul %52, %53, %cst_50 {dimension_numbers = #tpu.dot_dimension_numbers<[2], [1], [1], [2], [0, 0, 0, 1, 1, 2], [0], [0]>} : vector<4x8x8xf32>, vector<4x8x32xf32>, vector<4x8x32xf32> -> vector<4x8x32xf32>
      %cst_51 = arith.constant dense<0.000000e+00> : vector<8x32xf32>
      %55 = vector.multi_reduction <add>, %54, %cst_51 [0] : vector<4x8x32xf32> to vector<8x32xf32>
      %c0_52 = arith.constant 0 : index
      %c0_53 = arith.constant 0 : index
      %56 = vector.load %arg11[%c0_52, %c0_53] : memref<1x32xf32, #tpu.memory_space<vmem>>, vector<1x32xf32>
      %57 = vector.broadcast %56 : vector<1x32xf32> to vector<8x32xf32>
      %58 = arith.addf %55, %57 : vector<8x32xf32>
      %c0_54 = arith.constant 0 : index
      %c0_55 = arith.constant 0 : index
      %c0_56 = arith.constant 0 : index
      %59 = vector.load %arg3[%c0_54, %c0_55, %c0_56] : memref<1x8x32xf32, #tpu.memory_space<vmem>>, vector<1x8x32xf32>
      %60 = vector.shape_cast %59 : vector<1x8x32xf32> to vector<8x32xf32>
      %61 = arith.addf %60, %58 : vector<8x32xf32>
      %cst_57 = arith.constant dense<0.000000e+00> : vector<8xf32>
      %62 = vector.multi_reduction <add>, %61, %cst_57 [1] : vector<8x32xf32> to vector<8xf32>
      %63 = vector.shape_cast %62 : vector<8xf32> to vector<8x1xf32>
      %cst_58 = arith.constant 3.200000e+01 : f32
      %64 = vector.broadcast %cst_58 : f32 to vector<8x1xf32>
      %65 = arith.divf %63, %64 : vector<8x1xf32>
      %66 = vector.broadcast %65 : vector<8x1xf32> to vector<8x32xf32>
      %67 = arith.subf %61, %66 : vector<8x32xf32>
      %68 = arith.mulf %67, %67 : vector<8x32xf32>
      %cst_59 = arith.constant dense<0.000000e+00> : vector<8xf32>
      %69 = vector.multi_reduction <add>, %68, %cst_59 [1] : vector<8x32xf32> to vector<8xf32>
      %70 = vector.shape_cast %69 : vector<8xf32> to vector<8x1xf32>
      %cst_60 = arith.constant 3.200000e+01 : f32
      %71 = vector.broadcast %cst_60 : f32 to vector<8x1xf32>
      %72 = arith.divf %70, %71 : vector<8x1xf32>
      %73 = vector.broadcast %65 : vector<8x1xf32> to vector<8x32xf32>
      %74 = arith.subf %61, %73 : vector<8x32xf32>
      %cst_61 = arith.constant 9.99999974E-6 : f32
      %75 = vector.broadcast %cst_61 : f32 to vector<8x1xf32>
      %76 = arith.addf %72, %75 : vector<8x1xf32>
      %77 = math.rsqrt %76 : vector<8x1xf32>
      %78 = vector.broadcast %77 : vector<8x1xf32> to vector<8x32xf32>
      %79 = arith.mulf %74, %78 : vector<8x32xf32>
      %80 = vector.broadcast %46 : vector<1x32xf32> to vector<8x32xf32>
      %81 = arith.mulf %79, %80 : vector<8x32xf32>
      %82 = vector.broadcast %47 : vector<1x32xf32> to vector<8x32xf32>
      %83 = arith.addf %81, %82 : vector<8x32xf32>
      %c0_62 = arith.constant 0 : index
      %c0_63 = arith.constant 0 : index
      %84 = vector.load %arg12[%c0_62, %c0_63] : memref<32x64xf32, #tpu.memory_space<vmem>>, vector<32x64xf32>
      %cst_64 = arith.constant dense<0.000000e+00> : vector<8x64xf32>
      %85 = tpu.matmul %83, %84, %cst_64 {dimension_numbers = #tpu.dot_dimension_numbers<[1], [0], [0], [1], [0, 0, 1, 1], [], []>} : vector<8x32xf32>, vector<32x64xf32>, vector<8x64xf32> -> vector<8x64xf32>
      %c0_65 = arith.constant 0 : index
      %c0_66 = arith.constant 0 : index
      %86 = vector.load %arg13[%c0_65, %c0_66] : memref<1x64xf32, #tpu.memory_space<vmem>>, vector<1x64xf32>
      %87 = vector.broadcast %86 : vector<1x64xf32> to vector<8x64xf32>
      %88 = arith.addf %85, %87 : vector<8x64xf32>
      %cst_67 = arith.constant 0.000000e+00 : f32
      %89 = vector.broadcast %cst_67 : f32 to vector<8x64xf32>
      %90 = arith.maximumf %88, %89 : vector<8x64xf32>
      %c0_68 = arith.constant 0 : index
      %c0_69 = arith.constant 0 : index
      %91 = vector.load %arg14[%c0_68, %c0_69] : memref<64x32xf32, #tpu.memory_space<vmem>>, vector<64x32xf32>
      %cst_70 = arith.constant dense<0.000000e+00> : vector<8x32xf32>
      %92 = tpu.matmul %90, %91, %cst_70 {dimension_numbers = #tpu.dot_dimension_numbers<[1], [0], [0], [1], [0, 0, 1, 1], [], []>} : vector<8x64xf32>, vector<64x32xf32>, vector<8x32xf32> -> vector<8x32xf32>
      %c0_71 = arith.constant 0 : index
      %c0_72 = arith.constant 0 : index
      %93 = vector.load %arg15[%c0_71, %c0_72] : memref<1x32xf32, #tpu.memory_space<vmem>>, vector<1x32xf32>
      %94 = vector.broadcast %93 : vector<1x32xf32> to vector<8x32xf32>
      %95 = arith.addf %92, %94 : vector<8x32xf32>
      %96 = arith.addf %83, %95 : vector<8x32xf32>
      %cst_73 = arith.constant dense<0.000000e+00> : vector<8xf32>
      %97 = vector.multi_reduction <add>, %96, %cst_73 [1] : vector<8x32xf32> to vector<8xf32>
      %98 = vector.shape_cast %97 : vector<8xf32> to vector<8x1xf32>
      %cst_74 = arith.constant 3.200000e+01 : f32
      %99 = vector.broadcast %cst_74 : f32 to vector<8x1xf32>
      %100 = arith.divf %98, %99 : vector<8x1xf32>
      %101 = vector.broadcast %100 : vector<8x1xf32> to vector<8x32xf32>
      %102 = arith.subf %96, %101 : vector<8x32xf32>
      %103 = arith.mulf %102, %102 : vector<8x32xf32>
      %cst_75 = arith.constant dense<0.000000e+00> : vector<8xf32>
      %104 = vector.multi_reduction <add>, %103, %cst_75 [1] : vector<8x32xf32> to vector<8xf32>
      %105 = vector.shape_cast %104 : vector<8xf32> to vector<8x1xf32>
      %cst_76 = arith.constant 3.200000e+01 : f32
      %106 = vector.broadcast %cst_76 : f32 to vector<8x1xf32>
      %107 = arith.divf %105, %106 : vector<8x1xf32>
      %108 = vector.broadcast %100 : vector<8x1xf32> to vector<8x32xf32>
      %109 = arith.subf %96, %108 : vector<8x32xf32>
      %cst_77 = arith.constant 9.99999974E-6 : f32
      %110 = vector.broadcast %cst_77 : f32 to vector<8x1xf32>
      %111 = arith.addf %107, %110 : vector<8x1xf32>
      %112 = math.rsqrt %111 : vector<8x1xf32>
      %113 = vector.broadcast %112 : vector<8x1xf32> to vector<8x32xf32>
      %114 = arith.mulf %109, %113 : vector<8x32xf32>
      %115 = vector.broadcast %46 : vector<1x32xf32> to vector<8x32xf32>
      %116 = arith.mulf %114, %115 : vector<8x32xf32>
      %117 = vector.broadcast %47 : vector<1x32xf32> to vector<8x32xf32>
      %118 = arith.addf %116, %117 : vector<8x32xf32>
      %c0_78 = arith.constant 0 : index
      %c0_79 = arith.constant 0 : index
      %c0_80 = arith.constant 0 : index
      %119 = vector.load %arg18[%c0_78, %c0_79, %c0_80] : memref<1x8x32xf32, #tpu.memory_space<vmem>>, vector<1x8x32xf32>
      %120 = vector.shape_cast %119 : vector<1x8x32xf32> to vector<8x32xf32>
      %121 = vector.shape_cast %118 : vector<8x32xf32> to vector<1x8x32xf32>
      tpu.vector_store %arg18[%c0_78, %c0_79, %c0_80], %121 {strides = array<i32>} : memref<1x8x32xf32, #tpu.memory_space<vmem>>, vector<1x8x32xf32>,
    } else {
    }
    return
  }
  func.func @transform_0(%arg0: i32, %arg1: i32, %arg2: i32) -> (i32, i32, i32) {
    %c0_i32 = arith.constant 0 : i32
    %c0_i32_0 = arith.constant 0 : i32
    return %arg0, %arg1, %c0_i32 : i32, i32, i32
  }
  func.func @transform_1(%arg0: i32, %arg1: i32, %arg2: i32) -> (i32, i32, i32) {
    %c0_i32 = arith.constant 0 : i32
    %c0_i32_0 = arith.constant 0 : i32
    return %arg0, %arg2, %c0_i32 : i32, i32, i32
  }
  func.func @transform_2(%arg0: i32, %arg1: i32, %arg2: i32) -> (i32, i32, i32, i32) {
    %c0_i32 = arith.constant 0 : i32
    %c0_i32_0 = arith.constant 0 : i32
    %c0_i32_1 = arith.constant 0 : i32
    return %arg0, %arg2, %c0_i32, %c0_i32_0 : i32, i32, i32, i32
  }
  func.func @transform_3(%arg0: i32, %arg1: i32, %arg2: i32) -> (i32, i32) {
    %c0_i32 = arith.constant 0 : i32
    %c0_i32_0 = arith.constant 0 : i32
    %c0_i32_1 = arith.constant 0 : i32
    return %c0_i32, %c0_i32_0 : i32, i32
  }
  func.func @transform_4(%arg0: i32, %arg1: i32, %arg2: i32) -> (i32, i32) {
    %c0_i32 = arith.constant 0 : i32
    %c0_i32_0 = arith.constant 0 : i32
    %c0_i32_1 = arith.constant 0 : i32
    return %c0_i32, %c0_i32_0 : i32, i32
  }
  func.func @transform_5(%arg0: i32, %arg1: i32, %arg2: i32) -> (i32, i32) {
    %c0_i32 = arith.constant 0 : i32
    %c0_i32_0 = arith.constant 0 : i32
    %c0_i32_1 = arith.constant 0 : i32
    return %c0_i32, %c0_i32_0 : i32, i32
  }
  func.func @transform_6(%arg0: i32, %arg1: i32, %arg2: i32) -> (i32, i32) {
    %c0_i32 = arith.constant 0 : i32
    %c0_i32_0 = arith.constant 0 : i32
    %c0_i32_1 = arith.constant 0 : i32
    return %c0_i32, %c0_i32_0 : i32, i32
  }
  func.func @transform_7(%arg0: i32, %arg1: i32, %arg2: i32) -> (i32, i32, i32) {
    %c0_i32 = arith.constant 0 : i32
    %c0_i32_0 = arith.constant 0 : i32
    %c0_i32_1 = arith.constant 0 : i32
    %c0_i32_2 = arith.constant 0 : i32
    return %c0_i32, %c0_i32_0, %c0_i32_1 : i32, i32, i32
  }
  func.func @transform_8(%arg0: i32, %arg1: i32, %arg2: i32) -> (i32, i32) {
    %c0_i32 = arith.constant 0 : i32
    %c0_i32_0 = arith.constant 0 : i32
    %c0_i32_1 = arith.constant 0 : i32
    return %c0_i32, %c0_i32_0 : i32, i32
  }
  func.func @transform_9(%arg0: i32, %arg1: i32, %arg2: i32) -> (i32, i32) {
    %c0_i32 = arith.constant 0 : i32
    %c0_i32_0 = arith.constant 0 : i32
    %c0_i32_1 = arith.constant 0 : i32
    return %c0_i32, %c0_i32_0 : i32, i32
  }
  func.func @transform_10(%arg0: i32, %arg1: i32, %arg2: i32) -> (i32, i32) {
    %c0_i32 = arith.constant 0 : i32
    %c0_i32_0 = arith.constant 0 : i32
    %c0_i32_1 = arith.constant 0 : i32
    return %c0_i32, %c0_i32_0 : i32, i32
  }
  func.func @transform_11(%arg0: i32, %arg1: i32, %arg2: i32) -> (i32, i32) {
    %c0_i32 = arith.constant 0 : i32
    %c0_i32_0 = arith.constant 0 : i32
    %c0_i32_1 = arith.constant 0 : i32
    return %c0_i32, %c0_i32_0 : i32, i32
  }
  func.func @transform_12(%arg0: i32, %arg1: i32, %arg2: i32) -> (i32, i32) {
    %c0_i32 = arith.constant 0 : i32
    %c0_i32_0 = arith.constant 0 : i32
    %c0_i32_1 = arith.constant 0 : i32
    return %c0_i32, %c0_i32_0 : i32, i32
  }
  func.func @transform_13(%arg0: i32, %arg1: i32, %arg2: i32) -> (i32, i32) {
    %c0_i32 = arith.constant 0 : i32
    %c0_i32_0 = arith.constant 0 : i32
    %c0_i32_1 = arith.constant 0 : i32
    return %c0_i32, %c0_i32_0 : i32, i32
  }
  func.func @transform_14(%arg0: i32, %arg1: i32, %arg2: i32) -> (i32, i32) {
    %c0_i32 = arith.constant 0 : i32
    %c0_i32_0 = arith.constant 0 : i32
    %c0_i32_1 = arith.constant 0 : i32
    return %c0_i32, %c0_i32_0 : i32, i32
  }
  func.func @transform_15(%arg0: i32, %arg1: i32, %arg2: i32) -> (i32, i32, i32) {
    %c0_i32 = arith.constant 0 : i32
    %c0_i32_0 = arith.constant 0 : i32
    return %arg0, %arg1, %c0_i32 : i32, i32, i32
  }
}

module attributes {stable_mosaic.version = 11 : i64} {
  func.func @_encoder_layer_kernel(%arg0: i32, %arg1: i32, %arg2: i32, %arg3: memref<1x8x32xf32, #tpu.memory_space<vmem>>, %arg4: memref<1x8x32xf32, #tpu.memory_space<vmem>>, %arg5: memref<1x1x1x8xf32, #tpu.memory_space<vmem>>, %arg6: memref<32x32xf32, #tpu.memory_space<vmem>>, %arg7: memref<1x32xf32, #tpu.memory_space<vmem>>, %arg8: memref<64x32xf32, #tpu.memory_space<vmem>>, %arg9: memref<64x1xf32, #tpu.memory_space<vmem>>, %arg10: memref<4x8x32xf32, #tpu.memory_space<vmem>>, %arg11: memref<1x32xf32, #tpu.memory_space<vmem>>, %arg12: memref<32x64xf32, #tpu.memory_space<vmem>>, %arg13: memref<1x64xf32, #tpu.memory_space<vmem>>, %arg14: memref<64x32xf32, #tpu.memory_space<vmem>>, %arg15: memref<1x32xf32, #tpu.memory_space<vmem>>, %arg16: memref<1x32xf32, #tpu.memory_space<vmem>>, %arg17: memref<1x32xf32, #tpu.memory_space<vmem>>, %arg18: memref<1x8x32xf32, #tpu.memory_space<vmem>>, %arg19: memref<4x8x8xf32, #tpu.memory_space<vmem>>, %arg20: memref<4x8x1xf32, #tpu.memory_space<vmem>>, %arg21: memref<4x8x1xf32, #tpu.memory_space<vmem>>, %arg22: memref<4x8x8xf32, #tpu.memory_space<vmem>>) attributes {dimension_semantics = [#tpu.dimension_semantics<parallel>, #tpu.dimension_semantics<parallel>, #tpu.dimension_semantics<arbitrary>], iteration_bounds = array<i64: 2, 2, 2>, scalar_prefetch = 0 : i64, scratch_operands = 4 : i64, tpu.core_type = #tpu.core_type<tc>, window_params = [{transform_indices = @transform_0, window_bounds = array<i64: 1, 8, 32>}, {transform_indices = @transform_1, window_bounds = array<i64: 1, 8, 32>}, {transform_indices = @transform_2, window_bounds = array<i64: 1, 1, 1, 8>}, {pipeline_mode = #tpu.pipeline_mode<synchronous>, transform_indices = @transform_3, window_bounds = array<i64: 32, 32>}, {pipeline_mode = #tpu.pipeline_mode<synchronous>, transform_indices = @transform_4, window_bounds = array<i64: 1, 32>}, {pipeline_mode = #tpu.pipeline_mode<synchronous>, transform_indices = @transform_5, window_bounds = array<i64: 64, 32>}, {pipeline_mode = #tpu.pipeline_mode<synchronous>, transform_indices = @transform_6, window_bounds = array<i64: 64, 1>}, {pipeline_mode = #tpu.pipeline_mode<synchronous>, transform_indices = @transform_7, window_bounds = array<i64: 4, 8, 32>}, {pipeline_mode = #tpu.pipeline_mode<synchronous>, transform_indices = @transform_8, window_bounds = array<i64: 1, 32>}, {pipeline_mode = #tpu.pipeline_mode<synchronous>, transform_indices = @transform_9, window_bounds = array<i64: 32, 64>}, {pipeline_mode = #tpu.pipeline_mode<synchronous>, transform_indices = @transform_10, window_bounds = array<i64: 1, 64>}, {pipeline_mode = #tpu.pipeline_mode<synchronous>, transform_indices = @transform_11, window_bounds = array<i64: 64, 32>}, {pipeline_mode = #tpu.pipeline_mode<synchronous>, transform_indices = @transform_12, window_bounds = array<i64: 1, 32>}, {pipeline_mode = #tpu.pipeline_mode<synchronous>, transform_indices = @transform_13, window_bounds = array<i64: 1, 32>}, {pipeline_mode = #tpu.pipeline_mode<synchronous>, transform_indices = @transform_14, window_bounds = array<i64: 1, 32>}, {transform_indices = @transform_15, window_bounds = array<i64: 1, 8, 32>}]} {
    %c0_i32 = arith.constant 0 : i32
    %0 = arith.cmpi eq, %arg2, %c0_i32 : i32
    %1 = arith.extui %0 : i1 to i32
    %c0_i32_0 = arith.constant 0 : i32
    %2 = arith.cmpi ne, %1, %c0_i32_0 : i32
    scf.if %2 {
      %c0_37 = arith.constant 0 : index
      %c0_38 = arith.constant 0 : index
      %c0_39 = arith.constant 0 : index
      %46 = vector.load %arg3[%c0_37, %c0_38, %c0_39] : memref<1x8x32xf32, #tpu.memory_space<vmem>>, vector<1x8x32xf32>
      %47 = vector.shape_cast %46 : vector<1x8x32xf32> to vector<8x32xf32>
      %c0_40 = arith.constant 0 : index
      %c0_41 = arith.constant 0 : index
      %48 = vector.load %arg6[%c0_40, %c0_41] : memref<32x32xf32, #tpu.memory_space<vmem>>, vector<32x32xf32>
      %cst_42 = arith.constant dense<0.000000e+00> : vector<8x32xf32>
      %49 = tpu.matmul %47, %48, %cst_42 {dimension_numbers = #tpu.dot_dimension_numbers<[1], [0], [0], [1], [0, 0, 1, 1], [], []>} : vector<8x32xf32>, vector<32x32xf32>, vector<8x32xf32> -> vector<8x32xf32>
      %c0_43 = arith.constant 0 : index
      %c0_44 = arith.constant 0 : index
      %50 = vector.load %arg7[%c0_43, %c0_44] : memref<1x32xf32, #tpu.memory_space<vmem>>, vector<1x32xf32>
      %51 = vector.broadcast %50 : vector<1x32xf32> to vector<8x32xf32>
      %52 = arith.addf %49, %51 : vector<8x32xf32>
      %cst_45 = arith.constant 0.353553385 : f32
      %53 = vector.broadcast %cst_45 : f32 to vector<8x32xf32>
      %54 = arith.mulf %52, %53 : vector<8x32xf32>
      %55 = vector.shape_cast %54 : vector<8x32xf32> to vector<8x4x8xf32>
      %56 = tpu.transpose %55, [1, 0, 2] : vector<8x4x8xf32> -> vector<4x8x8xf32>
      %c0_46 = arith.constant 0 : index
      %c0_47 = arith.constant 0 : index
      %c0_48 = arith.constant 0 : index
      %57 = vector.load %arg19[%c0_46, %c0_47, %c0_48] : memref<4x8x8xf32, #tpu.memory_space<vmem>>, vector<4x8x8xf32>
      tpu.vector_store %arg19[%c0_46, %c0_47, %c0_48], %56 {strides = array<i32>} : memref<4x8x8xf32, #tpu.memory_space<vmem>>, vector<4x8x8xf32>,
      %cst_49 = arith.constant 0xFF800000 : f32
      %58 = vector.broadcast %cst_49 : f32 to vector<4x8x1xf32>
      %c0_50 = arith.constant 0 : index
      %c0_51 = arith.constant 0 : index
      %c0_52 = arith.constant 0 : index
      %59 = vector.load %arg20[%c0_50, %c0_51, %c0_52] : memref<4x8x1xf32, #tpu.memory_space<vmem>>, vector<4x8x1xf32>
      tpu.vector_store %arg20[%c0_50, %c0_51, %c0_52], %58 {strides = array<i32>} : memref<4x8x1xf32, #tpu.memory_space<vmem>>, vector<4x8x1xf32>,
      %cst_53 = arith.constant 0.000000e+00 : f32
      %60 = vector.broadcast %cst_53 : f32 to vector<4x8x1xf32>
      %c0_54 = arith.constant 0 : index
      %c0_55 = arith.constant 0 : index
      %c0_56 = arith.constant 0 : index
      %61 = vector.load %arg21[%c0_54, %c0_55, %c0_56] : memref<4x8x1xf32, #tpu.memory_space<vmem>>, vector<4x8x1xf32>
      tpu.vector_store %arg21[%c0_54, %c0_55, %c0_56], %60 {strides = array<i32>} : memref<4x8x1xf32, #tpu.memory_space<vmem>>, vector<4x8x1xf32>,
      %cst_57 = arith.constant 0.000000e+00 : f32
      %62 = vector.broadcast %cst_57 : f32 to vector<4x8x8xf32>
      %c0_58 = arith.constant 0 : index
      %c0_59 = arith.constant 0 : index
      %c0_60 = arith.constant 0 : index
      %63 = vector.load %arg22[%c0_58, %c0_59, %c0_60] : memref<4x8x8xf32, #tpu.memory_space<vmem>>, vector<4x8x8xf32>
      tpu.vector_store %arg22[%c0_58, %c0_59, %c0_60], %62 {strides = array<i32>} : memref<4x8x8xf32, #tpu.memory_space<vmem>>, vector<4x8x8xf32>,
    } else {
    }
    %c0 = arith.constant 0 : index
    %c0_1 = arith.constant 0 : index
    %c0_2 = arith.constant 0 : index
    %3 = vector.load %arg4[%c0, %c0_1, %c0_2] : memref<1x8x32xf32, #tpu.memory_space<vmem>>, vector<1x8x32xf32>
    %4 = vector.shape_cast %3 : vector<1x8x32xf32> to vector<8x32xf32>
    %c0_3 = arith.constant 0 : index
    %c0_4 = arith.constant 0 : index
    %5 = vector.load %arg8[%c0_3, %c0_4] : memref<64x32xf32, #tpu.memory_space<vmem>>, vector<64x32xf32>
    %cst = arith.constant dense<0.000000e+00> : vector<64x8xf32>
    %6 = tpu.matmul %5, %4, %cst {dimension_numbers = #tpu.dot_dimension_numbers<[1], [1], [0], [0], [0, 0, 1, 0], [], []>} : vector<64x32xf32>, vector<8x32xf32>, vector<64x8xf32> -> vector<64x8xf32>
    %c0_5 = arith.constant 0 : index
    %c0_6 = arith.constant 0 : index
    %7 = vector.load %arg9[%c0_5, %c0_6] : memref<64x1xf32, #tpu.memory_space<vmem>>, vector<64x1xf32>
    %8 = vector.broadcast %7 : vector<64x1xf32> to vector<64x8xf32>
    %9 = arith.addf %6, %8 : vector<64x8xf32>
    %10 = vector.extract_strided_slice %9 {offsets = [0, 0], sizes = [32, 8], strides = [1, 1]} : vector<64x8xf32> to vector<32x8xf32>
    %11 = vector.shape_cast %10 : vector<32x8xf32> to vector<4x8x8xf32>
    %12 = vector.extract_strided_slice %9 {offsets = [32, 0], sizes = [32, 8], strides = [1, 1]} : vector<64x8xf32> to vector<32x8xf32>
    %13 = vector.shape_cast %12 : vector<32x8xf32> to vector<4x8x8xf32>
    %c0_7 = arith.constant 0 : index
    %c0_8 = arith.constant 0 : index
    %c0_9 = arith.constant 0 : index
    %14 = vector.load %arg19[%c0_7, %c0_8, %c0_9] : memref<4x8x8xf32, #tpu.memory_space<vmem>>, vector<4x8x8xf32>
    %cst_10 = arith.constant dense<0.000000e+00> : vector<4x8x8xf32>
    %15 = tpu.matmul %14, %11, %cst_10 {dimension_numbers = #tpu.dot_dimension_numbers<[2], [1], [1], [2], [0, 0, 0, 1, 1, 2], [0], [0]>} : vector<4x8x8xf32>, vector<4x8x8xf32>, vector<4x8x8xf32> -> vector<4x8x8xf32>
    %c0_11 = arith.constant 0 : index
    %c0_12 = arith.constant 0 : index
    %c0_13 = arith.constant 0 : index
    %c0_14 = arith.constant 0 : index
    %16 = vector.load %arg5[%c0_11, %c0_12, %c0_13, %c0_14] : memref<1x1x1x8xf32, #tpu.memory_space<vmem>>, vector<1x1x1x8xf32>
    %17 = vector.shape_cast %16 : vector<1x1x1x8xf32> to vector<1x8xf32>
    %18 = vector.shape_cast %17 : vector<1x8xf32> to vector<1x1x8xf32>
    %19 = vector.broadcast %18 : vector<1x1x8xf32> to vector<4x8x8xf32>
    %20 = arith.addf %15, %19 : vector<4x8x8xf32>
    %c0_15 = arith.constant 0 : index
    %c0_16 = arith.constant 0 : index
    %c0_17 = arith.constant 0 : index
    %21 = vector.load %arg20[%c0_15, %c0_16, %c0_17] : memref<4x8x1xf32, #tpu.memory_space<vmem>>, vector<4x8x1xf32>
    %cst_18 = arith.constant dense<0xFF800000> : vector<4x8xf32>
    %22 = vector.multi_reduction <maximumf>, %20, %cst_18 [2] : vector<4x8x8xf32> to vector<4x8xf32>
    %23 = vector.shape_cast %22 : vector<4x8xf32> to vector<4x8x1xf32>
    %24 = arith.maximumf %21, %23 : vector<4x8x1xf32>
    %25 = arith.subf %21, %24 : vector<4x8x1xf32>
    %26 = math.exp %25 : vector<4x8x1xf32>
    %27 = vector.broadcast %24 : vector<4x8x1xf32> to vector<4x8x8xf32>
    %28 = arith.subf %20, %27 : vector<4x8x8xf32>
    %29 = math.exp %28 : vector<4x8x8xf32>
    %c0_19 = arith.constant 0 : index
    %c0_20 = arith.constant 0 : index
    %c0_21 = arith.constant 0 : index
    %30 = vector.load %arg21[%c0_19, %c0_20, %c0_21] : memref<4x8x1xf32, #tpu.memory_space<vmem>>, vector<4x8x1xf32>
    %31 = arith.mulf %26, %30 : vector<4x8x1xf32>
    %cst_22 = arith.constant dense<0.000000e+00> : vector<4x8xf32>
    %32 = vector.multi_reduction <add>, %29, %cst_22 [2] : vector<4x8x8xf32> to vector<4x8xf32>
    %33 = vector.shape_cast %32 : vector<4x8xf32> to vector<4x8x1xf32>
    %34 = arith.addf %31, %33 : vector<4x8x1xf32>
    %c0_23 = arith.constant 0 : index
    %c0_24 = arith.constant 0 : index
    %c0_25 = arith.constant 0 : index
    %35 = vector.load %arg21[%c0_23, %c0_24, %c0_25] : memref<4x8x1xf32, #tpu.memory_space<vmem>>, vector<4x8x1xf32>
    tpu.vector_store %arg21[%c0_23, %c0_24, %c0_25], %34 {strides = array<i32>} : memref<4x8x1xf32, #tpu.memory_space<vmem>>, vector<4x8x1xf32>,
    %cst_26 = arith.constant dense<0.000000e+00> : vector<4x8x8xf32>
    %36 = tpu.matmul %29, %13, %cst_26 {dimension_numbers = #tpu.dot_dimension_numbers<[2], [2], [1], [1], [0, 0, 0, 1, 1, 1], [0], [0]>} : vector<4x8x8xf32>, vector<4x8x8xf32>, vector<4x8x8xf32> -> vector<4x8x8xf32>
    %c0_27 = arith.constant 0 : index
    %c0_28 = arith.constant 0 : index
    %c0_29 = arith.constant 0 : index
    %37 = vector.load %arg22[%c0_27, %c0_28, %c0_29] : memref<4x8x8xf32, #tpu.memory_space<vmem>>, vector<4x8x8xf32>
    %38 = vector.broadcast %26 : vector<4x8x1xf32> to vector<4x8x8xf32>
    %39 = arith.mulf %38, %37 : vector<4x8x8xf32>
    %40 = arith.addf %39, %36 : vector<4x8x8xf32>
    %c0_30 = arith.constant 0 : index
    %c0_31 = arith.constant 0 : index
    %c0_32 = arith.constant 0 : index
    %41 = vector.load %arg22[%c0_30, %c0_31, %c0_32] : memref<4x8x8xf32, #tpu.memory_space<vmem>>, vector<4x8x8xf32>
    tpu.vector_store %arg22[%c0_30, %c0_31, %c0_32], %40 {strides = array<i32>} : memref<4x8x8xf32, #tpu.memory_space<vmem>>, vector<4x8x8xf32>,
    %c0_33 = arith.constant 0 : index
    %c0_34 = arith.constant 0 : index
    %c0_35 = arith.constant 0 : index
    %42 = vector.load %arg20[%c0_33, %c0_34, %c0_35] : memref<4x8x1xf32, #tpu.memory_space<vmem>>, vector<4x8x1xf32>
    tpu.vector_store %arg20[%c0_33, %c0_34, %c0_35], %24 {strides = array<i32>} : memref<4x8x1xf32, #tpu.memory_space<vmem>>, vector<4x8x1xf32>,
    %c1_i32 = arith.constant 1 : i32
    %43 = arith.cmpi eq, %arg2, %c1_i32 : i32
    %44 = arith.extui %43 : i1 to i32
    %c0_i32_36 = arith.constant 0 : i32
    %45 = arith.cmpi ne, %44, %c0_i32_36 : i32
    scf.if %45 {
      %c0_37 = arith.constant 0 : index
      %c0_38 = arith.constant 0 : index
      %46 = vector.load %arg16[%c0_37, %c0_38] : memref<1x32xf32, #tpu.memory_space<vmem>>, vector<1x32xf32>
      %c0_39 = arith.constant 0 : index
      %c0_40 = arith.constant 0 : index
      %47 = vector.load %arg17[%c0_39, %c0_40] : memref<1x32xf32, #tpu.memory_space<vmem>>, vector<1x32xf32>
      %c0_41 = arith.constant 0 : index
      %c0_42 = arith.constant 0 : index
      %c0_43 = arith.constant 0 : index
      %48 = vector.load %arg22[%c0_41, %c0_42, %c0_43] : memref<4x8x8xf32, #tpu.memory_space<vmem>>, vector<4x8x8xf32>
      %c0_44 = arith.constant 0 : index
      %c0_45 = arith.constant 0 : index
      %c0_46 = arith.constant 0 : index
      %49 = vector.load %arg21[%c0_44, %c0_45, %c0_46] : memref<4x8x1xf32, #tpu.memory_space<vmem>>, vector<4x8x1xf32>
      %50 = tpu.reciprocal %49 {approx = true} : vector<4x8x1xf32> -> vector<4x8x1xf32>
      %51 = vector.broadcast %50 : vector<4x8x1xf32> to vector<4x8x8xf32>
      %52 = arith.mulf %48, %51 : vector<4x8x8xf32>
      %c0_47 = arith.constant 0 : index
      %c0_48 = arith.constant 0 : index
      %c0_49 = arith.constant 0 : index
      %53 = vector.load %arg10[%c0_47, %c0_48, %c0_49] : memref<4x8x32xf32, #tpu.memory_space<vmem>>, vector<4x8x32xf32>
      %cst_50 = arith.constant dense<0.000000e+00> : vector<4x8x32xf32>
      %54 = tpu.matmul %52, %53, %cst_50 {dimension_numbers = #tpu.dot_dimension_numbers<[2], [1], [1], [2], [0, 0, 0, 1, 1, 2], [0], [0]>} : vector<4x8x8xf32>, vector<4x8x32xf32>, vector<4x8x32xf32> -> vector<4x8x32xf32>
      %cst_51 = arith.constant dense<0.000000e+00> : vector<8x32xf32>
      %55 = vector.multi_reduction <add>, %54, %cst_51 [0] : vector<4x8x32xf32> to vector<8x32xf32>
      %c0_52 = arith.constant 0 : index
      %c0_53 = arith.constant 0 : index
      %56 = vector.load %arg11[%c0_52, %c0_53] : memref<1x32xf32, #tpu.memory_space<vmem>>, vector<1x32xf32>
      %57 = vector.broadcast %56 : vector<1x32xf32> to vector<8x32xf32>
      %58 = arith.addf %55, %57 : vector<8x32xf32>
      %c0_54 = arith.constant 0 : index
      %c0_55 = arith.constant 0 : index
      %c0_56 = arith.constant 0 : index
      %59 = vector.load %arg3[%c0_54, %c0_55, %c0_56] : memref<1x8x32xf32, #tpu.memory_space<vmem>>, vector<1x8x32xf32>
      %60 = vector.shape_cast %59 : vector<1x8x32xf32> to vector<8x32xf32>
      %61 = arith.addf %60, %58 : vector<8x32xf32>
      %cst_57 = arith.constant dense<0.000000e+00> : vector<8xf32>
      %62 = vector.multi_reduction <add>, %61, %cst_57 [1] : vector<8x32xf32> to vector<8xf32>
      %63 = vector.shape_cast %62 : vector<8xf32> to vector<8x1xf32>
      %cst_58 = arith.constant 3.200000e+01 : f32
      %64 = vector.broadcast %cst_58 : f32 to vector<8x1xf32>
      %65 = arith.divf %63, %64 : vector<8x1xf32>
      %66 = vector.broadcast %65 : vector<8x1xf32> to vector<8x32xf32>
      %67 = arith.subf %61, %66 : vector<8x32xf32>
      %68 = arith.mulf %67, %67 : vector<8x32xf32>
      %cst_59 = arith.constant dense<0.000000e+00> : vector<8xf32>
      %69 = vector.multi_reduction <add>, %68, %cst_59 [1] : vector<8x32xf32> to vector<8xf32>
      %70 = vector.shape_cast %69 : vector<8xf32> to vector<8x1xf32>
      %cst_60 = arith.constant 3.200000e+01 : f32
      %71 = vector.broadcast %cst_60 : f32 to vector<8x1xf32>
      %72 = arith.divf %70, %71 : vector<8x1xf32>
      %73 = vector.broadcast %65 : vector<8x1xf32> to vector<8x32xf32>
      %74 = arith.subf %61, %73 : vector<8x32xf32>
      %cst_61 = arith.constant 9.99999974E-6 : f32
      %75 = vector.broadcast %cst_61 : f32 to vector<8x1xf32>
      %76 = arith.addf %72, %75 : vector<8x1xf32>
      %77 = math.rsqrt %76 : vector<8x1xf32>
      %78 = vector.broadcast %77 : vector<8x1xf32> to vector<8x32xf32>
      %79 = arith.mulf %74, %78 : vector<8x32xf32>
      %80 = vector.broadcast %46 : vector<1x32xf32> to vector<8x32xf32>
      %81 = arith.mulf %79, %80 : vector<8x32xf32>
      %82 = vector.broadcast %47 : vector<1x32xf32> to vector<8x32xf32>
      %83 = arith.addf %81, %82 : vector<8x32xf32>
      %c0_62 = arith.constant 0 : index
      %c0_63 = arith.constant 0 : index
      %84 = vector.load %arg12[%c0_62, %c0_63] : memref<32x64xf32, #tpu.memory_space<vmem>>, vector<32x64xf32>
      %cst_64 = arith.constant dense<0.000000e+00> : vector<8x64xf32>
      %85 = tpu.matmul %83, %84, %cst_64 {dimension_numbers = #tpu.dot_dimension_numbers<[1], [0], [0], [1], [0, 0, 1, 1], [], []>} : vector<8x32xf32>, vector<32x64xf32>, vector<8x64xf32> -> vector<8x64xf32>
      %c0_65 = arith.constant 0 : index
      %c0_66 = arith.constant 0 : index
      %86 = vector.load %arg13[%c0_65, %c0_66] : memref<1x64xf32, #tpu.memory_space<vmem>>, vector<1x64xf32>
      %87 = vector.broadcast %86 : vector<1x64xf32> to vector<8x64xf32>
      %88 = arith.addf %85, %87 : vector<8x64xf32>
      %cst_67 = arith.constant 0.000000e+00 : f32
      %89 = vector.broadcast %cst_67 : f32 to vector<8x64xf32>
      %90 = arith.maximumf %88, %89 : vector<8x64xf32>
      %c0_68 = arith.constant 0 : index
      %c0_69 = arith.constant 0 : index
      %91 = vector.load %arg14[%c0_68, %c0_69] : memref<64x32xf32, #tpu.memory_space<vmem>>, vector<64x32xf32>
      %cst_70 = arith.constant dense<0.000000e+00> : vector<8x32xf32>
      %92 = tpu.matmul %90, %91, %cst_70 {dimension_numbers = #tpu.dot_dimension_numbers<[1], [0], [0], [1], [0, 0, 1, 1], [], []>} : vector<8x64xf32>, vector<64x32xf32>, vector<8x32xf32> -> vector<8x32xf32>
      %c0_71 = arith.constant 0 : index
      %c0_72 = arith.constant 0 : index
      %93 = vector.load %arg15[%c0_71, %c0_72] : memref<1x32xf32, #tpu.memory_space<vmem>>, vector<1x32xf32>
      %94 = vector.broadcast %93 : vector<1x32xf32> to vector<8x32xf32>
      %95 = arith.addf %92, %94 : vector<8x32xf32>
      %96 = arith.addf %83, %95 : vector<8x32xf32>
      %cst_73 = arith.constant dense<0.000000e+00> : vector<8xf32>
      %97 = vector.multi_reduction <add>, %96, %cst_73 [1] : vector<8x32xf32> to vector<8xf32>
      %98 = vector.shape_cast %97 : vector<8xf32> to vector<8x1xf32>
      %cst_74 = arith.constant 3.200000e+01 : f32
      %99 = vector.broadcast %cst_74 : f32 to vector<8x1xf32>
      %100 = arith.divf %98, %99 : vector<8x1xf32>
      %101 = vector.broadcast %100 : vector<8x1xf32> to vector<8x32xf32>
      %102 = arith.subf %96, %101 : vector<8x32xf32>
      %103 = arith.mulf %102, %102 : vector<8x32xf32>
      %cst_75 = arith.constant dense<0.000000e+00> : vector<8xf32>
      %104 = vector.multi_reduction <add>, %103, %cst_75 [1] : vector<8x32xf32> to vector<8xf32>
      %105 = vector.shape_cast %104 : vector<8xf32> to vector<8x1xf32>
      %cst_76 = arith.constant 3.200000e+01 : f32
      %106 = vector.broadcast %cst_76 : f32 to vector<8x1xf32>
      %107 = arith.divf %105, %106 : vector<8x1xf32>
      %108 = vector.broadcast %100 : vector<8x1xf32> to vector<8x32xf32>
      %109 = arith.subf %96, %108 : vector<8x32xf32>
      %cst_77 = arith.constant 9.99999974E-6 : f32
      %110 = vector.broadcast %cst_77 : f32 to vector<8x1xf32>
      %111 = arith.addf %107, %110 : vector<8x1xf32>
      %112 = math.rsqrt %111 : vector<8x1xf32>
      %113 = vector.broadcast %112 : vector<8x1xf32> to vector<8x32xf32>
      %114 = arith.mulf %109, %113 : vector<8x32xf32>
      %115 = vector.broadcast %46 : vector<1x32xf32> to vector<8x32xf32>
      %116 = arith.mulf %114, %115 : vector<8x32xf32>
      %117 = vector.broadcast %47 : vector<1x32xf32> to vector<8x32xf32>
      %118 = arith.addf %116, %117 : vector<8x32xf32>
      %c0_78 = arith.constant 0 : index
      %c0_79 = arith.constant 0 : index
      %c0_80 = arith.constant 0 : index
      %119 = vector.load %arg18[%c0_78, %c0_79, %c0_80] : memref<1x8x32xf32, #tpu.memory_space<vmem>>, vector<1x8x32xf32>
      %120 = vector.shape_cast %119 : vector<1x8x32xf32> to vector<8x32xf32>
      %121 = vector.shape_cast %118 : vector<8x32xf32> to vector<1x8x32xf32>
      tpu.vector_store %arg18[%c0_78, %c0_79, %c0_80], %121 {strides = array<i32>} : memref<1x8x32xf32, #tpu.memory_space<vmem>>, vector<1x8x32xf32>,
    } else {
    }
    return
  }
  func.func @transform_0(%arg0: i32, %arg1: i32, %arg2: i32) -> (i32, i32, i32) {
    %c0_i32 = arith.constant 0 : i32
    %c0_i32_0 = arith.constant 0 : i32
    return %arg0, %arg1, %c0_i32 : i32, i32, i32
  }
  func.func @transform_1(%arg0: i32, %arg1: i32, %arg2: i32) -> (i32, i32, i32) {
    %c0_i32 = arith.constant 0 : i32
    %c0_i32_0 = arith.constant 0 : i32
    return %arg0, %arg2, %c0_i32 : i32, i32, i32
  }
  func.func @transform_2(%arg0: i32, %arg1: i32, %arg2: i32) -> (i32, i32, i32, i32) {
    %c0_i32 = arith.constant 0 : i32
    %c0_i32_0 = arith.constant 0 : i32
    %c0_i32_1 = arith.constant 0 : i32
    return %arg0, %arg2, %c0_i32, %c0_i32_0 : i32, i32, i32, i32
  }
  func.func @transform_3(%arg0: i32, %arg1: i32, %arg2: i32) -> (i32, i32) {
    %c0_i32 = arith.constant 0 : i32
    %c0_i32_0 = arith.constant 0 : i32
    %c0_i32_1 = arith.constant 0 : i32
    return %c0_i32, %c0_i32_0 : i32, i32
  }
  func.func @transform_4(%arg0: i32, %arg1: i32, %arg2: i32) -> (i32, i32) {
    %c0_i32 = arith.constant 0 : i32
    %c0_i32_0 = arith.constant 0 : i32
    %c0_i32_1 = arith.constant 0 : i32
    return %c0_i32, %c0_i32_0 : i32, i32
  }
  func.func @transform_5(%arg0: i32, %arg1: i32, %arg2: i32) -> (i32, i32) {
    %c0_i32 = arith.constant 0 : i32
    %c0_i32_0 = arith.constant 0 : i32
    %c0_i32_1 = arith.constant 0 : i32
    return %c0_i32, %c0_i32_0 : i32, i32
  }
  func.func @transform_6(%arg0: i32, %arg1: i32, %arg2: i32) -> (i32, i32) {
    %c0_i32 = arith.constant 0 : i32
    %c0_i32_0 = arith.constant 0 : i32
    %c0_i32_1 = arith.constant 0 : i32
    return %c0_i32, %c0_i32_0 : i32, i32
  }
  func.func @transform_7(%arg0: i32, %arg1: i32, %arg2: i32) -> (i32, i32, i32) {
    %c0_i32 = arith.constant 0 : i32
    %c0_i32_0 = arith.constant 0 : i32
    %c0_i32_1 = arith.constant 0 : i32
    %c0_i32_2 = arith.constant 0 : i32
    return %c0_i32, %c0_i32_0, %c0_i32_1 : i32, i32, i32
  }
  func.func @transform_8(%arg0: i32, %arg1: i32, %arg2: i32) -> (i32, i32) {
    %c0_i32 = arith.constant 0 : i32
    %c0_i32_0 = arith.constant 0 : i32
    %c0_i32_1 = arith.constant 0 : i32
    return %c0_i32, %c0_i32_0 : i32, i32
  }
  func.func @transform_9(%arg0: i32, %arg1: i32, %arg2: i32) -> (i32, i32) {
    %c0_i32 = arith.constant 0 : i32
    %c0_i32_0 = arith.constant 0 : i32
    %c0_i32_1 = arith.constant 0 : i32
    return %c0_i32, %c0_i32_0 : i32, i32
  }
  func.func @transform_10(%arg0: i32, %arg1: i32, %arg2: i32) -> (i32, i32) {
    %c0_i32 = arith.constant 0 : i32
    %c0_i32_0 = arith.constant 0 : i32
    %c0_i32_1 = arith.constant 0 : i32
    return %c0_i32, %c0_i32_0 : i32, i32
  }
  func.func @transform_11(%arg0: i32, %arg1: i32, %arg2: i32) -> (i32, i32) {
    %c0_i32 = arith.constant 0 : i32
    %c0_i32_0 = arith.constant 0 : i32
    %c0_i32_1 = arith.constant 0 : i32
    return %c0_i32, %c0_i32_0 : i32, i32
  }
  func.func @transform_12(%arg0: i32, %arg1: i32, %arg2: i32) -> (i32, i32) {
    %c0_i32 = arith.constant 0 : i32
    %c0_i32_0 = arith.constant 0 : i32
    %c0_i32_1 = arith.constant 0 : i32
    return %c0_i32, %c0_i32_0 : i32, i32
  }
  func.func @transform_13(%arg0: i32, %arg1: i32, %arg2: i32) -> (i32, i32) {
    %c0_i32 = arith.constant 0 : i32
    %c0_i32_0 = arith.constant 0 : i32
    %c0_i32_1 = arith.constant 0 : i32
    return %c0_i32, %c0_i32_0 : i32, i32
  }
  func.func @transform_14(%arg0: i32, %arg1: i32, %arg2: i32) -> (i32, i32) {
    %c0_i32 = arith.constant 0 : i32
    %c0_i32_0 = arith.constant 0 : i32
    %c0_i32_1 = arith.constant 0 : i32
    return %c0_i32, %c0_i32_0 : i32, i32
  }
  func.func @transform_15(%arg0: i32, %arg1: i32, %arg2: i32) -> (i32, i32, i32) {
    %c0_i32 = arith.constant 0 : i32
    %c0_i32_0 = arith.constant 0 : i32
    return %arg0, %arg1, %c0_i32 : i32, i32, i32
  }
}

</mosaic_0001>

<bundles_post_ra>
// kernel: tpu_custom_call.1
= control target key start
LH: loop header
LB: loop body
LE: loop exit
PB: predicated region body
PF: predicated region fallthrough
CT: control target
= control target key end

     0   :  { %s3488_s0 = inlined_call_operand.vmem [shape: f32[2,16,32], index: 0, kind: input, shape index: {}]   ;;  %s3489_s1 = inlined_call_operand.vmem [shape: f32[2,16,32], index: 1, kind: input, shape index: {}]   ;;  %s3490_s2 = inlined_call_operand.vmem [shape: f32[2,2,1,8], index: 2, kind: input, shape index: {}]   ;;  %s3491_s3 = inlined_call_operand.vmem [shape: f32[32,32], index: 3, kind: input, shape index: {}]   ;;  %s3492_s4 = inlined_call_operand.vmem [shape: f32[1,32], index: 4, kind: input, shape index: {}]   ;;  %s3493_s5 = inlined_call_operand.vmem [shape: f32[64,32], index: 5, kind: input, shape index: {}]   ;;  %s3494_s6 = inlined_call_operand.vmem [shape: f32[64,1], index: 6, kind: input, shape index: {}]   ;;  %s3495_s7 = inlined_call_operand.vmem [shape: f32[4,8,32], index: 7, kind: input, shape index: {}]   ;;  %s3496_s8 = inlined_call_operand.vmem [shape: f32[1,32], index: 8, kind: input, shape index: {}]   ;;  %s3497_s9 = inlined_call_operand.vmem [shape: f32[32,64], index: 9, kind: input, shape index: {}]   ;;  %s3498_s10 = inlined_call_operand.vmem [shape: f32[1,64], index: 10, kind: input, shape index: {}]   ;;  %s3499_s11 = inlined_call_operand.vmem [shape: f32[64,32], index: 11, kind: input, shape index: {}]   ;;  %s3500_s12 = inlined_call_operand.vmem [shape: f32[1,32], index: 12, kind: input, shape index: {}]   ;;  %s3501_s13 = inlined_call_operand.vmem [shape: f32[1,32], index: 13, kind: input, shape index: {}]   ;;  %s3502_s14 = inlined_call_operand.vmem [shape: f32[1,32], index: 14, kind: input, shape index: {}]   ;;  %s3503_s15 = inlined_call_operand.hbm [shape: f32[2,16,32], index: 15, kind: output, shape index: {}]  }
   0x1   :  { %3521 = sst [smem:[#allocation24_spill]] %s3488_s0 }
   0x2   :  { %3522 = sst [smem:[#allocation25_spill]] %s3489_s1 }
   0x3   :  { %3523 = sst [smem:[#allocation26_spill]] %s3500_s12 }
   0x4   :  { %3524 = sst [smem:[#allocation27_spill]] %s3503_s15 }
   0x5   :  { %20 = vsyncpa [#allocation7], 0 }
   0x6   :  { %22 = vsyncpa [#allocation7 + $0x1], 0  ;;  %s3037_s18 = smov 0   ;;  %s3039_s19 = smov 0  }
   0x7   :  { %s3041_s20 = smov 0   ;;  %s3043_s21 = smov 0  }
   0x8   :  { %s3045_s22 = smov 0   ;;  %s3047_s23 = smov 0  }
   0x9   :  { %s3049_s24 = smov 0   ;;  %s3051_s25 = smov 0  }
   0xa   :  { %s3053_s26 = smov 0   ;;  %s3055_s27 = smov 0  }
   0xb LB: > { %3525 = sst [smem:[#allocation9_spill]] %s2904_s18  ;;  %s2477_s28 = sadd.s32 4294967295, %s2940_s27   ;;  %s2940_s27 = sphi %s3055_s27, %s28_s27   ;;  %s2936_s26 = sphi %s3053_s26, %s3562_s26   ;;  %s2932_s25 = sphi %s3051_s25, %s3561_s25   ;;  %s2928_s24 = sphi %s3049_s24, %s3560_s24   ;;  %s2924_s23 = sphi %s3047_s23, %s3559_s23   ;;  %s2920_s22 = sphi %s3045_s22, %s3558_s22   ;;  %s2916_s21 = sphi %s3043_s21, %s3557_s21   ;;  %s2912_s20 = sphi %s3041_s20, %s3556_s20   ;;  %s2908_s19 = sphi %s3039_s19, %s3555_s19   ;;  %s2904_s18 = sphi %s3037_s18, %s3554_s18  }
   0xc   : > { %3526 = sst [smem:[#allocation10_spill]] %s2908_s19  ;;  %s2478_s29 = sadd.s32 4294967294, %s2940_s27  }
   0xd   : > { %3527 = sst [smem:[#allocation11_spill]] %s2912_s20  ;;  %s40_s30 = sadd.s32 1, %s2928_s24 }
   0xe   : > { %3528 = sst [smem:[#allocation12_spill]] %s2920_s22  ;;  %p41_p0 = scmp.ge.s32.totalorder %s40_s30, 2 }
   0xf   : > { %3529 = sst [smem:[#allocation13_spill]] %s2924_s23  ;;  %s43_s16 = sadd.s32 1, %s2932_s25 }
  0x10   : > { %3530 = sst [smem:[#allocation14_spill]] %s2928_s24  ;;  %s47_s17 = sadd.s32 1, %s2936_s26 }
  0x11   : > { %3531 = sst [smem:[#allocation15_spill]] %s2932_s25  ;;  %p402_p1 = scmp.ne.s32.totalorder %s2912_s20, %s2908_s19 }
  0x12   : > { %3532 = sst [smem:[#allocation16_spill]] %s2936_s26  ;;  %s3564_s30 = smov (%p41_p0, %s40_s30), 0 }
  0x13   : > { %3533 = sst [smem:[#allocation17_spill]] %s2940_s27  ;;  %s3566_s16 = smov (!%p41_p0, %s43_s16), %s2932_s25 }
  0x14   : > { %3534 = sst [smem:[#allocation18_spill]] %s3564_s30  ;;  %p403_p2 = scmp.eq.s32.totalorder %s2477_s28, 7 }
  0x15   : > { %p408_p3 = scmp.ne.s32.totalorder %s2908_s19, %s2904_s18  ;;  %p45_p4 = scmp.ge.s32.totalorder %s3566_s16, 2 }
  0x16   : > { %p409_p5 = scmp.eq.s32.totalorder %s2478_s29, 7  ;;  %p3099_p6 = por %p403_p2, %p402_p1 }
  0x17   : > { %s3568_s16 = smov (%p45_p4, %s3566_s16), 0  ;;  %s3570_s17 = smov (!%p45_p4, %s47_s17), %s2936_s26 }
  0x18   : > { %s3535_s15 = scalar_select %p3099_p6, 1, 0 }
  0x19   : > { %3537 = sst [smem:[#allocation20_spill]] %s3568_s16  ;;  %p3106_p7 = por %p409_p5, %p408_p3 }
  0x1a   : > { %3536 = sst [smem:[#allocation19_spill]] %s3535_s15  ;;  %p2481_p8 = scmp.ge.s32.totalorder %s2940_s27, 1 }
  0x1b   : > { %s3538_s24 = scalar_select %p3106_p7, 1, 0 }
  0x1c   : > { %p49_p9 = scmp.ge.s32.totalorder %s3570_s17, 2  ;;  %p495_p10 = scmp.lt.s32.totalorder %s2940_s27, 9 }
  0x1d   : > { %3539 = sst [smem:[#allocation21_spill]] %s3538_s24  ;;  %s388_s28 = ssub.s32 %s2932_s25, %s3568_s16 }
  0x1e   : > { %s3572_s17 = smov (%p49_p9, %s3570_s17), 0  ;;  %p496_p11 = pnand %p2481_p8, %p495_p10 }
  0x1f   : > { %3540 = sst [smem:[#allocation22_spill]] %s3572_s17  ;;  %s387_s29 = ssub.s32 %s2936_s26, %s3572_s17 }
  0x20   : > { %s389_s30 = sor.u32 %s388_s28, %s387_s29  ;;  %s392_s18 = sadd.s32 1, %s2912_s20 }
  0x21   : > { %p390_p12 = scmp.eq.s32.totalorder %s389_s30, 0  ;;  %499 = sbr.rel (%p496_p11) target bundleno = 2678 (0xa76), region = 80 }
  0x22   : > { %s3517_s16 = sand.u32 (!%p496_p11), 1, %s2908_s19   ;;  %p561_p13 = scmp.lt.s32.totalorder (!%p496_p11), %s2924_s23, 1 }
  0x23   : > { %s3120_s15 = scalar_select %p390_p12, %s2912_s20, %s392_s18  }
  0x24   : > { %s3126_s25 = sshll.u32 (!%p496_p11), %s3517_s16, 3  ;;  %p563_p0 = scmp.lt.s32.totalorder (!%p496_p11), %s2920_s22, 1 }
  0x25   : > { %3541 = sst [smem:[#allocation23_spill]] %s3120_s15  ;;  %p571_p1 = scmp.lt.s32.totalorder (!%p496_p11), %s2916_s21, 1 }
  0x26   : > { %s562_s28 = scalar_select %p561_p13, %s2924_s23, 1 }
  0x27   : > { %s564_s30 = scalar_select %p563_p0, %s2920_s22, 1 }
  0x28   : > { %s2483_s18 = sshll.u32 %s562_s28, 1  ;;  %s3542_s0 = sld [smem:[#allocation24_spill]] }
  0x29   : > { %s566_s29 = sadd.s32 %s2483_s18, %s564_s30  ;;  %s3543_s1 = sld [smem:[#allocation25_spill]] }
  0x2a   : > { %s2484_s17 = sshll.u32 %s566_s29, 3  ;;  %s560_s29 = scalar_lea.vmem [#allocation6], %s3126_s25 }
  0x2b   : > { %s572_s24 = scalar_select %p571_p1, %s2916_s21, 1 }
  0x2c   : > { %p2488_p2 = scmp.ne.s32.totalorder %s2916_s21, 0 }
  0x2d   : > { %s3138_s27 = sadd.s32 %s2483_s18, %s572_s24  ;;  %s2945_s15 = smov (!%p2488_p2), 104  }
  0x2e   : > { %s3135_s20 = scalar_lea.vmem %s3542_s0, %s2484_s17  ;;  %s2486_s16 = sshll.u32 %s3138_s27, 3 }
  0x2f   : > { %s583_s23 = scalar_lea.vmem %s3490_s2, %s3138_s27  ;;  %s3148_s30 = scalar_lea.vmem %s3543_s1, %s2486_s16 }
  0x30   : > { %587 = sbr.rel (%p2488_p2) target bundleno = 398 (0x18e), region = 84  ;;  %s2946_s24 = smov (!%p2488_p2), 120  }
  0x31   : > { %s2947_s12 = smov (!%p2488_p2), 112  }
  0x35   : > { %vm826_vm0 = vcmask 7168   ;;  %v592_v0 = vld [vmem:[%s3491_s3 + $0x18] sm:$0xff]  ;;  %v2942_v1 = vmov 0.0   ;;  %v2943_v2 = vmov -inf   ;;  %v591_v3 = vld [vmem:[%s3491_s3 + $0x10] sm:$0xff]  ;;  %vm2944_vm1 = vmmov 0  }
  0x36   : > { %2584 = vmatprep.subr.mxu0 %v2942_v1  ;;  %827 = vst.msk [vmem:[#allocation3] sm:$0xff] %vm826_vm0, %v2943_v2  ;;  %828 = vst.msk [vmem:[#allocation3 + $0x8] sm:$0xff] %vm826_vm0, %v2943_v2  ;;  %2592 = vmatprep.mubr.msk.f32.mxu0 %vm2944_vm1, %v2942_v1  ;;  %v590_v4 = vld [vmem:[%s3491_s3 + $0x8] sm:$0xff]  ;;  %v589_v5 = vld [vmem:[%s3491_s3] sm:$0xff]  ;;  %vm600_vm2 = vcmask 261120   ;;  %vm821_vm3 = vcmask 64512   ;;  %v690_v14 = vlaneseq }
  0x37   : > { %829 = vst.msk [vmem:[#allocation3 + $0x10] sm:$0xff] %vm826_vm0, %v2943_v2  ;;  %830 = vst.msk [vmem:[#allocation3 + $0x18] sm:$0xff] %vm826_vm0, %v2943_v2  ;;  %2585 = vmatpush3.msra.mxu0 %v592_v0  ;;  %v588_v6 = vld [vmem:[%s3135_s20] sm:$0xff]  ;;  %v2948_v12 = vmov 1983009808  }
  0x38   : > { %831 = vst.msk [vmem:[#allocation4] sm:$0xff] %vm826_vm0, %v2942_v1  ;;  %832 = vst.msk [vmem:[#allocation4 + $0x8] sm:$0xff] %vm826_vm0, %v2942_v1  ;;  %2586 = vmatprep.subr.mxu0 %v2942_v1  ;;  %v2489_v7 = vld [vmem:[%s3492_s4] ss:$0 sm:$0xff]  ;;  %v688_v13 = vunpack.c.l.s4 %v2948_v12  ;;  %v2949_v15 = vmov 1934713408  }
  0x39   : > { %833 = vst.msk [vmem:[#allocation4 + $0x10] sm:$0xff] %vm826_vm0, %v2942_v1  ;;  %834 = vst.msk [vmem:[#allocation4 + $0x18] sm:$0xff] %vm826_vm0, %v2942_v1  ;;  %2587 = vmatpush3.msra.mxu0 %v591_v3  ;;  %v720_v16 = vunpack.c.l.s4 %v2949_v15  ;;  %v691_v18 = vshrl.u32 %v690_v14, 7 }
  0x3a   : > { %2588 = vmatprep.subr.mxu0 %v2942_v1  ;;  %835 = vst.msk [vmem:[#allocation5] sm:$0xff] %vm821_vm3, %v2942_v1  ;;  %836 = vst.msk [vmem:[#allocation5 + $0x8] sm:$0xff] %vm821_vm3, %v2942_v1  ;;  %v689_v17 = vunpack.c.0.s8 %v688_v13 }
  0x3b   : > { %2589 = vmatpush3.msra.mxu0 %v590_v4  ;;  %837 = vst.msk [vmem:[#allocation5 + $0x10] sm:$0xff] %vm821_vm3, %v2942_v1  ;;  %838 = vst.msk [vmem:[#allocation5 + $0x18] sm:$0xff] %vm821_vm3, %v2942_v1  ;;  %v721_v21 = vunpack.c.0.s8 %v720_v16 }
  0x3c   : > { %2590 = vmatprep.subr.mxu0 %v2942_v1  ;;  %v692_v22 = vsub.s32 %v689_v17, %v691_v18 }
  0x3d   : > { %2591 = vmatpush3.msra.mxu0 %v589_v5  ;;  %v724_v28 = vsub.s32 %v721_v21, %v691_v18 }
  0x3e   : > { %2593 = vmatmul.mubr.msk.f32.vlgmr.msra.gmra.mxu0 %vm600_vm2, %v588_v6 }
  0xfe   : > { %v670_v8 = vpop.f32.mrf.mxu0 }
  0xff   : > { %v671_v9 = vadd.f32 %v2489_v7, %v670_v8 }
 0x100   : > { %v2594_v10 = vpop.f32.mrf.mxu0 }
 0x101   : > { %v674_v11 = vmul.f32 0.35355338, %v671_v9 }
 0x103   : > { %682 = vrot.lane.b32.xlu1 %v674_v11, %s2945_s15  ;;  %676 = vrot.lane.b32.xlu0 %v674_v11, %s2946_s24 }
 0x107   : > { %679 = vrot.lane.b32.xlu0 %v674_v11, %s2947_s12 }
 0x175   : > { %v683_v19 = vpop.permute.xlu1 %682  ;;  %v677_v20 = vpop.permute.xlu0 %676 }
 0x176   : > { %v701_v23 = vcombine.low %v677_v20, %v683_v19  ;;  %v702_v24 = vcombine.high %v677_v20, %v683_v19 }
 0x178   : > { %v709_v29 = vrot.slane %v701_v23, %v692_v22  ;;  %v716_v30 = vrot.slane %v702_v24, %v692_v22 }
 0x179   : > { %v680_v25 = vpop.permute.xlu0 %679 }
 0x17a   : > { %v685_v26 = vcombine.low %v674_v11, %v680_v25  ;;  %v686_v27 = vcombine.high %v674_v11, %v680_v25 }
 0x17c   : > { %v693_v31 = vrot.slane %v685_v26, %v692_v22  ;;  %v700_v32 = vrot.slane %v686_v27, %v692_v22 }
 0x17e   : > { %v717_v33 = vcombine.low %v693_v31, %v709_v29  ;;  %v718_v34 = vcombine.high %v693_v31, %v709_v29  ;;  %v733_v35 = vcombine.low %v700_v32, %v716_v30  ;;  %v734_v36 = vcombine.high %v700_v32, %v716_v30 }
 0x180   : > { %v725_v37 = vrot.slane %v717_v33, %v724_v28  ;;  %v732_v38 = vrot.slane %v718_v34, %v724_v28  ;;  %v741_v39 = vrot.slane %v733_v35, %v724_v28  ;;  %v748_v40 = vrot.slane %v734_v36, %v724_v28 }
 0x182   : > { %v753_v41 = vcombine.low %v725_v37, %v732_v38  ;;  %v2491_v42 = vcombine.high %v725_v37, %v732_v38  ;;  %v769_v43 = vcombine.low %v741_v39, %v748_v40  ;;  %v2492_v44 = vcombine.high %v741_v39, %v748_v40 }
 0x184   : > { %v760_v45 = vrot.slane %v753_v41, %v692_v22  ;;  %v768_v46 = vrot.slane %v2491_v42, %v692_v22  ;;  %v776_v47 = vrot.slane %v769_v43, %v692_v22  ;;  %v784_v48 = vrot.slane %v2492_v44, %v692_v22 }
 0x186   : > { %v785_v49 = vcombine.low %v760_v45, %v768_v46  ;;  %v786_v50 = vcombine.high %v760_v45, %v768_v46  ;;  %v801_v51 = vcombine.low %v776_v47, %v784_v48  ;;  %v802_v52 = vcombine.high %v776_v47, %v784_v48 }
 0x188   : > { %v793_v53 = vrot.slane %v785_v49, %v724_v28  ;;  %v800_v54 = vrot.slane %v786_v50, %v724_v28  ;;  %v809_v55 = vrot.slane %v801_v51, %v724_v28  ;;  %v816_v56 = vrot.slane %v802_v52, %v724_v28 }
 0x18a   : > { %v817_v57 = vcombine.low %v793_v53, %v809_v55  ;;  %v818_v58 = vcombine.high %v793_v53, %v809_v55  ;;  %v819_v59 = vcombine.low %v800_v54, %v816_v56  ;;  %v820_v60 = vcombine.high %v800_v54, %v816_v56 }
 0x18c   : > { %822 = vst.msk [vmem:[#allocation2] sm:$0xff] %vm821_vm3, %v817_v57  ;;  %823 = vst.msk [vmem:[#allocation2 + $0x8] sm:$0xff] %vm821_vm3, %v818_v58 }
 0x18d   : > { %824 = vst.msk [vmem:[#allocation2 + $0x10] sm:$0xff] %vm821_vm3, %v819_v59  ;;  %825 = vst.msk [vmem:[#allocation2 + $0x18] sm:$0xff] %vm821_vm3, %v820_v60 }
 0x18e PF: > { %v839_v61 = vld [vmem:[%s3148_s30] sm:$0xff]  ;;  %vm896_vm4 = vcmask 261120   ;;  %v841_v0 = vld [vmem:[%s3493_s5 + $0x8] sm:$0xff]  ;;  %v2950_v1 = vmov 0   ;;  %v850_v2 = vld [vmem:[%s3494_s6 + $0x10] sm:$0xff]  ;;  %v2951_v7 = vmov 0.0  }
 0x18f   : > { %v840_v62 = vld [vmem:[%s3493_s5] sm:$0xff]  ;;  %2595 = vmatprep.subr.msk.mxu0 %vm896_vm4, %v839_v61  ;;  %2800 = vset.pattern.permute.xlu0 %v2950_v1  ;;  %v842_v3 = vld [vmem:[%s3493_s5 + $0x10] sm:$0xff]  ;;  %v849_v4 = vld [vmem:[%s3494_s6 + $0x8] sm:$0xff]  ;;  %vm2952_vm5 = vmmov 0   ;;  %vm1040_vm6 = vcmask 64512   ;;  %vm1421_vm7 = vcmask 7168  }
 0x190   : > { %2597 = vmatprep.mubr.msk.f32.mxu0 %vm896_vm4, %v840_v62  ;;  %v848_v63 = vld [vmem:[%s3494_s6] sm:$0xff]  ;;  %2596 = vmatpush3.xpose.msk.msra.mxu0 %vm896_vm4, %v839_v61  ;;  %v851_v5 = vld [vmem:[%s3494_s6 + $0x18] sm:$0xff]  ;;  %v845_v25 = vld [vmem:[%s3493_s5 + $0x28] sm:$0xff]  ;;  %p2515_p3 = scmp.ne.s32.totalorder %s2916_s21, 1 }
 0x191   : > { %858 = vperm.xlu0 %2800, %v848_v63   ;;  %2801 = vset.pattern.permute.xlu1 %v2950_v1  ;;  %v843_v6 = vld [vmem:[%s3493_s5 + $0x18] sm:$0xff]  ;;  %v844_v24 = vld [vmem:[%s3493_s5 + $0x20] sm:$0xff]  ;;  %v846_v26 = vld [vmem:[%s3493_s5 + $0x30] sm:$0xff]  ;;  %s3544_s15 = sld [smem:[#allocation26_spill]] (!%p2515_p3) }
 0x192   : > { %868 = vperm.xlu1 %2801, %v850_v2   ;;  %2609 = vmatprep.subr.mxu1 %v2951_v7  ;;  %v847_v27 = vld [vmem:[%s3493_s5 + $0x38] sm:$0xff]  ;;  %v2502_v28 = vld [vmem:[%s583_s23] ss:$0 sm:$0xff]  ;;  %v3257_v48 = vld [vmem:[#allocation3 + $0x8] sm:$0xff] }
 0x193   : > { %2598 = vmatmul.mubr.msk.f32.vlgmr.msra.gmra.mxu0 %vm896_vm4, %v841_v0  ;;  %2634 = vmatprep.subr.mxu0 %v2951_v7  ;;  %v1029_v13 = vld [vmem:[#allocation2] sm:$0xff]  ;;  %v1030_v19 = vld [vmem:[#allocation2 + $0x8] sm:$0xff]  ;;  %v3263_v52 = vld [vmem:[#allocation3 + $0x10] sm:$0xff] }
 0x194   : > { %2600 = vmatprep.mubr.msk.f32.mxu0 %vm896_vm4, %v842_v3  ;;  %2611 = vmatprep.mubr.msk.f32.mxu1 %vm2952_vm5, %v2951_v7  ;;  %v1031_v21 = vld [vmem:[#allocation2 + $0x10] sm:$0xff]  ;;  %v1032_v23 = vld [vmem:[#allocation2 + $0x18] sm:$0xff]  ;;  %v1333_v45 = vld [vmem:[#allocation3] sm:$0xff] }
 0x195   : > { %863 = vperm.xlu0 %2800, %v849_v4   ;;  %v852_v55 = vld [vmem:[%s3494_s6 + $0x20] sm:$0xff]  ;;  %v3274_v58 = vld [vmem:[#allocation3 + $0x18] sm:$0xff]  ;;  %v854_v61 = vld [vmem:[%s3494_s6 + $0x30] sm:$0xff] }
 0x196   : > { %873 = vperm.xlu1 %2801, %v851_v5   ;;  %v853_v0 = vld [vmem:[%s3494_s6 + $0x28] sm:$0xff]  ;;  %v855_v1 = vld [vmem:[%s3494_s6 + $0x38] sm:$0xff] }
 0x197   : > { %2601 = vmatmul.mubr.msk.f32.gmra.mxu0 %vm896_vm4, %v843_v6 }
 0x198   : > { %2603 = vmatprep.mubr.msk.f32.mxu0 %vm896_vm4, %v844_v24 }
 0x19b   : > { %2604 = vmatmul.mubr.msk.f32.gmra.mxu0 %vm896_vm4, %v845_v25 }
 0x19c   : > { %2606 = vmatprep.mubr.msk.f32.mxu0 %vm896_vm4, %v846_v26 }
 0x19f   : > { %2607 = vmatmul.mubr.msk.f32.gmra.mxu0 %vm896_vm4, %v847_v27 }
 0x1a0   : > { %2636 = vmatprep.mubr.msk.f32.mxu0 %vm2952_vm5, %v2951_v7 }
 0x20c   : > { %v859_v8 = vpop.permute.xlu0 %858 }
 0x20d   : > { %v869_v14 = vpop.permute.xlu1 %868 }
 0x210   : > { %v864_v10 = vpop.permute.xlu0 %863 }
 0x211   : > { %v874_v20 = vpop.permute.xlu1 %873 }
 0x253   : > { %v2599_v9 = vpop.f32.mrf.mxu0 }
 0x254   : > { %v996_v16 = vadd.f32 %v2599_v9, %v864_v10 }
 0x255   : > { %v990_v11 = vpop.f32.mrf.mxu0 }
 0x256   : > { %v991_v12 = vadd.f32 %v990_v11, %v859_v8 }
 0x257   : > { %v2602_v15 = vpop.f32.mrf.mxu0 }
 0x258   : > { %2610 = vmatpush3.msra.mxu1 %v991_v12  ;;  %v1006_v22 = vadd.f32 %v2602_v15, %v874_v20 }
 0x259   : > { %2612 = vmatmul.mubr.msk.f32.vlgmr.msra.gmra.mxu1 %vm1040_vm6, %v1029_v13  ;;  %2614 = vmatprep.subr.mxu1 %v2951_v7  ;;  %v1000_v17 = vpop.f32.mrf.mxu0 }
 0x25a   : > { %2615 = vmatpush3.msra.mxu1 %v996_v16  ;;  %v1001_v18 = vadd.f32 %v1000_v17, %v869_v14  ;;  %2616 = vmatprep.mubr.msk.f32.mxu1 %vm2952_vm5, %v2951_v7 }
 0x25b   : > { %2619 = vmatprep.subr.mxu1 %v2951_v7  ;;  %v2605_v5 = vpop.f32.mrf.mxu0 }
 0x25d   : > { %2617 = vmatmul.mubr.msk.f32.vlgmr.msra.gmra.mxu1 %vm1040_vm6, %v1030_v19  ;;  %v1010_v10 = vpop.f32.mrf.mxu0 }
 0x25e   : > { %2620 = vmatpush3.msra.mxu1 %v1001_v18  ;;  %2621 = vmatprep.mubr.msk.f32.mxu1 %vm2952_vm5, %v2951_v7 }
 0x25f   : > { %2624 = vmatprep.subr.mxu1 %v2951_v7  ;;  %v2608_v17 = vpop.f32.mrf.mxu0 }
 0x261   : > { %2622 = vmatmul.mubr.msk.f32.vlgmr.msra.gmra.mxu1 %vm1040_vm6, %v1031_v21  ;;  %v1020_v20 = vpop.f32.mrf.mxu0 }
 0x262   : > { %2625 = vmatpush3.msra.mxu1 %v1006_v22  ;;  %2626 = vmatprep.mubr.msk.f32.mxu1 %vm2952_vm5, %v2951_v7 }
 0x263   : > { %2629 = vmatprep.subr.mxu1 %v2951_v7 }
 0x265   : > { %2627 = vmatmul.mubr.msk.f32.vlgmr.msra.gmra.mxu1 %vm1040_vm6, %v1032_v23 }
 0x266   : > { %2631 = vmatprep.mubr.msk.f32.mxu1 %vm2952_vm5, %v2951_v7 }
 0x319   : > { %v1110_v29 = vpop.f32.mrf.mxu1 }
 0x31a   : > { %v1111_v30 = vadd.f32 %v2502_v28, %v1110_v29 }
 0x31b   : > { %v2613_v31 = vpop.f32.mrf.mxu1 }
 0x31c   : > { %v1337_v32 = vsel %vm1040_vm6, %v1111_v30, -inf }
 0x31d   : > { %1338 = vmax.xlane.f32.xlu0 %v1337_v32  ;;  %v1183_v33 = vpop.f32.mrf.mxu1 }
 0x31e   : > { %v1184_v34 = vadd.f32 %v2502_v28, %v1183_v33 }
 0x31f   : > { %v2618_v35 = vpop.f32.mrf.mxu1 }
 0x320   : > { %v1340_v36 = vsel %vm1040_vm6, %v1184_v34, -inf }
 0x321   : > { %1341 = vmax.xlane.f32.xlu1 %v1340_v36  ;;  %v1256_v37 = vpop.f32.mrf.mxu1 }
 0x322   : > { %v1257_v38 = vadd.f32 %v2502_v28, %v1256_v37 }
 0x323   : > { %v2623_v39 = vpop.f32.mrf.mxu1 }
 0x324   : > { %v1343_v40 = vsel %vm1040_vm6, %v1257_v38, -inf }
 0x325   : > { %1344 = vmax.xlane.f32.xlu0 %v1343_v40  ;;  %v1329_v41 = vpop.f32.mrf.mxu1 }
 0x326   : > { %v3253_v42 = vadd.f32 %v2502_v28, %v1329_v41  ;;  %v1397_v41 = vld [vmem:[#allocation4] sm:$0xff] }
 0x327   : > { %v2628_v43 = vpop.f32.mrf.mxu1 }
 0x328   : > { %v1346_v44 = vsel %vm1040_vm6, %v3253_v42, -inf }
 0x329   : > { %1347 = vmax.xlane.f32.xlu0 %v1346_v44 }
 0x3a6   : > { %v1339_v46 = vpop.xlane.xlu0 %1338 }
 0x3a7   : > { %v1349_v47 = vmax.f32 %v1333_v45, %v1339_v46 }
 0x3a9   : > { %1766 = vst.msk [vmem:[#allocation3] sm:$0xff] %vm1421_vm7, %v1349_v47  ;;  %1367 = vperm.xlu1 %2801, %v1349_v47   ;;  %v1353_v50 = vsub.f32 %v1333_v45, %v1349_v47  ;;  %v1398_v45 = vld [vmem:[#allocation4 + $0x8] sm:$0xff] }
 0x3aa   : > { %v1342_v49 = vpop.xlane.xlu1 %1341 }
 0x3ab   : > { %v3261_v51 = vmax.f32 %v3257_v48, %v1342_v49  ;;  %v1357_v56 = vmul.f32 1.442695, %v1353_v50 }
 0x3ad   : > { %v1354_v53 = vsub.f32 %v3257_v48, %v3261_v51  ;;  %1767 = vst.msk [vmem:[#allocation3 + $0x8] sm:$0xff] %vm1421_vm7, %v3261_v51  ;;  %1372 = vperm.xlu0 %2800, %v3261_v51   ;;  %2802 = vpow2.f32 %v1357_v56  ;;  %v1399_v48 = vld [vmem:[#allocation4 + $0x10] sm:$0xff] }
 0x3ae   : > { %v1345_v54 = vpop.xlane.xlu0 %1344 }
 0x3af   : > { %v1351_v57 = vmax.f32 %v3263_v52, %v1345_v54 }
 0x3b1   : > { %v1355_v59 = vsub.f32 %v3263_v52, %v1351_v57  ;;  %1768 = vst.msk [vmem:[#allocation3 + $0x10] sm:$0xff] %vm1421_vm7, %v1351_v57  ;;  %1377 = vperm.xlu1 %2801, %v1351_v57   ;;  %878 = vperm.xlu0 %2800, %v852_v55  }
 0x3b2   : > { %v1348_v60 = vpop.xlane.xlu0 %1347 }
 0x3b3   : > { %v1352_v62 = vmax.f32 %v3274_v58, %v1348_v60  ;;  %v1361_v31 = vmul.f32 1.442695, %v1355_v59  ;;  %v1731_v60 = vld [vmem:[#allocation5 + $0x8] sm:$0xff] }
 0x3b5   : > { %v1356_v63 = vsub.f32 %v3274_v58, %v1352_v62  ;;  %1769 = vst.msk [vmem:[#allocation3 + $0x18] sm:$0xff] %vm1421_vm7, %v1352_v62  ;;  %888 = vperm.xlu0 %2800, %v854_v61   ;;  %1382 = vperm.xlu1 %2801, %v1352_v62   ;;  %v1730_v58 = vld [vmem:[#allocation5] sm:$0xff] }
 0x3b9   : > { %883 = vperm.xlu1 %2801, %v853_v0  }
 0x3ba   : > { %v3290_v2 = vpop.eup %2802 }
 0x3bd   : > { %893 = vperm.xlu1 %2801, %v855_v1  }
 0x3c1   : > { %1736 = vperm.xlu1 %2801, %v3290_v2  }
 0x424   : > { %v1368_v3 = vpop.permute.xlu1 %1367 }
 0x425   : > { %v1385_v4 = vsub.f32 %v1111_v30, %v1368_v3  ;;  %v1732_v3 = vld [vmem:[#allocation5 + $0x10] sm:$0xff] }
 0x427   : > { %v1389_v6 = vmul.f32 1.442695, %v1385_v4 }
 0x428   : > { %v1373_v8 = vpop.permute.xlu0 %1372 }
 0x429   : > { %2804 = vpow2.f32 %v1389_v6  ;;  %v1386_v9 = vsub.f32 %v1184_v34, %v1373_v8  ;;  %v1363_v34 = vmul.f32 1.442695, %v1356_v63 }
 0x42b   : > { %v1391_v11 = vmul.f32 1.442695, %v1386_v9  ;;  %v1733_v9 = vld [vmem:[#allocation5 + $0x18] sm:$0xff] }
 0x42c   : > { %v1378_v12 = vpop.permute.xlu1 %1377  ;;  %v879_v13 = vpop.permute.xlu0 %878 }
 0x42d   : > { %2806 = vpow2.f32 %v1391_v11  ;;  %v1387_v14 = vsub.f32 %v1257_v38, %v1378_v12  ;;  %v1011_v15 = vadd.f32 %v1010_v10, %v879_v13  ;;  %v1359_v38 = vmul.f32 1.442695, %v1354_v53  ;;  %v1400_v53 = vld [vmem:[#allocation4 + $0x18] sm:$0xff] }
 0x42f   : > { %v1393_v16 = vmul.f32 1.442695, %v1387_v14  ;;  %2630 = vmatpush3.xpose.msk.msra.mxu1 %vm1040_vm6, %v1011_v15 }
 0x430   : > { %v1383_v18 = vpop.permute.xlu1 %1382  ;;  %2639 = vmatprep.subr.mxu1 %v2951_v7  ;;  %v889_v22 = vpop.permute.xlu0 %888 }
 0x431   : > { %2808 = vpow2.f32 %v1393_v16  ;;  %v1388_v19 = vsub.f32 %v3253_v42, %v1383_v18  ;;  %v1021_v26 = vadd.f32 %v1020_v20, %v889_v22  ;;  %v1401_v42 = vmul.f32 %v3290_v2, %v1397_v41 }
 0x433   : > { %v1395_v21 = vmul.f32 1.442695, %v1388_v19 }
 0x434   : > { %v884_v23 = vpop.permute.xlu1 %883 }
 0x435   : > { %2810 = vpow2.f32 %v1395_v21  ;;  %v1016_v24 = vadd.f32 %v2605_v5, %v884_v23 }
 0x436   : > { %v2805_v25 = vpop.eup %2804  ;;  %2812 = vpow2.f32 %v1361_v31 }
 0x437   : > { %2632 = vmatmul.mubr.msk.f32.vlgmr.msra.gmra.mxu1 %vm1040_vm6, %v2805_v25  ;;  %2635 = vmatpush3.xpose.msk.msra.mxu0 %vm1040_vm6, %v1016_v24  ;;  %v1405_v27 = vsel %vm1040_vm6, %v2805_v25, 0.0  ;;  %2814 = vpow2.f32 %v1363_v34 }
 0x438   : > { %2640 = vmatpush3.xpose.msk.msra.mxu1 %vm1040_vm6, %v1021_v26  ;;  %1406 = vadd.xlane.f32.xlu0 %v1405_v27  ;;  %v894_v28 = vpop.permute.xlu1 %893  ;;  %2816 = vpow2.f32 %v1359_v38 }
 0x439   : > { %v1026_v29 = vadd.f32 %v2608_v17, %v894_v28  ;;  %2644 = vmatprep.subr.mxu0 %v2951_v7  ;;  %2641 = vmatprep.mubr.msk.f32.mxu1 %vm2952_vm5, %v2951_v7 }
 0x43a   : > { %v2807_v30 = vpop.eup %2806 }
 0x43b   : > { %2637 = vmatmul.mubr.msk.f32.vlgmr.msra.gmra.mxu0 %vm1040_vm6, %v2807_v30  ;;  %v1408_v32 = vsel %vm1040_vm6, %v2807_v30, 0.0 }
 0x43c   : > { %2645 = vmatpush3.xpose.msk.msra.mxu0 %vm1040_vm6, %v1026_v29  ;;  %1409 = vadd.xlane.f32.xlu1 %v1408_v32  ;;  %v1737_v43 = vpop.permute.xlu1 %1736 }
 0x43d   : > { %2646 = vmatprep.mubr.msk.f32.mxu0 %vm2952_vm5, %v2951_v7  ;;  %v1754_v59 = vmul.f32 %v1737_v43, %v1730_v58 }
 0x43e   : > { %v2809_v33 = vpop.eup %2808 }
 0x43f   : > { %2642 = vmatmul.mubr.msk.f32.vlgmr.msra.gmra.mxu1 %vm1040_vm6, %v2809_v33  ;;  %v1411_v35 = vsel %vm1040_vm6, %v2809_v33, 0.0 }
 0x440   : > { %1412 = vadd.xlane.f32.xlu0 %v1411_v35 }
 0x442   : > { %v2811_v36 = vpop.eup %2810 }
 0x443   : > { %2647 = vmatmul.mubr.msk.f32.vlgmr.msra.gmra.mxu0 %vm1040_vm6, %v2811_v36  ;;  %v1414_v37 = vsel %vm1040_vm6, %v2811_v36, 0.0  ;;  %v2813_v7 = vpop.eup %2812 }
 0x444   : > { %1415 = vadd.xlane.f32.xlu0 %v1414_v37  ;;  %v2815_v39 = vpop.eup %2814  ;;  %v1403_v51 = vmul.f32 %v2813_v7, %v1399_v48 }
 0x445   : > { %v2817_v40 = vpop.eup %2816  ;;  %v1404_v55 = vmul.f32 %v2815_v39, %v1400_v53 }
 0x446   : > { %v1402_v47 = vmul.f32 %v2817_v40, %v1398_v45 }
 0x44d   : > { %1746 = vperm.xlu1 %2801, %v2813_v7  }
 0x451   : > { %1751 = vperm.xlu1 %2801, %v2815_v39  }
 0x45a   : > { %1741 = vperm.xlu0 %2800, %v2817_v40  }
 0x4c1   : > { %v1407_v44 = vpop.xlane.xlu0 %1406 }
 0x4c2   : > { %v1417_v46 = vadd.f32 %v1407_v44, %v1401_v42 }
 0x4c4   : > { %1422 = vst.msk [vmem:[#allocation4] sm:$0xff] %vm1421_vm7, %v1417_v46 }
 0x4c5   : > { %v1410_v49 = vpop.xlane.xlu1 %1409 }
 0x4c6   : > { %v1418_v50 = vadd.f32 %v1410_v49, %v1402_v47 }
 0x4c8   : > { %1423 = vst.msk [vmem:[#allocation4 + $0x8] sm:$0xff] %vm1421_vm7, %v1418_v50 }
 0x4c9   : > { %v1413_v52 = vpop.xlane.xlu0 %1412  ;;  %v1747_v0 = vpop.permute.xlu1 %1746 }
 0x4ca   : > { %v1419_v54 = vadd.f32 %v1413_v52, %v1403_v51  ;;  %v1756_v8 = vmul.f32 %v1747_v0, %v1732_v3 }
 0x4cc   : > { %1424 = vst.msk [vmem:[#allocation4 + $0x10] sm:$0xff] %vm1421_vm7, %v1419_v54 }
 0x4cd   : > { %v1416_v56 = vpop.xlane.xlu0 %1415  ;;  %v1752_v10 = vpop.permute.xlu1 %1751 }
 0x4ce   : > { %v1420_v57 = vadd.f32 %v1416_v56, %v1404_v55  ;;  %v1757_v14 = vmul.f32 %v1752_v10, %v1733_v9 }
 0x4d0   : > { %1425 = vst.msk [vmem:[#allocation4 + $0x18] sm:$0xff] %vm1421_vm7, %v1420_v57 }
 0x4d5   : > { %v1742_v61 = vpop.permute.xlu0 %1741 }
 0x4d6   : > { %v1755_v2 = vmul.f32 %v1742_v61, %v1731_v60 }
 0x4f7   : > { %v1498_v62 = vpop.f32.mrf.mxu1 }
 0x4f8   : > { %v1758_v63 = vadd.f32 %v1754_v59, %v1498_v62 }
 0x4f9   : > { %v2633_v1 = vpop.f32.mrf.mxu1 }
 0x4fa   : > { %1762 = vst.msk [vmem:[#allocation5] sm:$0xff] %vm1040_vm6, %v1758_v63 }
 0x4fb   : > { %v1574_v4 = vpop.f32.mrf.mxu0 }
 0x4fc   : > { %v1759_v5 = vadd.f32 %v1755_v2, %v1574_v4 }
 0x4fd   : > { %v2638_v6 = vpop.f32.mrf.mxu0 }
 0x4fe   : > { %1763 = vst.msk [vmem:[#allocation5 + $0x8] sm:$0xff] %vm1040_vm6, %v1759_v5 }
 0x4ff   : > { %v1650_v11 = vpop.f32.mrf.mxu1 }
 0x500   : > { %v1760_v12 = vadd.f32 %v1756_v8, %v1650_v11 }
 0x501   : > { %v2643_v13 = vpop.f32.mrf.mxu1 }
 0x502   : > { %1764 = vst.msk [vmem:[#allocation5 + $0x10] sm:$0xff] %vm1040_vm6, %v1760_v12  ;;  %1773 = sbr.rel (%p2515_p3) target bundleno = 2650 (0xa5a), region = 88 }
 0x503   : > { %v1726_v15 = vpop.f32.mrf.mxu0 }
 0x504   : > { %v1761_v16 = vadd.f32 %v1757_v14, %v1726_v15 }
 0x505   : > { %v2648_v17 = vpop.f32.mrf.mxu0 }
 0x506   : > { %1765 = vst.msk [vmem:[#allocation5 + $0x18] sm:$0xff] %vm1040_vm6, %v1761_v16 }
 0x507   : > { %v1782_v18 = vld [vmem:[#allocation4 + $0x10] sm:$0xff]  ;;  %v1780_v19 = vld [vmem:[#allocation4] sm:$0xff]  ;;  %v1783_v20 = vld [vmem:[#allocation4 + $0x18] sm:$0xff]  ;;  %v2953_v21 = vmov 0   ;;  %v2954_v23 = vmov 0.0   ;;  %vm2955_vm8 = vmmov 0  }
 0x508   : > { %2819 = vset.pattern.permute.xlu1 %v2953_v21  ;;  %2818 = vset.pattern.permute.xlu0 %v2953_v21  ;;  %2820 = vrcp.f32 %v1782_v18  ;;  %v1781_v22 = vld [vmem:[#allocation4 + $0x8] sm:$0xff]  ;;  %v1812_v24 = vld [vmem:[%s3495_s7] sm:$0xff]  ;;  %v1815_v28 = vld [vmem:[%s3495_s7 + $0x18] sm:$0xff]  ;;  %vm2253_vm9 = vcmask 523264  }
 0x509   : > { %2822 = vrcp.f32 %v1780_v19  ;;  %2649 = vmatprep.subr.mxu0 %v2954_v23  ;;  %2664 = vmatprep.subr.mxu1 %v2954_v23  ;;  %v1776_v30 = vld [vmem:[#allocation5] sm:$0xff]  ;;  %v1813_v34 = vld [vmem:[%s3495_s7 + $0x8] sm:$0xff]  ;;  %v1814_v40 = vld [vmem:[%s3495_s7 + $0x10] sm:$0xff] }
 0x50a   : > { %2824 = vrcp.f32 %v1783_v20  ;;  %2650 = vmatpush3.msra.mxu0 %v1812_v24  ;;  %2651 = vmatprep.mubr.msk.f32.mxu0 %vm2955_vm8, %v2954_v23  ;;  %v1777_v36 = vld [vmem:[#allocation5 + $0x8] sm:$0xff]  ;;  %v1778_v41 = vld [vmem:[#allocation5 + $0x10] sm:$0xff]  ;;  %v2520_v57 = vld [vmem:[%s3496_s8] ss:$0 sm:$0xff] }
 0x50b   : > { %2826 = vrcp.f32 %v1781_v22  ;;  %2654 = vmatprep.subr.mxu0 %v2954_v23  ;;  %2666 = vmatprep.mubr.msk.f32.mxu1 %vm2955_vm8, %v2954_v23  ;;  %v2123_v59 = vld [vmem:[%s3135_s20] sm:$0xff]  ;;  %v2156_v4 = vld [vmem:[%s3497_s9 + $0x18] sm:$0xff]  ;;  %v2155_v5 = vld [vmem:[%s3497_s9 + $0x10] sm:$0xff] }
 0x50c   : > { %2665 = vmatpush3.msra.mxu1 %v1815_v28  ;;  %v2154_v6 = vld [vmem:[%s3497_s9 + $0x8] sm:$0xff]  ;;  %v2153_v8 = vld [vmem:[%s3497_s9] sm:$0xff]  ;;  %v2245_v9 = vld [vmem:[%s3499_s11 + $0x38] sm:$0xff] }
 0x50d   : > { %2680 = vmatprep.subr.mxu1 %v2954_v23  ;;  %v1779_v35 = vld [vmem:[#allocation5 + $0x18] sm:$0xff]  ;;  %v2244_v10 = vld [vmem:[%s3499_s11 + $0x30] sm:$0xff]  ;;  %v2243_v11 = vld [vmem:[%s3499_s11 + $0x28] sm:$0xff] }
 0x50e   : > { %v2242_v12 = vld [vmem:[%s3499_s11 + $0x20] sm:$0xff]  ;;  %v2241_v13 = vld [vmem:[%s3499_s11 + $0x18] sm:$0xff]  ;;  %v2240_v24 = vld [vmem:[%s3499_s11 + $0x10] sm:$0xff] }
 0x50f   : > { %v2521_v18 = vld [vmem:[%s3501_s13] ss:$0 sm:$0xff] }
 0x510   : > { %v2522_v20 = vld [vmem:[%s3502_s14] ss:$0 sm:$0xff] }
 0x515   : > { %v2821_v25 = vpop.eup %2820 }
 0x516   : > { %v2823_v26 = vpop.eup %2822  ;;  %1800 = vperm.xlu1 %2819, %v2821_v25   ;;  %v2239_v25 = vld [vmem:[%s3499_s11 + $0x8] sm:$0xff] }
 0x517   : > { %v2825_v27 = vpop.eup %2824  ;;  %1790 = vperm.xlu0 %2818, %v2823_v26   ;;  %v2238_v26 = vld [vmem:[%s3499_s11] sm:$0xff] }
 0x518   : > { %v2827_v29 = vpop.eup %2826 }
 0x51a   : > { %1805 = vperm.xlu1 %2819, %v2825_v27   ;;  %v2523_v27 = vld [vmem:[%s3498_s10] ss:$0 sm:$0xff] }
 0x51b   : > { %1795 = vperm.xlu0 %2818, %v2827_v29  }
 0x591   : > { %v1801_v31 = vpop.permute.xlu1 %1800 }
 0x592   : > { %v1791_v32 = vpop.permute.xlu0 %1790  ;;  %v1810_v42 = vmul.f32 %v1801_v31, %v1778_v41 }
 0x593   : > { %v1808_v33 = vmul.f32 %v1791_v32, %v1776_v30  ;;  %v2525_v32 = vld [vmem:[%s3544_s15] ss:$0 sm:$0xff] }
 0x595   : > { %2652 = vmatmul.mubr.msk.f32.vlgmr.msra.gmra.mxu0 %vm1040_vm6, %v1808_v33  ;;  %v1806_v37 = vpop.permute.xlu1 %1805 }
 0x596   : > { %2655 = vmatpush3.msra.mxu0 %v1813_v34  ;;  %v1811_v38 = vmul.f32 %v1806_v37, %v1779_v35  ;;  %v1796_v7 = vpop.permute.xlu0 %1795  ;;  %2656 = vmatprep.mubr.msk.f32.mxu0 %vm2955_vm8, %v2954_v23 }
 0x597   : > { %v1809_v39 = vmul.f32 %v1796_v7, %v1777_v36  ;;  %2659 = vmatprep.subr.mxu0 %v2954_v23 }
 0x598   : > { %2667 = vmatmul.mubr.msk.f32.vlgmr.msra.gmra.mxu1 %vm1040_vm6, %v1811_v38 }
 0x599   : > { %2657 = vmatmul.mubr.msk.f32.vlgmr.msra.gmra.mxu0 %vm1040_vm6, %v1809_v39  ;;  %2696 = vmatprep.mubr.msk.f32.mxu1 %vm2955_vm8, %v2954_v23 }
 0x59a   : > { %2660 = vmatpush3.msra.mxu0 %v1814_v40  ;;  %2661 = vmatprep.mubr.msk.f32.mxu0 %vm2955_vm8, %v2954_v23 }
 0x59b   : > { %2669 = vmatprep.subr.mxu0 %v2954_v23  ;;  %2681 = vmatpush3.msra.mxu1 %v2245_v9 }
 0x59c   : > { %2682 = vmatprep.subr.mxu1 %v2954_v23 }
 0x59d   : > { %2662 = vmatmul.mubr.msk.f32.vlgmr.msra.gmra.mxu0 %vm1040_vm6, %v1810_v42  ;;  %2683 = vmatpush3.msra.mxu1 %v2244_v10 }
 0x59e   : > { %2677 = vmatprep.mubr.msk.f32.mxu0 %vm2955_vm8, %v2954_v23  ;;  %2670 = vmatpush3.msra.mxu0 %v2156_v4 }
 0x59f   : > { %2671 = vmatprep.subr.mxu0 %v2954_v23  ;;  %2684 = vmatprep.subr.mxu1 %v2954_v23 }
 0x5a0   : > { %2672 = vmatpush3.msra.mxu0 %v2155_v5  ;;  %2685 = vmatpush3.msra.mxu1 %v2243_v11 }
 0x5a1   : > { %2673 = vmatprep.subr.mxu0 %v2954_v23  ;;  %2686 = vmatprep.subr.mxu1 %v2954_v23 }
 0x5a2   : > { %2674 = vmatpush3.msra.mxu0 %v2154_v6  ;;  %2687 = vmatpush3.msra.mxu1 %v2242_v12 }
 0x5a3   : > { %2675 = vmatprep.subr.mxu0 %v2954_v23  ;;  %2688 = vmatprep.subr.mxu1 %v2954_v23 }
 0x5a4   : > { %2676 = vmatpush3.msra.mxu0 %v2153_v8  ;;  %2689 = vmatpush3.msra.mxu1 %v2241_v13 }
 0x5a5   : > { %2690 = vmatprep.subr.mxu1 %v2954_v23 }
 0x5a6   : > { %2691 = vmatpush3.msra.mxu1 %v2240_v24 }
 0x5a7   : > { %2692 = vmatprep.subr.mxu1 %v2954_v23 }
 0x5a8   : > { %2693 = vmatpush3.msra.mxu1 %v2239_v25 }
 0x5a9   : > { %2694 = vmatprep.subr.mxu1 %v2954_v23 }
 0x5aa   : > { %2695 = vmatpush3.msra.mxu1 %v2238_v26 }
 0x655   : > { %v1885_v43 = vpop.f32.mrf.mxu0 }
 0x656   : > { %v2108_v50 = vsel %vm896_vm4, %v1885_v43, 0.0 }
 0x657   : > { %v2653_v44 = vpop.f32.mrf.mxu0 }
 0x658   : > { %v2104_v45 = vpop.f32.mrf.mxu1 }
 0x659   : > { %v1958_v46 = vpop.f32.mrf.mxu0  ;;  %v2113_v56 = vsel %vm896_vm4, %v2104_v45, 0.0 }
 0x65a   : > { %v2109_v47 = vsel %vm896_vm4, %v1958_v46, 0.0  ;;  %v2668_v49 = vpop.f32.mrf.mxu1 }
 0x65b   : > { %v2658_v48 = vpop.f32.mrf.mxu0  ;;  %v2110_v51 = vadd.f32 %v2109_v47, %v2108_v50 }
 0x65d   : > { %v2031_v52 = vpop.f32.mrf.mxu0 }
 0x65e   : > { %v2111_v53 = vsel %vm896_vm4, %v2031_v52, 0.0 }
 0x65f   : > { %v2112_v54 = vadd.f32 %v2111_v53, %v2110_v51  ;;  %v2663_v55 = vpop.f32.mrf.mxu0 }
 0x661   : > { %v2114_v58 = vadd.f32 %v2113_v56, %v2112_v54 }
 0x663   : > { %v2122_v60 = vadd.f32 %v2520_v57, %v2114_v58 }
 0x665   : > { %v2124_v61 = vadd.f32 %v2123_v59, %v2122_v60 }
 0x667   : > { %v2125_v62 = vsel %vm896_vm4, %v2124_v61, 0.0 }
 0x668   : > { %2126 = vadd.xlane.f32.xlu0 %v2125_v62 }
 0x6f1   : > { %v2127_v63 = vpop.xlane.xlu0 %2126 }
 0x6f2   : > { %v2129_v0 = vmul.f32 0.03125, %v2127_v63 }
 0x6f4   : > { %v2130_v1 = vsub.f32 %v2124_v61, %v2129_v0 }
 0x6f6   : > { %v2131_v2 = vmul.f32 %v2130_v1, %v2130_v1 }
 0x6f8   : > { %v2132_v3 = vsel %vm896_vm4, %v2131_v2, 0.0 }
 0x6f9   : > { %2133 = vadd.xlane.f32.xlu1 %v2132_v3 }
 0x782   : > { %v2134_v14 = vpop.xlane.xlu1 %2133 }
 0x783   : > { %v2135_v15 = vmul.f32 0.03125, %v2134_v14 }
 0x785   : > { %v2136_v16 = vadd.f32 1e-05, %v2135_v15 }
 0x787   : > { %2828 = vrsqrt.f32 %v2136_v16 }
 0x794   : > { %v2829_v17 = vpop.eup %2828 }
 0x795   : > { %v2138_v19 = vmul.f32 %v2829_v17, %v2130_v1 }
 0x797   : > { %v2145_v21 = vmul.f32 %v2521_v18, %v2138_v19 }
 0x799   : > { %v2152_v22 = vadd.f32 %v2522_v20, %v2145_v21 }
 0x79b   : > { %2678 = vmatmul.mubr.msk.f32.vlgmr.msra.gmra.mxu0 %vm896_vm4, %v2152_v22 }
 0x85b   : > { %v2233_v28 = vpop.f32.mrf.mxu0 }
 0x85c   : > { %v2234_v29 = vadd.f32 %v2523_v27, %v2233_v28 }
 0x85d   : > { %v2679_v30 = vpop.f32.mrf.mxu0 }
 0x85e   : > { %v2237_v31 = vmax.f32 %v2234_v29, 0.0 }
 0x860   : > { %2697 = vmatmul.mubr.msk.f32.vlgmr.msra.gmra.mxu1 %vm2253_vm9, %v2237_v31 }
 0x920   : > { %v2323_v23 = vpop.f32.mrf.mxu1 }
 0x921   : > { %v2324_v33 = vadd.f32 %v2525_v32, %v2323_v23 }
 0x922   : > { %v2698_v34 = vpop.f32.mrf.mxu1 }
 0x923   : > { %v2327_v35 = vadd.f32 %v2324_v33, %v2152_v22 }
 0x925   : > { %v2328_v36 = vsel %vm896_vm4, %v2327_v35, 0.0 }
 0x926   : > { %2329 = vadd.xlane.f32.xlu0 %v2328_v36 }
 0x9af   : > { %v2330_v37 = vpop.xlane.xlu0 %2329 }
 0x9b0   : > { %v2331_v38 = vmul.f32 0.03125, %v2330_v37 }
 0x9b2   : > { %v2332_v7 = vsub.f32 %v2327_v35, %v2331_v38 }
 0x9b4   : > { %v2333_v39 = vmul.f32 %v2332_v7, %v2332_v7 }
 0x9b6   : > { %v2334_v40 = vsel %vm896_vm4, %v2333_v39, 0.0 }
 0x9b7   : > { %2335 = vadd.xlane.f32.xlu0 %v2334_v40 }
 0xa40   : > { %v2336_v41 = vpop.xlane.xlu0 %2335 }
 0xa41   : > { %v2337_v42 = vmul.f32 0.03125, %v2336_v41 }
 0xa43   : > { %v2338_v43 = vadd.f32 1e-05, %v2337_v42 }
 0xa45   : > { %2830 = vrsqrt.f32 %v2338_v43 }
 0xa52   : > { %v2831_v44 = vpop.eup %2830 }
 0xa53   : > { %v2340_v45 = vmul.f32 %v2831_v44, %v2332_v7 }
 0xa55   : > { %v2341_v46 = vmul.f32 %v2521_v18, %v2340_v45 }
 0xa57   : > { %v2342_v47 = vadd.f32 %v2522_v20, %v2341_v46 }
 0xa59   : > { %2343 = vst.msk [vmem:[%s560_s29] sm:$0xff] %vm896_vm4, %v2342_v47 }
 0xa5a PF: > { %s3545_s24 = sld [smem:[#allocation13_spill]]  ;;  %s2360_s26 = sshll.u32 %s560_s29, 4  ;;  %s2361_s26 = int_to_ptr.vmem [resolvable:$true] %s2360_s26 }
 0xa5b   : > { %s3546_s20 = sld [smem:[#allocation12_spill]]  ;;  %s2832_s15 = scalar_lea.vmem %s2361_s26, 128 }
 0xa5c   : > { %s3547_s12 = sld [smem:[#allocation10_spill]]  ;;  %p2833_p4 = scmp.ne.s32.totalorder %s2361_s26, %s2832_s15 }
 0xa5d   : > { %s3549_s17 = sld [smem:[#allocation27_spill]]  ;;  %s2956_s0 = smov [#allocation6]  }
 0xa5e   : > { %p2834_p5 = pnand %p2833_p4, %p3099_p6  ;;  %s2836_s1 = sshll.u32 %s2956_s0, 4  ;;  %s2837_s1 = int_to_ptr.vmem [resolvable:$false] %s2836_s1 }
 0xa5f   : > { %p2839_p9 = scmp.lt.s32.totalorder %s2361_s26, %s2837_s1 }
 0xa60   : > { %s2528_s21 = sshll.u32 %s3545_s24, 1  ;;  %p2835_p8 = pneg %p2834_p5 }
 0xa61   : > { %s2356_s22 = sadd.s32 %s3546_s20, %s2528_s21  ;;  %s2838_s24 = scalar_lea.vmem %s2837_s1, 256 }
 0xa62   : > { %s2529_s16 = sshll.u32 %s2356_s22, 7  ;;  %s3550_s30 = sand.u32 1, %s3547_s12  }
 0xa63   : > { %s2358_s18 = scalar_lea.hbm %s3549_s17, %s2529_s16  ;;  %s2345_s28 = scalar_lea.sflag [#allocation7], %s3550_s30 }
 0xa64   : > { %p2840_p10 = scmp.lt.s32.totalorder %s2838_s24, %s2832_s15 }
 0xa66   : > { %p2841_p11 = por %p2840_p10, %p2839_p9 }
 0xa68   : > { %p2842_p12 = pnand %p2841_p11, %p2835_p8 }
 0xa6a   : > { %2845 = shalt.err (!%p2842_p12)
}
 0xa6b   : > { %s2846_s25 = scalar_lea.hbm %s2358_s18, 128  ;;  %s2850_s12 = scalar_lea.hbm %s3549_s17, 512 }
 0xa6c   : > { %p2847_p13 = scmp.ne.s32.totalorder %s2358_s18, %s2846_s25  ;;  %p2851_p2 = scmp.lt.s32.totalorder %s2358_s18, %s3549_s17 }
 0xa6d   : > { %p2852_p3 = scmp.lt.s32.totalorder %s2850_s12, %s2846_s25 }
 0xa6e   : > { %p2848_p0 = pnand %p2847_p13, %p3099_p6 }
 0xa6f   : > { %p2853_p4 = por %p2852_p3, %p2851_p2 }
 0xa70   : > { %p2849_p1 = pneg %p2848_p0 }
 0xa72   : > { %p2854_p5 = pnand %p2853_p4, %p2849_p1 }
 0xa74   : > { %2857 = shalt.err (!%p2854_p5)
}
 0xa75   : > { %2699 = dma.vmem_to_hbm [thread:$0]  (%p3099_p6), %s2361_s26, 128, %s2358_s18, %s2345_s28  }
 0xa76 PF: > { %s3551_s0 = sld [smem:[#allocation17_spill]] }
 0xa77   : > { %s3552_s1 = sld [smem:[#allocation9_spill]] }
 0xa7c   : > { %p2705_p8 = scmp.ge.s32.totalorder %s3551_s0, 2 }
 0xa7d   : > { %s2372_s23 = sand.u32 1, %s3552_s1  }
 0xa7e   : > { %p2702_p9 = pnand %p2705_p8, %p3106_p7  ;;  %s2373_s27 = scalar_lea.sflag [#allocation7], %s2372_s23 }
 0xa80   : > { %p2703_p10 = pneg %p2702_p9 }
 0xa82   : > { %2899 = dma.done.wait (%p2703_p10), %s2373_s27, 128  }
 0xa83   : > { %2901 = vsyncadd (%p2703_p10), %s2373_s27, 4294967168  ;;  %s28_s27 = sadd.s32 1, %s3551_s0   ;;  %s3554_s18 = sld [smem:[#allocation10_spill]] }
 0xa84   : > { %p25_p11 = scmp.ge.s32.totalorder %s28_s27, 10   ;;  %s3555_s19 = sld [smem:[#allocation11_spill]] }
 0xa85   : > { %s3556_s20 = sld [smem:[#allocation23_spill]] }
 0xa86   : > { %s3557_s21 = sld [smem:[#allocation14_spill]] }
 0xa87   : > { %s3558_s22 = sld [smem:[#allocation15_spill]]  ;;  %27 = sbr.rel (!%p25_p11) target bundleno = 11 (0xb), region = 129 }
 0xa88   : > { %s3559_s23 = sld [smem:[#allocation16_spill]] }
 0xa89   : > { %s3560_s24 = sld [smem:[#allocation18_spill]] }
 0xa8a   : > { %s3561_s25 = sld [smem:[#allocation20_spill]] }
 0xa8b   : > { %s3562_s26 = sld [smem:[#allocation22_spill]] }
 0xa8c   :  { %2378 = vsyncpa [#allocation7], 1 }
 0xa8d   :  { %2380 = vsyncpa [#allocation7 + $0x1], 1 }

// kernel: tpu_custom_call.1
= control target key start
LH: loop header
LB: loop body
LE: loop exit
PB: predicated region body
PF: predicated region fallthrough
CT: control target
= control target key end

     0   :  { %s3488_s0 = inlined_call_operand.vmem [shape: f32[2,16,32], index: 0, kind: input, shape index: {}]   ;;  %s3489_s1 = inlined_call_operand.vmem [shape: f32[2,16,32], index: 1, kind: input, shape index: {}]   ;;  %s3490_s2 = inlined_call_operand.vmem [shape: f32[2,2,1,8], index: 2, kind: input, shape index: {}]   ;;  %s3491_s3 = inlined_call_operand.vmem [shape: f32[32,32], index: 3, kind: input, shape index: {}]   ;;  %s3492_s4 = inlined_call_operand.vmem [shape: f32[1,32], index: 4, kind: input, shape index: {}]   ;;  %s3493_s5 = inlined_call_operand.vmem [shape: f32[64,32], index: 5, kind: input, shape index: {}]   ;;  %s3494_s6 = inlined_call_operand.vmem [shape: f32[64,1], index: 6, kind: input, shape index: {}]   ;;  %s3495_s7 = inlined_call_operand.vmem [shape: f32[4,8,32], index: 7, kind: input, shape index: {}]   ;;  %s3496_s8 = inlined_call_operand.vmem [shape: f32[1,32], index: 8, kind: input, shape index: {}]   ;;  %s3497_s9 = inlined_call_operand.vmem [shape: f32[32,64], index: 9, kind: input, shape index: {}]   ;;  %s3498_s10 = inlined_call_operand.vmem [shape: f32[1,64], index: 10, kind: input, shape index: {}]   ;;  %s3499_s11 = inlined_call_operand.vmem [shape: f32[64,32], index: 11, kind: input, shape index: {}]   ;;  %s3500_s12 = inlined_call_operand.vmem [shape: f32[1,32], index: 12, kind: input, shape index: {}]   ;;  %s3501_s13 = inlined_call_operand.vmem [shape: f32[1,32], index: 13, kind: input, shape index: {}]   ;;  %s3502_s14 = inlined_call_operand.vmem [shape: f32[1,32], index: 14, kind: input, shape index: {}]   ;;  %s3503_s15 = inlined_call_operand.hbm [shape: f32[2,16,32], index: 15, kind: output, shape index: {}]  }
   0x1   :  { %3521 = sst [smem:[#allocation24_spill]] %s3488_s0 }
   0x2   :  { %3522 = sst [smem:[#allocation25_spill]] %s3489_s1 }
   0x3   :  { %3523 = sst [smem:[#allocation26_spill]] %s3500_s12 }
   0x4   :  { %3524 = sst [smem:[#allocation27_spill]] %s3503_s15 }
   0x5   :  { %20 = vsyncpa [#allocation7], 0 }
   0x6   :  { %22 = vsyncpa [#allocation7 + $0x1], 0  ;;  %s3037_s18 = smov 0   ;;  %s3039_s19 = smov 0  }
   0x7   :  { %s3041_s20 = smov 0   ;;  %s3043_s21 = smov 0  }
   0x8   :  { %s3045_s22 = smov 0   ;;  %s3047_s23 = smov 0  }
   0x9   :  { %s3049_s24 = smov 0   ;;  %s3051_s25 = smov 0  }
   0xa   :  { %s3053_s26 = smov 0   ;;  %s3055_s27 = smov 0  }
   0xb LB: > { %3525 = sst [smem:[#allocation9_spill]] %s2904_s18  ;;  %s2477_s28 = sadd.s32 4294967295, %s2940_s27   ;;  %s2940_s27 = sphi %s3055_s27, %s28_s27   ;;  %s2936_s26 = sphi %s3053_s26, %s3562_s26   ;;  %s2932_s25 = sphi %s3051_s25, %s3561_s25   ;;  %s2928_s24 = sphi %s3049_s24, %s3560_s24   ;;  %s2924_s23 = sphi %s3047_s23, %s3559_s23   ;;  %s2920_s22 = sphi %s3045_s22, %s3558_s22   ;;  %s2916_s21 = sphi %s3043_s21, %s3557_s21   ;;  %s2912_s20 = sphi %s3041_s20, %s3556_s20   ;;  %s2908_s19 = sphi %s3039_s19, %s3555_s19   ;;  %s2904_s18 = sphi %s3037_s18, %s3554_s18  }
   0xc   : > { %3526 = sst [smem:[#allocation10_spill]] %s2908_s19  ;;  %s2478_s29 = sadd.s32 4294967294, %s2940_s27  }
   0xd   : > { %3527 = sst [smem:[#allocation11_spill]] %s2912_s20  ;;  %s40_s30 = sadd.s32 1, %s2928_s24 }
   0xe   : > { %3528 = sst [smem:[#allocation12_spill]] %s2920_s22  ;;  %p41_p0 = scmp.ge.s32.totalorder %s40_s30, 2 }
   0xf   : > { %3529 = sst [smem:[#allocation13_spill]] %s2924_s23  ;;  %s43_s16 = sadd.s32 1, %s2932_s25 }
  0x10   : > { %3530 = sst [smem:[#allocation14_spill]] %s2928_s24  ;;  %s47_s17 = sadd.s32 1, %s2936_s26 }
  0x11   : > { %3531 = sst [smem:[#allocation15_spill]] %s2932_s25  ;;  %p402_p1 = scmp.ne.s32.totalorder %s2912_s20, %s2908_s19 }
  0x12   : > { %3532 = sst [smem:[#allocation16_spill]] %s2936_s26  ;;  %s3564_s30 = smov (%p41_p0, %s40_s30), 0 }
  0x13   : > { %3533 = sst [smem:[#allocation17_spill]] %s2940_s27  ;;  %s3566_s16 = smov (!%p41_p0, %s43_s16), %s2932_s25 }
  0x14   : > { %3534 = sst [smem:[#allocation18_spill]] %s3564_s30  ;;  %p403_p2 = scmp.eq.s32.totalorder %s2477_s28, 7 }
  0x15   : > { %p408_p3 = scmp.ne.s32.totalorder %s2908_s19, %s2904_s18  ;;  %p45_p4 = scmp.ge.s32.totalorder %s3566_s16, 2 }
  0x16   : > { %p409_p5 = scmp.eq.s32.totalorder %s2478_s29, 7  ;;  %p3099_p6 = por %p403_p2, %p402_p1 }
  0x17   : > { %s3568_s16 = smov (%p45_p4, %s3566_s16), 0  ;;  %s3570_s17 = smov (!%p45_p4, %s47_s17), %s2936_s26 }
  0x18   : > { %s3535_s15 = scalar_select %p3099_p6, 1, 0 }
  0x19   : > { %3537 = sst [smem:[#allocation20_spill]] %s3568_s16  ;;  %p3106_p7 = por %p409_p5, %p408_p3 }
  0x1a   : > { %3536 = sst [smem:[#allocation19_spill]] %s3535_s15  ;;  %p2481_p8 = scmp.ge.s32.totalorder %s2940_s27, 1 }
  0x1b   : > { %s3538_s24 = scalar_select %p3106_p7, 1, 0 }
  0x1c   : > { %p49_p9 = scmp.ge.s32.totalorder %s3570_s17, 2  ;;  %p495_p10 = scmp.lt.s32.totalorder %s2940_s27, 9 }
  0x1d   : > { %3539 = sst [smem:[#allocation21_spill]] %s3538_s24  ;;  %s388_s28 = ssub.s32 %s2932_s25, %s3568_s16 }
  0x1e   : > { %s3572_s17 = smov (%p49_p9, %s3570_s17), 0  ;;  %p496_p11 = pnand %p2481_p8, %p495_p10 }
  0x1f   : > { %3540 = sst [smem:[#allocation22_spill]] %s3572_s17  ;;  %s387_s29 = ssub.s32 %s2936_s26, %s3572_s17 }
  0x20   : > { %s389_s30 = sor.u32 %s388_s28, %s387_s29  ;;  %s392_s18 = sadd.s32 1, %s2912_s20 }
  0x21   : > { %p390_p12 = scmp.eq.s32.totalorder %s389_s30, 0  ;;  %499 = sbr.rel (%p496_p11) target bundleno = 2678 (0xa76), region = 80 }
  0x22   : > { %s3517_s16 = sand.u32 (!%p496_p11), 1, %s2908_s19   ;;  %p561_p13 = scmp.lt.s32.totalorder (!%p496_p11), %s2924_s23, 1 }
  0x23   : > { %s3120_s15 = scalar_select %p390_p12, %s2912_s20, %s392_s18  }
  0x24   : > { %s3126_s25 = sshll.u32 (!%p496_p11), %s3517_s16, 3  ;;  %p563_p0 = scmp.lt.s32.totalorder (!%p496_p11), %s2920_s22, 1 }
  0x25   : > { %3541 = sst [smem:[#allocation23_spill]] %s3120_s15  ;;  %p571_p1 = scmp.lt.s32.totalorder (!%p496_p11), %s2916_s21, 1 }
  0x26   : > { %s562_s28 = scalar_select %p561_p13, %s2924_s23, 1 }
  0x27   : > { %s564_s30 = scalar_select %p563_p0, %s2920_s22, 1 }
  0x28   : > { %s2483_s18 = sshll.u32 %s562_s28, 1  ;;  %s3542_s0 = sld [smem:[#allocation24_spill]] }
  0x29   : > { %s566_s29 = sadd.s32 %s2483_s18, %s564_s30  ;;  %s3543_s1 = sld [smem:[#allocation25_spill]] }
  0x2a   : > { %s2484_s17 = sshll.u32 %s566_s29, 3  ;;  %s560_s29 = scalar_lea.vmem [#allocation6], %s3126_s25 }
  0x2b   : > { %s572_s24 = scalar_select %p571_p1, %s2916_s21, 1 }
  0x2c   : > { %p2488_p2 = scmp.ne.s32.totalorder %s2916_s21, 0 }
  0x2d   : > { %s3138_s27 = sadd.s32 %s2483_s18, %s572_s24  ;;  %s2945_s15 = smov (!%p2488_p2), 104  }
  0x2e   : > { %s3135_s20 = scalar_lea.vmem %s3542_s0, %s2484_s17  ;;  %s2486_s16 = sshll.u32 %s3138_s27, 3 }
  0x2f   : > { %s583_s23 = scalar_lea.vmem %s3490_s2, %s3138_s27  ;;  %s3148_s30 = scalar_lea.vmem %s3543_s1, %s2486_s16 }
  0x30   : > { %587 = sbr.rel (%p2488_p2) target bundleno = 398 (0x18e), region = 84  ;;  %s2946_s24 = smov (!%p2488_p2), 120  }
  0x31   : > { %s2947_s12 = smov (!%p2488_p2), 112  }
  0x35   : > { %vm826_vm0 = vcmask 7168   ;;  %v592_v0 = vld [vmem:[%s3491_s3 + $0x18] sm:$0xff]  ;;  %v2942_v1 = vmov 0.0   ;;  %v2943_v2 = vmov -inf   ;;  %v591_v3 = vld [vmem:[%s3491_s3 + $0x10] sm:$0xff]  ;;  %vm2944_vm1 = vmmov 0  }
  0x36   : > { %2584 = vmatprep.subr.mxu0 %v2942_v1  ;;  %827 = vst.msk [vmem:[#allocation3] sm:$0xff] %vm826_vm0, %v2943_v2  ;;  %828 = vst.msk [vmem:[#allocation3 + $0x8] sm:$0xff] %vm826_vm0, %v2943_v2  ;;  %2592 = vmatprep.mubr.msk.f32.mxu0 %vm2944_vm1, %v2942_v1  ;;  %v590_v4 = vld [vmem:[%s3491_s3 + $0x8] sm:$0xff]  ;;  %v589_v5 = vld [vmem:[%s3491_s3] sm:$0xff]  ;;  %vm600_vm2 = vcmask 261120   ;;  %vm821_vm3 = vcmask 64512   ;;  %v690_v14 = vlaneseq }
  0x37   : > { %829 = vst.msk [vmem:[#allocation3 + $0x10] sm:$0xff] %vm826_vm0, %v2943_v2  ;;  %830 = vst.msk [vmem:[#allocation3 + $0x18] sm:$0xff] %vm826_vm0, %v2943_v2  ;;  %2585 = vmatpush3.msra.mxu0 %v592_v0  ;;  %v588_v6 = vld [vmem:[%s3135_s20] sm:$0xff]  ;;  %v2948_v12 = vmov 1983009808  }
  0x38   : > { %831 = vst.msk [vmem:[#allocation4] sm:$0xff] %vm826_vm0, %v2942_v1  ;;  %832 = vst.msk [vmem:[#allocation4 + $0x8] sm:$0xff] %vm826_vm0, %v2942_v1  ;;  %2586 = vmatprep.subr.mxu0 %v2942_v1  ;;  %v2489_v7 = vld [vmem:[%s3492_s4] ss:$0 sm:$0xff]  ;;  %v688_v13 = vunpack.c.l.s4 %v2948_v12  ;;  %v2949_v15 = vmov 1934713408  }
  0x39   : > { %833 = vst.msk [vmem:[#allocation4 + $0x10] sm:$0xff] %vm826_vm0, %v2942_v1  ;;  %834 = vst.msk [vmem:[#allocation4 + $0x18] sm:$0xff] %vm826_vm0, %v2942_v1  ;;  %2587 = vmatpush3.msra.mxu0 %v591_v3  ;;  %v720_v16 = vunpack.c.l.s4 %v2949_v15  ;;  %v691_v18 = vshrl.u32 %v690_v14, 7 }
  0x3a   : > { %2588 = vmatprep.subr.mxu0 %v2942_v1  ;;  %835 = vst.msk [vmem:[#allocation5] sm:$0xff] %vm821_vm3, %v2942_v1  ;;  %836 = vst.msk [vmem:[#allocation5 + $0x8] sm:$0xff] %vm821_vm3, %v2942_v1  ;;  %v689_v17 = vunpack.c.0.s8 %v688_v13 }
  0x3b   : > { %2589 = vmatpush3.msra.mxu0 %v590_v4  ;;  %837 = vst.msk [vmem:[#allocation5 + $0x10] sm:$0xff] %vm821_vm3, %v2942_v1  ;;  %838 = vst.msk [vmem:[#allocation5 + $0x18] sm:$0xff] %vm821_vm3, %v2942_v1  ;;  %v721_v21 = vunpack.c.0.s8 %v720_v16 }
  0x3c   : > { %2590 = vmatprep.subr.mxu0 %v2942_v1  ;;  %v692_v22 = vsub.s32 %v689_v17, %v691_v18 }
  0x3d   : > { %2591 = vmatpush3.msra.mxu0 %v589_v5  ;;  %v724_v28 = vsub.s32 %v721_v21, %v691_v18 }
  0x3e   : > { %2593 = vmatmul.mubr.msk.f32.vlgmr.msra.gmra.mxu0 %vm600_vm2, %v588_v6 }
  0xfe   : > { %v670_v8 = vpop.f32.mrf.mxu0 }
  0xff   : > { %v671_v9 = vadd.f32 %v2489_v7, %v670_v8 }
 0x100   : > { %v2594_v10 = vpop.f32.mrf.mxu0 }
 0x101   : > { %v674_v11 = vmul.f32 0.35355338, %v671_v9 }
 0x103   : > { %682 = vrot.lane.b32.xlu1 %v674_v11, %s2945_s15  ;;  %676 = vrot.lane.b32.xlu0 %v674_v11, %s2946_s24 }
 0x107   : > { %679 = vrot.lane.b32.xlu0 %v674_v11, %s2947_s12 }
 0x175   : > { %v683_v19 = vpop.permute.xlu1 %682  ;;  %v677_v20 = vpop.permute.xlu0 %676 }
 0x176   : > { %v701_v23 = vcombine.low %v677_v20, %v683_v19  ;;  %v702_v24 = vcombine.high %v677_v20, %v683_v19 }
 0x178   : > { %v709_v29 = vrot.slane %v701_v23, %v692_v22  ;;  %v716_v30 = vrot.slane %v702_v24, %v692_v22 }
 0x179   : > { %v680_v25 = vpop.permute.xlu0 %679 }
 0x17a   : > { %v685_v26 = vcombine.low %v674_v11, %v680_v25  ;;  %v686_v27 = vcombine.high %v674_v11, %v680_v25 }
 0x17c   : > { %v693_v31 = vrot.slane %v685_v26, %v692_v22  ;;  %v700_v32 = vrot.slane %v686_v27, %v692_v22 }
 0x17e   : > { %v717_v33 = vcombine.low %v693_v31, %v709_v29  ;;  %v718_v34 = vcombine.high %v693_v31, %v709_v29  ;;  %v733_v35 = vcombine.low %v700_v32, %v716_v30  ;;  %v734_v36 = vcombine.high %v700_v32, %v716_v30 }
 0x180   : > { %v725_v37 = vrot.slane %v717_v33, %v724_v28  ;;  %v732_v38 = vrot.slane %v718_v34, %v724_v28  ;;  %v741_v39 = vrot.slane %v733_v35, %v724_v28  ;;  %v748_v40 = vrot.slane %v734_v36, %v724_v28 }
 0x182   : > { %v753_v41 = vcombine.low %v725_v37, %v732_v38  ;;  %v2491_v42 = vcombine.high %v725_v37, %v732_v38  ;;  %v769_v43 = vcombine.low %v741_v39, %v748_v40  ;;  %v2492_v44 = vcombine.high %v741_v39, %v748_v40 }
 0x184   : > { %v760_v45 = vrot.slane %v753_v41, %v692_v22  ;;  %v768_v46 = vrot.slane %v2491_v42, %v692_v22  ;;  %v776_v47 = vrot.slane %v769_v43, %v692_v22  ;;  %v784_v48 = vrot.slane %v2492_v44, %v692_v22 }
 0x186   : > { %v785_v49 = vcombine.low %v760_v45, %v768_v46  ;;  %v786_v50 = vcombine.high %v760_v45, %v768_v46  ;;  %v801_v51 = vcombine.low %v776_v47, %v784_v48  ;;  %v802_v52 = vcombine.high %v776_v47, %v784_v48 }
 0x188   : > { %v793_v53 = vrot.slane %v785_v49, %v724_v28  ;;  %v800_v54 = vrot.slane %v786_v50, %v724_v28  ;;  %v809_v55 = vrot.slane %v801_v51, %v724_v28  ;;  %v816_v56 = vrot.slane %v802_v52, %v724_v28 }
 0x18a   : > { %v817_v57 = vcombine.low %v793_v53, %v809_v55  ;;  %v818_v58 = vcombine.high %v793_v53, %v809_v55  ;;  %v819_v59 = vcombine.low %v800_v54, %v816_v56  ;;  %v820_v60 = vcombine.high %v800_v54, %v816_v56 }
 0x18c   : > { %822 = vst.msk [vmem:[#allocation2] sm:$0xff] %vm821_vm3, %v817_v57  ;;  %823 = vst.msk [vmem:[#allocation2 + $0x8] sm:$0xff] %vm821_vm3, %v818_v58 }
 0x18d   : > { %824 = vst.msk [vmem:[#allocation2 + $0x10] sm:$0xff] %vm821_vm3, %v819_v59  ;;  %825 = vst.msk [vmem:[#allocation2 + $0x18] sm:$0xff] %vm821_vm3, %v820_v60 }
 0x18e PF: > { %v839_v61 = vld [vmem:[%s3148_s30] sm:$0xff]  ;;  %vm896_vm4 = vcmask 261120   ;;  %v841_v0 = vld [vmem:[%s3493_s5 + $0x8] sm:$0xff]  ;;  %v2950_v1 = vmov 0   ;;  %v850_v2 = vld [vmem:[%s3494_s6 + $0x10] sm:$0xff]  ;;  %v2951_v7 = vmov 0.0  }
 0x18f   : > { %v840_v62 = vld [vmem:[%s3493_s5] sm:$0xff]  ;;  %2595 = vmatprep.subr.msk.mxu0 %vm896_vm4, %v839_v61  ;;  %2800 = vset.pattern.permute.xlu0 %v2950_v1  ;;  %v842_v3 = vld [vmem:[%s3493_s5 + $0x10] sm:$0xff]  ;;  %v849_v4 = vld [vmem:[%s3494_s6 + $0x8] sm:$0xff]  ;;  %vm2952_vm5 = vmmov 0   ;;  %vm1040_vm6 = vcmask 64512   ;;  %vm1421_vm7 = vcmask 7168  }
 0x190   : > { %2597 = vmatprep.mubr.msk.f32.mxu0 %vm896_vm4, %v840_v62  ;;  %v848_v63 = vld [vmem:[%s3494_s6] sm:$0xff]  ;;  %2596 = vmatpush3.xpose.msk.msra.mxu0 %vm896_vm4, %v839_v61  ;;  %v851_v5 = vld [vmem:[%s3494_s6 + $0x18] sm:$0xff]  ;;  %v845_v25 = vld [vmem:[%s3493_s5 + $0x28] sm:$0xff]  ;;  %p2515_p3 = scmp.ne.s32.totalorder %s2916_s21, 1 }
 0x191   : > { %858 = vperm.xlu0 %2800, %v848_v63   ;;  %2801 = vset.pattern.permute.xlu1 %v2950_v1  ;;  %v843_v6 = vld [vmem:[%s3493_s5 + $0x18] sm:$0xff]  ;;  %v844_v24 = vld [vmem:[%s3493_s5 + $0x20] sm:$0xff]  ;;  %v846_v26 = vld [vmem:[%s3493_s5 + $0x30] sm:$0xff]  ;;  %s3544_s15 = sld [smem:[#allocation26_spill]] (!%p2515_p3) }
 0x192   : > { %868 = vperm.xlu1 %2801, %v850_v2   ;;  %2609 = vmatprep.subr.mxu1 %v2951_v7  ;;  %v847_v27 = vld [vmem:[%s3493_s5 + $0x38] sm:$0xff]  ;;  %v2502_v28 = vld [vmem:[%s583_s23] ss:$0 sm:$0xff]  ;;  %v3257_v48 = vld [vmem:[#allocation3 + $0x8] sm:$0xff] }
 0x193   : > { %2598 = vmatmul.mubr.msk.f32.vlgmr.msra.gmra.mxu0 %vm896_vm4, %v841_v0  ;;  %2634 = vmatprep.subr.mxu0 %v2951_v7  ;;  %v1029_v13 = vld [vmem:[#allocation2] sm:$0xff]  ;;  %v1030_v19 = vld [vmem:[#allocation2 + $0x8] sm:$0xff]  ;;  %v3263_v52 = vld [vmem:[#allocation3 + $0x10] sm:$0xff] }
 0x194   : > { %2600 = vmatprep.mubr.msk.f32.mxu0 %vm896_vm4, %v842_v3  ;;  %2611 = vmatprep.mubr.msk.f32.mxu1 %vm2952_vm5, %v2951_v7  ;;  %v1031_v21 = vld [vmem:[#allocation2 + $0x10] sm:$0xff]  ;;  %v1032_v23 = vld [vmem:[#allocation2 + $0x18] sm:$0xff]  ;;  %v1333_v45 = vld [vmem:[#allocation3] sm:$0xff] }
 0x195   : > { %863 = vperm.xlu0 %2800, %v849_v4   ;;  %v852_v55 = vld [vmem:[%s3494_s6 + $0x20] sm:$0xff]  ;;  %v3274_v58 = vld [vmem:[#allocation3 + $0x18] sm:$0xff]  ;;  %v854_v61 = vld [vmem:[%s3494_s6 + $0x30] sm:$0xff] }
 0x196   : > { %873 = vperm.xlu1 %2801, %v851_v5   ;;  %v853_v0 = vld [vmem:[%s3494_s6 + $0x28] sm:$0xff]  ;;  %v855_v1 = vld [vmem:[%s3494_s6 + $0x38] sm:$0xff] }
 0x197   : > { %2601 = vmatmul.mubr.msk.f32.gmra.mxu0 %vm896_vm4, %v843_v6 }
 0x198   : > { %2603 = vmatprep.mubr.msk.f32.mxu0 %vm896_vm4, %v844_v24 }
 0x19b   : > { %2604 = vmatmul.mubr.msk.f32.gmra.mxu0 %vm896_vm4, %v845_v25 }
 0x19c   : > { %2606 = vmatprep.mubr.msk.f32.mxu0 %vm896_vm4, %v846_v26 }
 0x19f   : > { %2607 = vmatmul.mubr.msk.f32.gmra.mxu0 %vm896_vm4, %v847_v27 }
 0x1a0   : > { %2636 = vmatprep.mubr.msk.f32.mxu0 %vm2952_vm5, %v2951_v7 }
 0x20c   : > { %v859_v8 = vpop.permute.xlu0 %858 }
 0x20d   : > { %v869_v14 = vpop.permute.xlu1 %868 }
 0x210   : > { %v864_v10 = vpop.permute.xlu0 %863 }
 0x211   : > { %v874_v20 = vpop.permute.xlu1 %873 }
 0x253   : > { %v2599_v9 = vpop.f32.mrf.mxu0 }
 0x254   : > { %v996_v16 = vadd.f32 %v2599_v9, %v864_v10 }
 0x255   : > { %v990_v11 = vpop.f32.mrf.mxu0 }
 0x256   : > { %v991_v12 = vadd.f32 %v990_v11, %v859_v8 }
 0x257   : > { %v2602_v15 = vpop.f32.mrf.mxu0 }
 0x258   : > { %2610 = vmatpush3.msra.mxu1 %v991_v12  ;;  %v1006_v22 = vadd.f32 %v2602_v15, %v874_v20 }
 0x259   : > { %2612 = vmatmul.mubr.msk.f32.vlgmr.msra.gmra.mxu1 %vm1040_vm6, %v1029_v13  ;;  %2614 = vmatprep.subr.mxu1 %v2951_v7  ;;  %v1000_v17 = vpop.f32.mrf.mxu0 }
 0x25a   : > { %2615 = vmatpush3.msra.mxu1 %v996_v16  ;;  %v1001_v18 = vadd.f32 %v1000_v17, %v869_v14  ;;  %2616 = vmatprep.mubr.msk.f32.mxu1 %vm2952_vm5, %v2951_v7 }
 0x25b   : > { %2619 = vmatprep.subr.mxu1 %v2951_v7  ;;  %v2605_v5 = vpop.f32.mrf.mxu0 }
 0x25d   : > { %2617 = vmatmul.mubr.msk.f32.vlgmr.msra.gmra.mxu1 %vm1040_vm6, %v1030_v19  ;;  %v1010_v10 = vpop.f32.mrf.mxu0 }
 0x25e   : > { %2620 = vmatpush3.msra.mxu1 %v1001_v18  ;;  %2621 = vmatprep.mubr.msk.f32.mxu1 %vm2952_vm5, %v2951_v7 }
 0x25f   : > { %2624 = vmatprep.subr.mxu1 %v2951_v7  ;;  %v2608_v17 = vpop.f32.mrf.mxu0 }
 0x261   : > { %2622 = vmatmul.mubr.msk.f32.vlgmr.msra.gmra.mxu1 %vm1040_vm6, %v1031_v21  ;;  %v1020_v20 = vpop.f32.mrf.mxu0 }
 0x262   : > { %2625 = vmatpush3.msra.mxu1 %v1006_v22  ;;  %2626 = vmatprep.mubr.msk.f32.mxu1 %vm2952_vm5, %v2951_v7 }
 0x263   : > { %2629 = vmatprep.subr.mxu1 %v2951_v7 }
 0x265   : > { %2627 = vmatmul.mubr.msk.f32.vlgmr.msra.gmra.mxu1 %vm1040_vm6, %v1032_v23 }
 0x266   : > { %2631 = vmatprep.mubr.msk.f32.mxu1 %vm2952_vm5, %v2951_v7 }
 0x319   : > { %v1110_v29 = vpop.f32.mrf.mxu1 }
 0x31a   : > { %v1111_v30 = vadd.f32 %v2502_v28, %v1110_v29 }
 0x31b   : > { %v2613_v31 = vpop.f32.mrf.mxu1 }
 0x31c   : > { %v1337_v32 = vsel %vm1040_vm6, %v1111_v30, -inf }
 0x31d   : > { %1338 = vmax.xlane.f32.xlu0 %v1337_v32  ;;  %v1183_v33 = vpop.f32.mrf.mxu1 }
 0x31e   : > { %v1184_v34 = vadd.f32 %v2502_v28, %v1183_v33 }
 0x31f   : > { %v2618_v35 = vpop.f32.mrf.mxu1 }
 0x320   : > { %v1340_v36 = vsel %vm1040_vm6, %v1184_v34, -inf }
 0x321   : > { %1341 = vmax.xlane.f32.xlu1 %v1340_v36  ;;  %v1256_v37 = vpop.f32.mrf.mxu1 }
 0x322   : > { %v1257_v38 = vadd.f32 %v2502_v28, %v1256_v37 }
 0x323   : > { %v2623_v39 = vpop.f32.mrf.mxu1 }
 0x324   : > { %v1343_v40 = vsel %vm1040_vm6, %v1257_v38, -inf }
 0x325   : > { %1344 = vmax.xlane.f32.xlu0 %v1343_v40  ;;  %v1329_v41 = vpop.f32.mrf.mxu1 }
 0x326   : > { %v3253_v42 = vadd.f32 %v2502_v28, %v1329_v41  ;;  %v1397_v41 = vld [vmem:[#allocation4] sm:$0xff] }
 0x327   : > { %v2628_v43 = vpop.f32.mrf.mxu1 }
 0x328   : > { %v1346_v44 = vsel %vm1040_vm6, %v3253_v42, -inf }
 0x329   : > { %1347 = vmax.xlane.f32.xlu0 %v1346_v44 }
 0x3a6   : > { %v1339_v46 = vpop.xlane.xlu0 %1338 }
 0x3a7   : > { %v1349_v47 = vmax.f32 %v1333_v45, %v1339_v46 }
 0x3a9   : > { %1766 = vst.msk [vmem:[#allocation3] sm:$0xff] %vm1421_vm7, %v1349_v47  ;;  %1367 = vperm.xlu1 %2801, %v1349_v47   ;;  %v1353_v50 = vsub.f32 %v1333_v45, %v1349_v47  ;;  %v1398_v45 = vld [vmem:[#allocation4 + $0x8] sm:$0xff] }
 0x3aa   : > { %v1342_v49 = vpop.xlane.xlu1 %1341 }
 0x3ab   : > { %v3261_v51 = vmax.f32 %v3257_v48, %v1342_v49  ;;  %v1357_v56 = vmul.f32 1.442695, %v1353_v50 }
 0x3ad   : > { %v1354_v53 = vsub.f32 %v3257_v48, %v3261_v51  ;;  %1767 = vst.msk [vmem:[#allocation3 + $0x8] sm:$0xff] %vm1421_vm7, %v3261_v51  ;;  %1372 = vperm.xlu0 %2800, %v3261_v51   ;;  %2802 = vpow2.f32 %v1357_v56  ;;  %v1399_v48 = vld [vmem:[#allocation4 + $0x10] sm:$0xff] }
 0x3ae   : > { %v1345_v54 = vpop.xlane.xlu0 %1344 }
 0x3af   : > { %v1351_v57 = vmax.f32 %v3263_v52, %v1345_v54 }
 0x3b1   : > { %v1355_v59 = vsub.f32 %v3263_v52, %v1351_v57  ;;  %1768 = vst.msk [vmem:[#allocation3 + $0x10] sm:$0xff] %vm1421_vm7, %v1351_v57  ;;  %1377 = vperm.xlu1 %2801, %v1351_v57   ;;  %878 = vperm.xlu0 %2800, %v852_v55  }
 0x3b2   : > { %v1348_v60 = vpop.xlane.xlu0 %1347 }
 0x3b3   : > { %v1352_v62 = vmax.f32 %v3274_v58, %v1348_v60  ;;  %v1361_v31 = vmul.f32 1.442695, %v1355_v59  ;;  %v1731_v60 = vld [vmem:[#allocation5 + $0x8] sm:$0xff] }
 0x3b5   : > { %v1356_v63 = vsub.f32 %v3274_v58, %v1352_v62  ;;  %1769 = vst.msk [vmem:[#allocation3 + $0x18] sm:$0xff] %vm1421_vm7, %v1352_v62  ;;  %888 = vperm.xlu0 %2800, %v854_v61   ;;  %1382 = vperm.xlu1 %2801, %v1352_v62   ;;  %v1730_v58 = vld [vmem:[#allocation5] sm:$0xff] }
 0x3b9   : > { %883 = vperm.xlu1 %2801, %v853_v0  }
 0x3ba   : > { %v3290_v2 = vpop.eup %2802 }
 0x3bd   : > { %893 = vperm.xlu1 %2801, %v855_v1  }
 0x3c1   : > { %1736 = vperm.xlu1 %2801, %v3290_v2  }
 0x424   : > { %v1368_v3 = vpop.permute.xlu1 %1367 }
 0x425   : > { %v1385_v4 = vsub.f32 %v1111_v30, %v1368_v3  ;;  %v1732_v3 = vld [vmem:[#allocation5 + $0x10] sm:$0xff] }
 0x427   : > { %v1389_v6 = vmul.f32 1.442695, %v1385_v4 }
 0x428   : > { %v1373_v8 = vpop.permute.xlu0 %1372 }
 0x429   : > { %2804 = vpow2.f32 %v1389_v6  ;;  %v1386_v9 = vsub.f32 %v1184_v34, %v1373_v8  ;;  %v1363_v34 = vmul.f32 1.442695, %v1356_v63 }
 0x42b   : > { %v1391_v11 = vmul.f32 1.442695, %v1386_v9  ;;  %v1733_v9 = vld [vmem:[#allocation5 + $0x18] sm:$0xff] }
 0x42c   : > { %v1378_v12 = vpop.permute.xlu1 %1377  ;;  %v879_v13 = vpop.permute.xlu0 %878 }
 0x42d   : > { %2806 = vpow2.f32 %v1391_v11  ;;  %v1387_v14 = vsub.f32 %v1257_v38, %v1378_v12  ;;  %v1011_v15 = vadd.f32 %v1010_v10, %v879_v13  ;;  %v1359_v38 = vmul.f32 1.442695, %v1354_v53  ;;  %v1400_v53 = vld [vmem:[#allocation4 + $0x18] sm:$0xff] }
 0x42f   : > { %v1393_v16 = vmul.f32 1.442695, %v1387_v14  ;;  %2630 = vmatpush3.xpose.msk.msra.mxu1 %vm1040_vm6, %v1011_v15 }
 0x430   : > { %v1383_v18 = vpop.permute.xlu1 %1382  ;;  %2639 = vmatprep.subr.mxu1 %v2951_v7  ;;  %v889_v22 = vpop.permute.xlu0 %888 }
 0x431   : > { %2808 = vpow2.f32 %v1393_v16  ;;  %v1388_v19 = vsub.f32 %v3253_v42, %v1383_v18  ;;  %v1021_v26 = vadd.f32 %v1020_v20, %v889_v22  ;;  %v1401_v42 = vmul.f32 %v3290_v2, %v1397_v41 }
 0x433   : > { %v1395_v21 = vmul.f32 1.442695, %v1388_v19 }
 0x434   : > { %v884_v23 = vpop.permute.xlu1 %883 }
 0x435   : > { %2810 = vpow2.f32 %v1395_v21  ;;  %v1016_v24 = vadd.f32 %v2605_v5, %v884_v23 }
 0x436   : > { %v2805_v25 = vpop.eup %2804  ;;  %2812 = vpow2.f32 %v1361_v31 }
 0x437   : > { %2632 = vmatmul.mubr.msk.f32.vlgmr.msra.gmra.mxu1 %vm1040_vm6, %v2805_v25  ;;  %2635 = vmatpush3.xpose.msk.msra.mxu0 %vm1040_vm6, %v1016_v24  ;;  %v1405_v27 = vsel %vm1040_vm6, %v2805_v25, 0.0  ;;  %2814 = vpow2.f32 %v1363_v34 }
 0x438   : > { %2640 = vmatpush3.xpose.msk.msra.mxu1 %vm1040_vm6, %v1021_v26  ;;  %1406 = vadd.xlane.f32.xlu0 %v1405_v27  ;;  %v894_v28 = vpop.permute.xlu1 %893  ;;  %2816 = vpow2.f32 %v1359_v38 }
 0x439   : > { %v1026_v29 = vadd.f32 %v2608_v17, %v894_v28  ;;  %2644 = vmatprep.subr.mxu0 %v2951_v7  ;;  %2641 = vmatprep.mubr.msk.f32.mxu1 %vm2952_vm5, %v2951_v7 }
 0x43a   : > { %v2807_v30 = vpop.eup %2806 }
 0x43b   : > { %2637 = vmatmul.mubr.msk.f32.vlgmr.msra.gmra.mxu0 %vm1040_vm6, %v2807_v30  ;;  %v1408_v32 = vsel %vm1040_vm6, %v2807_v30, 0.0 }
 0x43c   : > { %2645 = vmatpush3.xpose.msk.msra.mxu0 %vm1040_vm6, %v1026_v29  ;;  %1409 = vadd.xlane.f32.xlu1 %v1408_v32  ;;  %v1737_v43 = vpop.permute.xlu1 %1736 }
 0x43d   : > { %2646 = vmatprep.mubr.msk.f32.mxu0 %vm2952_vm5, %v2951_v7  ;;  %v1754_v59 = vmul.f32 %v1737_v43, %v1730_v58 }
 0x43e   : > { %v2809_v33 = vpop.eup %2808 }
 0x43f   : > { %2642 = vmatmul.mubr.msk.f32.vlgmr.msra.gmra.mxu1 %vm1040_vm6, %v2809_v33  ;;  %v1411_v35 = vsel %vm1040_vm6, %v2809_v33, 0.0 }
 0x440   : > { %1412 = vadd.xlane.f32.xlu0 %v1411_v35 }
 0x442   : > { %v2811_v36 = vpop.eup %2810 }
 0x443   : > { %2647 = vmatmul.mubr.msk.f32.vlgmr.msra.gmra.mxu0 %vm1040_vm6, %v2811_v36  ;;  %v1414_v37 = vsel %vm1040_vm6, %v2811_v36, 0.0  ;;  %v2813_v7 = vpop.eup %2812 }
 0x444   : > { %1415 = vadd.xlane.f32.xlu0 %v1414_v37  ;;  %v2815_v39 = vpop.eup %2814  ;;  %v1403_v51 = vmul.f32 %v2813_v7, %v1399_v48 }
 0x445   : > { %v2817_v40 = vpop.eup %2816  ;;  %v1404_v55 = vmul.f32 %v2815_v39, %v1400_v53 }
 0x446   : > { %v1402_v47 = vmul.f32 %v2817_v40, %v1398_v45 }
 0x44d   : > { %1746 = vperm.xlu1 %2801, %v2813_v7  }
 0x451   : > { %1751 = vperm.xlu1 %2801, %v2815_v39  }
 0x45a   : > { %1741 = vperm.xlu0 %2800, %v2817_v40  }
 0x4c1   : > { %v1407_v44 = vpop.xlane.xlu0 %1406 }
 0x4c2   : > { %v1417_v46 = vadd.f32 %v1407_v44, %v1401_v42 }
 0x4c4   : > { %1422 = vst.msk [vmem:[#allocation4] sm:$0xff] %vm1421_vm7, %v1417_v46 }
 0x4c5   : > { %v1410_v49 = vpop.xlane.xlu1 %1409 }
 0x4c6   : > { %v1418_v50 = vadd.f32 %v1410_v49, %v1402_v47 }
 0x4c8   : > { %1423 = vst.msk [vmem:[#allocation4 + $0x8] sm:$0xff] %vm1421_vm7, %v1418_v50 }
 0x4c9   : > { %v1413_v52 = vpop.xlane.xlu0 %1412  ;;  %v1747_v0 = vpop.permute.xlu1 %1746 }
 0x4ca   : > { %v1419_v54 = vadd.f32 %v1413_v52, %v1403_v51  ;;  %v1756_v8 = vmul.f32 %v1747_v0, %v1732_v3 }
 0x4cc   : > { %1424 = vst.msk [vmem:[#allocation4 + $0x10] sm:$0xff] %vm1421_vm7, %v1419_v54 }
 0x4cd   : > { %v1416_v56 = vpop.xlane.xlu0 %1415  ;;  %v1752_v10 = vpop.permute.xlu1 %1751 }
 0x4ce   : > { %v1420_v57 = vadd.f32 %v1416_v56, %v1404_v55  ;;  %v1757_v14 = vmul.f32 %v1752_v10, %v1733_v9 }
 0x4d0   : > { %1425 = vst.msk [vmem:[#allocation4 + $0x18] sm:$0xff] %vm1421_vm7, %v1420_v57 }
 0x4d5   : > { %v1742_v61 = vpop.permute.xlu0 %1741 }
 0x4d6   : > { %v1755_v2 = vmul.f32 %v1742_v61, %v1731_v60 }
 0x4f7   : > { %v1498_v62 = vpop.f32.mrf.mxu1 }
 0x4f8   : > { %v1758_v63 = vadd.f32 %v1754_v59, %v1498_v62 }
 0x4f9   : > { %v2633_v1 = vpop.f32.mrf.mxu1 }
 0x4fa   : > { %1762 = vst.msk [vmem:[#allocation5] sm:$0xff] %vm1040_vm6, %v1758_v63 }
 0x4fb   : > { %v1574_v4 = vpop.f32.mrf.mxu0 }
 0x4fc   : > { %v1759_v5 = vadd.f32 %v1755_v2, %v1574_v4 }
 0x4fd   : > { %v2638_v6 = vpop.f32.mrf.mxu0 }
 0x4fe   : > { %1763 = vst.msk [vmem:[#allocation5 + $0x8] sm:$0xff] %vm1040_vm6, %v1759_v5 }
 0x4ff   : > { %v1650_v11 = vpop.f32.mrf.mxu1 }
 0x500   : > { %v1760_v12 = vadd.f32 %v1756_v8, %v1650_v11 }
 0x501   : > { %v2643_v13 = vpop.f32.mrf.mxu1 }
 0x502   : > { %1764 = vst.msk [vmem:[#allocation5 + $0x10] sm:$0xff] %vm1040_vm6, %v1760_v12  ;;  %1773 = sbr.rel (%p2515_p3) target bundleno = 2650 (0xa5a), region = 88 }
 0x503   : > { %v1726_v15 = vpop.f32.mrf.mxu0 }
 0x504   : > { %v1761_v16 = vadd.f32 %v1757_v14, %v1726_v15 }
 0x505   : > { %v2648_v17 = vpop.f32.mrf.mxu0 }
 0x506   : > { %1765 = vst.msk [vmem:[#allocation5 + $0x18] sm:$0xff] %vm1040_vm6, %v1761_v16 }
 0x507   : > { %v1782_v18 = vld [vmem:[#allocation4 + $0x10] sm:$0xff]  ;;  %v1780_v19 = vld [vmem:[#allocation4] sm:$0xff]  ;;  %v1783_v20 = vld [vmem:[#allocation4 + $0x18] sm:$0xff]  ;;  %v2953_v21 = vmov 0   ;;  %v2954_v23 = vmov 0.0   ;;  %vm2955_vm8 = vmmov 0  }
 0x508   : > { %2819 = vset.pattern.permute.xlu1 %v2953_v21  ;;  %2818 = vset.pattern.permute.xlu0 %v2953_v21  ;;  %2820 = vrcp.f32 %v1782_v18  ;;  %v1781_v22 = vld [vmem:[#allocation4 + $0x8] sm:$0xff]  ;;  %v1812_v24 = vld [vmem:[%s3495_s7] sm:$0xff]  ;;  %v1815_v28 = vld [vmem:[%s3495_s7 + $0x18] sm:$0xff]  ;;  %vm2253_vm9 = vcmask 523264  }
 0x509   : > { %2822 = vrcp.f32 %v1780_v19  ;;  %2649 = vmatprep.subr.mxu0 %v2954_v23  ;;  %2664 = vmatprep.subr.mxu1 %v2954_v23  ;;  %v1776_v30 = vld [vmem:[#allocation5] sm:$0xff]  ;;  %v1813_v34 = vld [vmem:[%s3495_s7 + $0x8] sm:$0xff]  ;;  %v1814_v40 = vld [vmem:[%s3495_s7 + $0x10] sm:$0xff] }
 0x50a   : > { %2824 = vrcp.f32 %v1783_v20  ;;  %2650 = vmatpush3.msra.mxu0 %v1812_v24  ;;  %2651 = vmatprep.mubr.msk.f32.mxu0 %vm2955_vm8, %v2954_v23  ;;  %v1777_v36 = vld [vmem:[#allocation5 + $0x8] sm:$0xff]  ;;  %v1778_v41 = vld [vmem:[#allocation5 + $0x10] sm:$0xff]  ;;  %v2520_v57 = vld [vmem:[%s3496_s8] ss:$0 sm:$0xff] }
 0x50b   : > { %2826 = vrcp.f32 %v1781_v22  ;;  %2654 = vmatprep.subr.mxu0 %v2954_v23  ;;  %2666 = vmatprep.mubr.msk.f32.mxu1 %vm2955_vm8, %v2954_v23  ;;  %v2123_v59 = vld [vmem:[%s3135_s20] sm:$0xff]  ;;  %v2156_v4 = vld [vmem:[%s3497_s9 + $0x18] sm:$0xff]  ;;  %v2155_v5 = vld [vmem:[%s3497_s9 + $0x10] sm:$0xff] }
 0x50c   : > { %2665 = vmatpush3.msra.mxu1 %v1815_v28  ;;  %v2154_v6 = vld [vmem:[%s3497_s9 + $0x8] sm:$0xff]  ;;  %v2153_v8 = vld [vmem:[%s3497_s9] sm:$0xff]  ;;  %v2245_v9 = vld [vmem:[%s3499_s11 + $0x38] sm:$0xff] }
 0x50d   : > { %2680 = vmatprep.subr.mxu1 %v2954_v23  ;;  %v1779_v35 = vld [vmem:[#allocation5 + $0x18] sm:$0xff]  ;;  %v2244_v10 = vld [vmem:[%s3499_s11 + $0x30] sm:$0xff]  ;;  %v2243_v11 = vld [vmem:[%s3499_s11 + $0x28] sm:$0xff] }
 0x50e   : > { %v2242_v12 = vld [vmem:[%s3499_s11 + $0x20] sm:$0xff]  ;;  %v2241_v13 = vld [vmem:[%s3499_s11 + $0x18] sm:$0xff]  ;;  %v2240_v24 = vld [vmem:[%s3499_s11 + $0x10] sm:$0xff] }
 0x50f   : > { %v2521_v18 = vld [vmem:[%s3501_s13] ss:$0 sm:$0xff] }
 0x510   : > { %v2522_v20 = vld [vmem:[%s3502_s14] ss:$0 sm:$0xff] }
 0x515   : > { %v2821_v25 = vpop.eup %2820 }
 0x516   : > { %v2823_v26 = vpop.eup %2822  ;;  %1800 = vperm.xlu1 %2819, %v2821_v25   ;;  %v2239_v25 = vld [vmem:[%s3499_s11 + $0x8] sm:$0xff] }
 0x517   : > { %v2825_v27 = vpop.eup %2824  ;;  %1790 = vperm.xlu0 %2818, %v2823_v26   ;;  %v2238_v26 = vld [vmem:[%s3499_s11] sm:$0xff] }
 0x518   : > { %v2827_v29 = vpop.eup %2826 }
 0x51a   : > { %1805 = vperm.xlu1 %2819, %v2825_v27   ;;  %v2523_v27 = vld [vmem:[%s3498_s10] ss:$0 sm:$0xff] }
 0x51b   : > { %1795 = vperm.xlu0 %2818, %v2827_v29  }
 0x591   : > { %v1801_v31 = vpop.permute.xlu1 %1800 }
 0x592   : > { %v1791_v32 = vpop.permute.xlu0 %1790  ;;  %v1810_v42 = vmul.f32 %v1801_v31, %v1778_v41 }
 0x593   : > { %v1808_v33 = vmul.f32 %v1791_v32, %v1776_v30  ;;  %v2525_v32 = vld [vmem:[%s3544_s15] ss:$0 sm:$0xff] }
 0x595   : > { %2652 = vmatmul.mubr.msk.f32.vlgmr.msra.gmra.mxu0 %vm1040_vm6, %v1808_v33  ;;  %v1806_v37 = vpop.permute.xlu1 %1805 }
 0x596   : > { %2655 = vmatpush3.msra.mxu0 %v1813_v34  ;;  %v1811_v38 = vmul.f32 %v1806_v37, %v1779_v35  ;;  %v1796_v7 = vpop.permute.xlu0 %1795  ;;  %2656 = vmatprep.mubr.msk.f32.mxu0 %vm2955_vm8, %v2954_v23 }
 0x597   : > { %v1809_v39 = vmul.f32 %v1796_v7, %v1777_v36  ;;  %2659 = vmatprep.subr.mxu0 %v2954_v23 }
 0x598   : > { %2667 = vmatmul.mubr.msk.f32.vlgmr.msra.gmra.mxu1 %vm1040_vm6, %v1811_v38 }
 0x599   : > { %2657 = vmatmul.mubr.msk.f32.vlgmr.msra.gmra.mxu0 %vm1040_vm6, %v1809_v39  ;;  %2696 = vmatprep.mubr.msk.f32.mxu1 %vm2955_vm8, %v2954_v23 }
 0x59a   : > { %2660 = vmatpush3.msra.mxu0 %v1814_v40  ;;  %2661 = vmatprep.mubr.msk.f32.mxu0 %vm2955_vm8, %v2954_v23 }
 0x59b   : > { %2669 = vmatprep.subr.mxu0 %v2954_v23  ;;  %2681 = vmatpush3.msra.mxu1 %v2245_v9 }
 0x59c   : > { %2682 = vmatprep.subr.mxu1 %v2954_v23 }
 0x59d   : > { %2662 = vmatmul.mubr.msk.f32.vlgmr.msra.gmra.mxu0 %vm1040_vm6, %v1810_v42  ;;  %2683 = vmatpush3.msra.mxu1 %v2244_v10 }
 0x59e   : > { %2677 = vmatprep.mubr.msk.f32.mxu0 %vm2955_vm8, %v2954_v23  ;;  %2670 = vmatpush3.msra.mxu0 %v2156_v4 }
 0x59f   : > { %2671 = vmatprep.subr.mxu0 %v2954_v23  ;;  %2684 = vmatprep.subr.mxu1 %v2954_v23 }
 0x5a0   : > { %2672 = vmatpush3.msra.mxu0 %v2155_v5  ;;  %2685 = vmatpush3.msra.mxu1 %v2243_v11 }
 0x5a1   : > { %2673 = vmatprep.subr.mxu0 %v2954_v23  ;;  %2686 = vmatprep.subr.mxu1 %v2954_v23 }
 0x5a2   : > { %2674 = vmatpush3.msra.mxu0 %v2154_v6  ;;  %2687 = vmatpush3.msra.mxu1 %v2242_v12 }
 0x5a3   : > { %2675 = vmatprep.subr.mxu0 %v2954_v23  ;;  %2688 = vmatprep.subr.mxu1 %v2954_v23 }
 0x5a4   : > { %2676 = vmatpush3.msra.mxu0 %v2153_v8  ;;  %2689 = vmatpush3.msra.mxu1 %v2241_v13 }
 0x5a5   : > { %2690 = vmatprep.subr.mxu1 %v2954_v23 }
 0x5a6   : > { %2691 = vmatpush3.msra.mxu1 %v2240_v24 }
 0x5a7   : > { %2692 = vmatprep.subr.mxu1 %v2954_v23 }
 0x5a8   : > { %2693 = vmatpush3.msra.mxu1 %v2239_v25 }
 0x5a9   : > { %2694 = vmatprep.subr.mxu1 %v2954_v23 }
 0x5aa   : > { %2695 = vmatpush3.msra.mxu1 %v2238_v26 }
 0x655   : > { %v1885_v43 = vpop.f32.mrf.mxu0 }
 0x656   : > { %v2108_v50 = vsel %vm896_vm4, %v1885_v43, 0.0 }
 0x657   : > { %v2653_v44 = vpop.f32.mrf.mxu0 }
 0x658   : > { %v2104_v45 = vpop.f32.mrf.mxu1 }
 0x659   : > { %v1958_v46 = vpop.f32.mrf.mxu0  ;;  %v2113_v56 = vsel %vm896_vm4, %v2104_v45, 0.0 }
 0x65a   : > { %v2109_v47 = vsel %vm896_vm4, %v1958_v46, 0.0  ;;  %v2668_v49 = vpop.f32.mrf.mxu1 }
 0x65b   : > { %v2658_v48 = vpop.f32.mrf.mxu0  ;;  %v2110_v51 = vadd.f32 %v2109_v47, %v2108_v50 }
 0x65d   : > { %v2031_v52 = vpop.f32.mrf.mxu0 }
 0x65e   : > { %v2111_v53 = vsel %vm896_vm4, %v2031_v52, 0.0 }
 0x65f   : > { %v2112_v54 = vadd.f32 %v2111_v53, %v2110_v51  ;;  %v2663_v55 = vpop.f32.mrf.mxu0 }
 0x661   : > { %v2114_v58 = vadd.f32 %v2113_v56, %v2112_v54 }
 0x663   : > { %v2122_v60 = vadd.f32 %v2520_v57, %v2114_v58 }
 0x665   : > { %v2124_v61 = vadd.f32 %v2123_v59, %v2122_v60 }
 0x667   : > { %v2125_v62 = vsel %vm896_vm4, %v2124_v61, 0.0 }
 0x668   : > { %2126 = vadd.xlane.f32.xlu0 %v2125_v62 }
 0x6f1   : > { %v2127_v63 = vpop.xlane.xlu0 %2126 }
 0x6f2   : > { %v2129_v0 = vmul.f32 0.03125, %v2127_v63 }
 0x6f4   : > { %v2130_v1 = vsub.f32 %v2124_v61, %v2129_v0 }
 0x6f6   : > { %v2131_v2 = vmul.f32 %v2130_v1, %v2130_v1 }
 0x6f8   : > { %v2132_v3 = vsel %vm896_vm4, %v2131_v2, 0.0 }
 0x6f9   : > { %2133 = vadd.xlane.f32.xlu1 %v2132_v3 }
 0x782   : > { %v2134_v14 = vpop.xlane.xlu1 %2133 }
 0x783   : > { %v2135_v15 = vmul.f32 0.03125, %v2134_v14 }
 0x785   : > { %v2136_v16 = vadd.f32 1e-05, %v2135_v15 }
 0x787   : > { %2828 = vrsqrt.f32 %v2136_v16 }
 0x794   : > { %v2829_v17 = vpop.eup %2828 }
 0x795   : > { %v2138_v19 = vmul.f32 %v2829_v17, %v2130_v1 }
 0x797   : > { %v2145_v21 = vmul.f32 %v2521_v18, %v2138_v19 }
 0x799   : > { %v2152_v22 = vadd.f32 %v2522_v20, %v2145_v21 }
 0x79b   : > { %2678 = vmatmul.mubr.msk.f32.vlgmr.msra.gmra.mxu0 %vm896_vm4, %v2152_v22 }
 0x85b   : > { %v2233_v28 = vpop.f32.mrf.mxu0 }
 0x85c   : > { %v2234_v29 = vadd.f32 %v2523_v27, %v2233_v28 }
 0x85d   : > { %v2679_v30 = vpop.f32.mrf.mxu0 }
 0x85e   : > { %v2237_v31 = vmax.f32 %v2234_v29, 0.0 }
 0x860   : > { %2697 = vmatmul.mubr.msk.f32.vlgmr.msra.gmra.mxu1 %vm2253_vm9, %v2237_v31 }
 0x920   : > { %v2323_v23 = vpop.f32.mrf.mxu1 }
 0x921   : > { %v2324_v33 = vadd.f32 %v2525_v32, %v2323_v23 }
 0x922   : > { %v2698_v34 = vpop.f32.mrf.mxu1 }
 0x923   : > { %v2327_v35 = vadd.f32 %v2324_v33, %v2152_v22 }
 0x925   : > { %v2328_v36 = vsel %vm896_vm4, %v2327_v35, 0.0 }
 0x926   : > { %2329 = vadd.xlane.f32.xlu0 %v2328_v36 }
 0x9af   : > { %v2330_v37 = vpop.xlane.xlu0 %2329 }
 0x9b0   : > { %v2331_v38 = vmul.f32 0.03125, %v2330_v37 }
 0x9b2   : > { %v2332_v7 = vsub.f32 %v2327_v35, %v2331_v38 }
 0x9b4   : > { %v2333_v39 = vmul.f32 %v2332_v7, %v2332_v7 }
 0x9b6   : > { %v2334_v40 = vsel %vm896_vm4, %v2333_v39, 0.0 }
 0x9b7   : > { %2335 = vadd.xlane.f32.xlu0 %v2334_v40 }
 0xa40   : > { %v2336_v41 = vpop.xlane.xlu0 %2335 }
 0xa41   : > { %v2337_v42 = vmul.f32 0.03125, %v2336_v41 }
 0xa43   : > { %v2338_v43 = vadd.f32 1e-05, %v2337_v42 }
 0xa45   : > { %2830 = vrsqrt.f32 %v2338_v43 }
 0xa52   : > { %v2831_v44 = vpop.eup %2830 }
 0xa53   : > { %v2340_v45 = vmul.f32 %v2831_v44, %v2332_v7 }
 0xa55   : > { %v2341_v46 = vmul.f32 %v2521_v18, %v2340_v45 }
 0xa57   : > { %v2342_v47 = vadd.f32 %v2522_v20, %v2341_v46 }
 0xa59   : > { %2343 = vst.msk [vmem:[%s560_s29] sm:$0xff] %vm896_vm4, %v2342_v47 }
 0xa5a PF: > { %s3545_s24 = sld [smem:[#allocation13_spill]]  ;;  %s2360_s26 = sshll.u32 %s560_s29, 4  ;;  %s2361_s26 = int_to_ptr.vmem [resolvable:$true] %s2360_s26 }
 0xa5b   : > { %s3546_s20 = sld [smem:[#allocation12_spill]]  ;;  %s2832_s15 = scalar_lea.vmem %s2361_s26, 128 }
 0xa5c   : > { %s3547_s12 = sld [smem:[#allocation10_spill]]  ;;  %p2833_p4 = scmp.ne.s32.totalorder %s2361_s26, %s2832_s15 }
 0xa5d   : > { %s3549_s17 = sld [smem:[#allocation27_spill]]  ;;  %s2956_s0 = smov [#allocation6]  }
 0xa5e   : > { %p2834_p5 = pnand %p2833_p4, %p3099_p6  ;;  %s2836_s1 = sshll.u32 %s2956_s0, 4  ;;  %s2837_s1 = int_to_ptr.vmem [resolvable:$false] %s2836_s1 }
 0xa5f   : > { %p2839_p9 = scmp.lt.s32.totalorder %s2361_s26, %s2837_s1 }
 0xa60   : > { %s2528_s21 = sshll.u32 %s3545_s24, 1  ;;  %p2835_p8 = pneg %p2834_p5 }
 0xa61   : > { %s2356_s22 = sadd.s32 %s3546_s20, %s2528_s21  ;;  %s2838_s24 = scalar_lea.vmem %s2837_s1, 256 }
 0xa62   : > { %s2529_s16 = sshll.u32 %s2356_s22, 7  ;;  %s3550_s30 = sand.u32 1, %s3547_s12  }
 0xa63   : > { %s2358_s18 = scalar_lea.hbm %s3549_s17, %s2529_s16  ;;  %s2345_s28 = scalar_lea.sflag [#allocation7], %s3550_s30 }
 0xa64   : > { %p2840_p10 = scmp.lt.s32.totalorder %s2838_s24, %s2832_s15 }
 0xa66   : > { %p2841_p11 = por %p2840_p10, %p2839_p9 }
 0xa68   : > { %p2842_p12 = pnand %p2841_p11, %p2835_p8 }
 0xa6a   : > { %2845 = shalt.err (!%p2842_p12)
}
 0xa6b   : > { %s2846_s25 = scalar_lea.hbm %s2358_s18, 128  ;;  %s2850_s12 = scalar_lea.hbm %s3549_s17, 512 }
 0xa6c   : > { %p2847_p13 = scmp.ne.s32.totalorder %s2358_s18, %s2846_s25  ;;  %p2851_p2 = scmp.lt.s32.totalorder %s2358_s18, %s3549_s17 }
 0xa6d   : > { %p2852_p3 = scmp.lt.s32.totalorder %s2850_s12, %s2846_s25 }
 0xa6e   : > { %p2848_p0 = pnand %p2847_p13, %p3099_p6 }
 0xa6f   : > { %p2853_p4 = por %p2852_p3, %p2851_p2 }
 0xa70   : > { %p2849_p1 = pneg %p2848_p0 }
 0xa72   : > { %p2854_p5 = pnand %p2853_p4, %p2849_p1 }
 0xa74   : > { %2857 = shalt.err (!%p2854_p5)
}
 0xa75   : > { %2699 = dma.vmem_to_hbm [thread:$0]  (%p3099_p6), %s2361_s26, 128, %s2358_s18, %s2345_s28  }
 0xa76 PF: > { %s3551_s0 = sld [smem:[#allocation17_spill]] }
 0xa77   : > { %s3552_s1 = sld [smem:[#allocation9_spill]] }
 0xa7c   : > { %p2705_p8 = scmp.ge.s32.totalorder %s3551_s0, 2 }
 0xa7d   : > { %s2372_s23 = sand.u32 1, %s3552_s1  }
 0xa7e   : > { %p2702_p9 = pnand %p2705_p8, %p3106_p7  ;;  %s2373_s27 = scalar_lea.sflag [#allocation7], %s2372_s23 }
 0xa80   : > { %p2703_p10 = pneg %p2702_p9 }
 0xa82   : > { %2899 = dma.done.wait (%p2703_p10), %s2373_s27, 128  }
 0xa83   : > { %2901 = vsyncadd (%p2703_p10), %s2373_s27, 4294967168  ;;  %s28_s27 = sadd.s32 1, %s3551_s0   ;;  %s3554_s18 = sld [smem:[#allocation10_spill]] }
 0xa84   : > { %p25_p11 = scmp.ge.s32.totalorder %s28_s27, 10   ;;  %s3555_s19 = sld [smem:[#allocation11_spill]] }
 0xa85   : > { %s3556_s20 = sld [smem:[#allocation23_spill]] }
 0xa86   : > { %s3557_s21 = sld [smem:[#allocation14_spill]] }
 0xa87   : > { %s3558_s22 = sld [smem:[#allocation15_spill]]  ;;  %27 = sbr.rel (!%p25_p11) target bundleno = 11 (0xb), region = 129 }
 0xa88   : > { %s3559_s23 = sld [smem:[#allocation16_spill]] }
 0xa89   : > { %s3560_s24 = sld [smem:[#allocation18_spill]] }
 0xa8a   : > { %s3561_s25 = sld [smem:[#allocation20_spill]] }
 0xa8b   : > { %s3562_s26 = sld [smem:[#allocation22_spill]] }
 0xa8c   :  { %2378 = vsyncpa [#allocation7], 1 }
 0xa8d   :  { %2380 = vsyncpa [#allocation7 + $0x1], 1 }

</bundles_post_ra>
